<compile_context>
chip_gen: v7x
topology: tpu7x:2x2x1
jax: 0.10.0
libtpu: 0.0.40
codegen_flags: <defaults>
</compile_context>

<pallas_src>
import numpy as np
import jax
import jax.numpy as jnp
from jax.experimental import pallas as pl
from jax.experimental.pallas import tpu as pltpu

EPS = 1e-5  # PyTorch LayerNorm default eps


# --------------------------------------------------------------------------
# in-kernel building blocks
# --------------------------------------------------------------------------

def _layernorm(x, gamma, beta):
    mu = jnp.mean(x, axis=-1, keepdims=True)
    var = jnp.mean(jnp.square(x - mu), axis=-1, keepdims=True)
    return (x - mu) * jax.lax.rsqrt(var + EPS) * gamma + beta


def _ffn_gate(xin, w1_ref, b1_ref, w2cat_ref, bcat_ref, h):
    """FeedForwardLayer + GatedAttn over the hidden axis (fc2 + gate folded)."""
    # TODO(synk): PyTorch F.gelu defaults to the exact erf GELU; the tanh approximation
    # is used because erf is not a guaranteed Mosaic lowering.
    h1 = jax.nn.gelu(
        jnp.dot(xin, w1_ref[...], preferred_element_type=jnp.float32) + b1_ref[...],
        approximate=True)
    yg = jnp.dot(h1, w2cat_ref[...], preferred_element_type=jnp.float32) + bcat_ref[...]
    y, g = yg[:, :h], yg[:, h:]
    return y * jax.nn.silu(g)


def _build_stack_kernel(meta, n, h, df):
    """Kernel processing one batch element's full layer stack on a (nodes*patches, h) slab."""
    n_out = len(meta)

    def kernel(*refs):
        in_refs = refs[:len(refs) - n_out]
        out_refs = refs[len(refs) - n_out:]
        pos = [1]                                   # refs[0] is the activation slab

        def take(k):
            i = pos[0]
            pos[0] = i + k
            return in_refs[i:i + k]

        x = in_refs[0][...].astype(jnp.float32)     # (n*pt0, h)
        for l, m in enumerate(meta):
            pt = m["pt"]
            rows = n * pt

            # ---- TemporalMixerBlock: patch mixing as left matmuls (lane axis = h) ----
            if m["has_temporal"]:
                lg, lb, m1, b1c, m2c, bc = take(6)
                xn = _layernorm(x, lg[...], lb[...])
                h1 = jax.nn.gelu(
                    jnp.dot(m1[...], xn, preferred_element_type=jnp.float32) + b1c[...],
                    approximate=True)
                yg = jnp.dot(m2c[...], h1, preferred_element_type=jnp.float32) + bc[...]
                x = yg[:rows] * jax.nn.silu(yg[rows:]) + x

            # ---- DimensionMixerBlock: LN -> FFN -> gate -> residual ----
            lg, lb, w1, b1, w2c, bc = take(6)
            x = _ffn_gate(_layernorm(x, lg[...], lb[...]), w1, b1, w2c, bc, h) + x

            # ---- GraphMixerBlock: LN -> kron(a_norm, I_pt) aggregation -> FFN -> gate ----
            lg, lb, ak, w1, b1, w2c, bc = take(7)
            xn = _layernorm(x, lg[...], lb[...])
            agg = jnp.dot(ak[...], xn, preferred_element_type=jnp.float32)
            x = _ffn_gate(agg, w1, b1, w2c, bc, h) + x

            out_refs[l][...] = x.astype(out_refs[l].dtype)

            # ---- DownSample fused into the layer epilogue ----
            if m["has_downsample"]:
                sels = take(df)
                wd, bd = take(2)
                acc = jnp.zeros((rows // df, h), jnp.float32)
                for j in range(df):
                    xj = jnp.dot(sels[j][...], x, preferred_element_type=jnp.float32)
                    acc = acc + jnp.dot(xj, wd[j * h:(j + 1) * h, :],
                                        preferred_element_type=jnp.float32)
                x = acc + bd[...]

    return kernel


# --------------------------------------------------------------------------
# host-side operand preparation (tiny, done once under jit)
# --------------------------------------------------------------------------

def _const_spec(arr):
    zeros = (0,) * arr.ndim
    return pl.BlockSpec(arr.shape, lambda i, _z=zeros: _z)


def _prep_temporal(p, n):
    """Patch-mixing FFN+gate as row-mixing (left-matmul) matrices; fc2+gate folded."""
    w1, b1, w2, b2, wg, bg = p["w1"], p["b1"], p["w2"], p["b2"], p["wg"], p["bg"]
    eye_n = jnp.eye(n, dtype=jnp.float32)
    m1 = jnp.kron(eye_n, w1.T)                                        # (n*pt*e, n*pt)
    b1c = jnp.tile(b1, n).reshape(-1, 1)
    m2cat = jnp.concatenate([jnp.kron(eye_n, w2.T),
                             jnp.kron(eye_n, (w2 @ wg).T)], axis=0)   # (2*n*pt, n*pt*e)
    bcat = jnp.concatenate([jnp.tile(b2, n),
                            jnp.tile(b2 @ wg + bg, n)]).reshape(-1, 1)
    return [p["ln_g"].reshape(1, -1), p["ln_b"].reshape(1, -1), m1, b1c, m2cat, bcat]


def _prep_channel(p):
    """Hidden-dim FFN+gate (right matmuls); fc2+gate folded into [W2 | W2@Wg]."""
    w2cat = jnp.concatenate([p["w2"], p["w2"] @ p["wg"]], axis=1)     # (h*e, 2h)
    bcat = jnp.concatenate([p["b2"], p["b2"] @ p["wg"] + p["bg"]]).reshape(1, -1)
    return [p["ln_g"].reshape(1, -1), p["ln_b"].reshape(1, -1),
            p["w1"], p["b1"].reshape(1, -1), w2cat, bcat]


def _prep_downsample(p, n, pt, df):
    """DownSample as df row-selection matrices + the (h*df, h) linear."""
    ops = []
    for j in range(df):
        e = np.zeros((pt // df, pt), np.float32)
        e[np.arange(pt // df), np.arange(pt // df) * df + j] = 1.0
        ops.append(jnp.asarray(np.kron(np.eye(n, dtype=np.float32), e)))
    ops.append(p["w"])                       # (h*df, h)
    ops.append(p["b"].reshape(1, -1))        # (1, h)
    return ops


# --------------------------------------------------------------------------
# fused forward pass (single pallas_call for the whole stack)
# --------------------------------------------------------------------------

def multiscale_encoding(x, adj, params, args):
    b, n, pt0, h = x.shape
    df = int(args["downsample_factor"])
    num_layers = int(args["num_layers"])

    # Row-normalized adjacency (matches PyTorch exactly: no epsilon).
    a_norm = adj.astype(jnp.float32) / jnp.sum(adj.astype(jnp.float32), axis=1,
                                               keepdims=True)

    meta, operands, out_pts = [], [], []
    pt = pt0
    for l in range(num_layers):
        lp = params["mixers"][l]
        m = dict(pt=pt, has_temporal=pt > 1)
        if m["has_temporal"]:
            operands += _prep_temporal(lp["temporal"], n)
        operands += _prep_channel(lp["feature"])
        gops = _prep_channel(lp["graph"])
        akron = jnp.kron(a_norm, jnp.eye(pt, dtype=jnp.float32))      # (n*pt, n*pt)
        operands += gops[:2] + [akron] + gops[2:]
        out_pts.append(pt)
        m["has_downsample"] = (l < num_layers - 1) and (pt > 1)
        if m["has_downsample"]:
            operands += _prep_downsample(params["downsamples"][l], n, pt, df)
            pt //= df
        meta.append(m)

    x2 = x.reshape(b, n * pt0, h)
    in_specs = [pl.BlockSpec((None, n * pt0, h), lambda i: (i, 0, 0))]
    in_specs += [_const_spec(op) for op in operands]
    out_shape = [jax.ShapeDtypeStruct((b, n * p, h), x.dtype) for p in out_pts]
    out_specs = [pl.BlockSpec((None, n * p, h), lambda i: (i, 0, 0)) for p in out_pts]

    outs = pl.pallas_call(
        _build_stack_kernel(meta, n, h, df),
        out_shape=out_shape,
        grid=(b,),
        in_specs=in_specs,
        out_specs=out_specs,
        compiler_params=pltpu.CompilerParams(dimension_semantics=("parallel",)),
    )(x2, *operands)
    if not isinstance(outs, (list, tuple)):
        outs = [outs]
    x_all = [o.reshape(b, n, p, h) for o, p in zip(outs, out_pts)]
    return x_all[-1], x_all


# --------------------------------------------------------------------------
# deterministic parameter init (shapes follow the PyTorch __init__)
# --------------------------------------------------------------------------

def init_params(key, args):
    h = int(args["hidden_dim"])
    exp = int(args["expansion_factor"])
    df = int(args["downsample_factor"])

    def lin(k, din, dout):
        w = jax.random.normal(k, (din, dout), jnp.float32) * 0.02
        return w, jnp.zeros((dout,), jnp.float32)

    def mixer_block(k, d):
        k1, k2, k3 = jax.random.split(k, 3)
        w1, b1 = lin(k1, d, d * exp)
        w2, b2 = lin(k2, d * exp, d)
        wg, bg = lin(k3, d, d)
        return dict(ln_g=jnp.ones((h,), jnp.float32),
                    ln_b=jnp.zeros((h,), jnp.float32),
                    w1=w1, b1=b1, w2=w2, b2=b2, wg=wg, bg=bg)

    mixers = []
    for i in range(int(args["num_layers"])):
        p_i = max(int(args["num_patches"]) // (2 ** i), 1)
        key, kt, kf, kg = jax.random.split(key, 4)
        mixers.append(dict(temporal=mixer_block(kt, p_i),
                           feature=mixer_block(kf, h),
                           graph=mixer_block(kg, h)))

    downsamples = []
    for _ in range(int(args["num_layers"]) - 1):
        key, kd = jax.random.split(key)
        w, b = lin(kd, h * df, h)
        downsamples.append(dict(w=w, b=b))

    return dict(mixers=mixers, downsamples=downsamples)


# --------------------------------------------------------------------------

if __name__ == "__main__":
    args = dict(hidden_dim=32, num_patches=4, num_layers=3, downsample_factor=2,
                expansion_factor=2, dropout=0.0, gated_attn=True)
    batch, nodes = 2, 4

    key = jax.random.PRNGKey(0)
    kx, ka, kp = jax.random.split(key, 3)
    x = jax.random.normal(kx, (batch, nodes, args["num_patches"], args["hidden_dim"]),
                          jnp.float32)
    adj = jax.random.uniform(ka, (nodes, nodes), jnp.float32, minval=0.1, maxval=1.0)
    params = init_params(kp, args)

    fwd = jax.jit(lambda x_, adj_, p_: multiscale_encoding(x_, adj_, p_, args))
    out, out_all = fwd(x, adj, params)
    jax.block_until_ready(out)
    for o in out_all:
        jax.block_until_ready(o)
    print("KERNEL_OK")
</pallas_src>

<mosaic_0001>
module attributes {stable_mosaic.version = 11 : i64} {
  func.func @kernel(%arg0: i32, %arg1: memref<1x16x32xf32, #tpu.memory_space<vmem>>, %arg2: memref<1x32xf32, #tpu.memory_space<vmem>>, %arg3: memref<1x32xf32, #tpu.memory_space<vmem>>, %arg4: memref<32x16xf32, #tpu.memory_space<vmem>>, %arg5: memref<32x1xf32, #tpu.memory_space<vmem>>, %arg6: memref<32x32xf32, #tpu.memory_space<vmem>>, %arg7: memref<32x1xf32, #tpu.memory_space<vmem>>, %arg8: memref<1x32xf32, #tpu.memory_space<vmem>>, %arg9: memref<1x32xf32, #tpu.memory_space<vmem>>, %arg10: memref<32x64xf32, #tpu.memory_space<vmem>>, %arg11: memref<1x64xf32, #tpu.memory_space<vmem>>, %arg12: memref<64x64xf32, #tpu.memory_space<vmem>>, %arg13: memref<1x64xf32, #tpu.memory_space<vmem>>, %arg14: memref<1x32xf32, #tpu.memory_space<vmem>>, %arg15: memref<1x32xf32, #tpu.memory_space<vmem>>, %arg16: memref<16x16xf32, #tpu.memory_space<vmem>>, %arg17: memref<32x64xf32, #tpu.memory_space<vmem>>, %arg18: memref<1x64xf32, #tpu.memory_space<vmem>>, %arg19: memref<64x64xf32, #tpu.memory_space<vmem>>, %arg20: memref<1x64xf32, #tpu.memory_space<vmem>>, %arg21: memref<8x16xf32, #tpu.memory_space<vmem>>, %arg22: memref<8x16xf32, #tpu.memory_space<vmem>>, %arg23: memref<64x32xf32, #tpu.memory_space<vmem>>, %arg24: memref<1x32xf32, #tpu.memory_space<vmem>>, %arg25: memref<1x32xf32, #tpu.memory_space<vmem>>, %arg26: memref<1x32xf32, #tpu.memory_space<vmem>>, %arg27: memref<16x8xf32, #tpu.memory_space<vmem>>, %arg28: memref<16x1xf32, #tpu.memory_space<vmem>>, %arg29: memref<16x16xf32, #tpu.memory_space<vmem>>, %arg30: memref<16x1xf32, #tpu.memory_space<vmem>>, %arg31: memref<1x32xf32, #tpu.memory_space<vmem>>, %arg32: memref<1x32xf32, #tpu.memory_space<vmem>>, %arg33: memref<32x64xf32, #tpu.memory_space<vmem>>, %arg34: memref<1x64xf32, #tpu.memory_space<vmem>>, %arg35: memref<64x64xf32, #tpu.memory_space<vmem>>, %arg36: memref<1x64xf32, #tpu.memory_space<vmem>>, %arg37: memref<1x32xf32, #tpu.memory_space<vmem>>, %arg38: memref<1x32xf32, #tpu.memory_space<vmem>>, %arg39: memref<8x8xf32, #tpu.memory_space<vmem>>, %arg40: memref<32x64xf32, #tpu.memory_space<vmem>>, %arg41: memref<1x64xf32, #tpu.memory_space<vmem>>, %arg42: memref<64x64xf32, #tpu.memory_space<vmem>>, %arg43: memref<1x64xf32, #tpu.memory_space<vmem>>, %arg44: memref<4x8xf32, #tpu.memory_space<vmem>>, %arg45: memref<4x8xf32, #tpu.memory_space<vmem>>, %arg46: memref<64x32xf32, #tpu.memory_space<vmem>>, %arg47: memref<1x32xf32, #tpu.memory_space<vmem>>, %arg48: memref<1x32xf32, #tpu.memory_space<vmem>>, %arg49: memref<1x32xf32, #tpu.memory_space<vmem>>, %arg50: memref<32x64xf32, #tpu.memory_space<vmem>>, %arg51: memref<1x64xf32, #tpu.memory_space<vmem>>, %arg52: memref<64x64xf32, #tpu.memory_space<vmem>>, %arg53: memref<1x64xf32, #tpu.memory_space<vmem>>, %arg54: memref<1x32xf32, #tpu.memory_space<vmem>>, %arg55: memref<1x32xf32, #tpu.memory_space<vmem>>, %arg56: memref<4x4xf32, #tpu.memory_space<vmem>>, %arg57: memref<32x64xf32, #tpu.memory_space<vmem>>, %arg58: memref<1x64xf32, #tpu.memory_space<vmem>>, %arg59: memref<64x64xf32, #tpu.memory_space<vmem>>, %arg60: memref<1x64xf32, #tpu.memory_space<vmem>>, %arg61: memref<1x16x32xf32, #tpu.memory_space<vmem>>, %arg62: memref<1x8x32xf32, #tpu.memory_space<vmem>>, %arg63: memref<1x4x32xf32, #tpu.memory_space<vmem>>) attributes {dimension_semantics = [#tpu.dimension_semantics<parallel>], iteration_bounds = array<i64: 2>, scalar_prefetch = 0 : i64, scratch_operands = 0 : i64, tpu.core_type = #tpu.core_type<tc>, window_params = [{transform_indices = @transform_0, window_bounds = array<i64: 1, 16, 32>}, {pipeline_mode = #tpu.pipeline_mode<synchronous>, transform_indices = @transform_1, window_bounds = array<i64: 1, 32>}, {pipeline_mode = #tpu.pipeline_mode<synchronous>, transform_indices = @transform_2, window_bounds = array<i64: 1, 32>}, {pipeline_mode = #tpu.pipeline_mode<synchronous>, transform_indices = @transform_3, window_bounds = array<i64: 32, 16>}, {pipeline_mode = #tpu.pipeline_mode<synchronous>, transform_indices = @transform_4, window_bounds = array<i64: 32, 1>}, {pipeline_mode = #tpu.pipeline_mode<synchronous>, transform_indices = @transform_5, window_bounds = array<i64: 32, 32>}, {pipeline_mode = #tpu.pipeline_mode<synchronous>, transform_indices = @transform_6, window_bounds = array<i64: 32, 1>}, {pipeline_mode = #tpu.pipeline_mode<synchronous>, transform_indices = @transform_7, window_bounds = array<i64: 1, 32>}, {pipeline_mode = #tpu.pipeline_mode<synchronous>, transform_indices = @transform_8, window_bounds = array<i64: 1, 32>}, {pipeline_mode = #tpu.pipeline_mode<synchronous>, transform_indices = @transform_9, window_bounds = array<i64: 32, 64>}, {pipeline_mode = #tpu.pipeline_mode<synchronous>, transform_indices = @transform_10, window_bounds = array<i64: 1, 64>}, {pipeline_mode = #tpu.pipeline_mode<synchronous>, transform_indices = @transform_11, window_bounds = array<i64: 64, 64>}, {pipeline_mode = #tpu.pipeline_mode<synchronous>, transform_indices = @transform_12, window_bounds = array<i64: 1, 64>}, {pipeline_mode = #tpu.pipeline_mode<synchronous>, transform_indices = @transform_13, window_bounds = array<i64: 1, 32>}, {pipeline_mode = #tpu.pipeline_mode<synchronous>, transform_indices = @transform_14, window_bounds = array<i64: 1, 32>}, {pipeline_mode = #tpu.pipeline_mode<synchronous>, transform_indices = @transform_15, window_bounds = array<i64: 16, 16>}, {pipeline_mode = #tpu.pipeline_mode<synchronous>, transform_indices = @transform_16, window_bounds = array<i64: 32, 64>}, {pipeline_mode = #tpu.pipeline_mode<synchronous>, transform_indices = @transform_17, window_bounds = array<i64: 1, 64>}, {pipeline_mode = #tpu.pipeline_mode<synchronous>, transform_indices = @transform_18, window_bounds = array<i64: 64, 64>}, {pipeline_mode = #tpu.pipeline_mode<synchronous>, transform_indices = @transform_19, window_bounds = array<i64: 1, 64>}, {pipeline_mode = #tpu.pipeline_mode<synchronous>, transform_indices = @transform_20, window_bounds = array<i64: 8, 16>}, {pipeline_mode = #tpu.pipeline_mode<synchronous>, transform_indices = @transform_21, window_bounds = array<i64: 8, 16>}, {pipeline_mode = #tpu.pipeline_mode<synchronous>, transform_indices = @transform_22, window_bounds = array<i64: 64, 32>}, {pipeline_mode = #tpu.pipeline_mode<synchronous>, transform_indices = @transform_23, window_bounds = array<i64: 1, 32>}, {pipeline_mode = #tpu.pipeline_mode<synchronous>, transform_indices = @transform_24, window_bounds = array<i64: 1, 32>}, {pipeline_mode = #tpu.pipeline_mode<synchronous>, transform_indices = @transform_25, window_bounds = array<i64: 1, 32>}, {pipeline_mode = #tpu.pipeline_mode<synchronous>, transform_indices = @transform_26, window_bounds = array<i64: 16, 8>}, {pipeline_mode = #tpu.pipeline_mode<synchronous>, transform_indices = @transform_27, window_bounds = array<i64: 16, 1>}, {pipeline_mode = #tpu.pipeline_mode<synchronous>, transform_indices = @transform_28, window_bounds = array<i64: 16, 16>}, {pipeline_mode = #tpu.pipeline_mode<synchronous>, transform_indices = @transform_29, window_bounds = array<i64: 16, 1>}, {pipeline_mode = #tpu.pipeline_mode<synchronous>, transform_indices = @transform_30, window_bounds = array<i64: 1, 32>}, {pipeline_mode = #tpu.pipeline_mode<synchronous>, transform_indices = @transform_31, window_bounds = array<i64: 1, 32>}, {pipeline_mode = #tpu.pipeline_mode<synchronous>, transform_indices = @transform_32, window_bounds = array<i64: 32, 64>}, {pipeline_mode = #tpu.pipeline_mode<synchronous>, transform_indices = @transform_33, window_bounds = array<i64: 1, 64>}, {pipeline_mode = #tpu.pipeline_mode<synchronous>, transform_indices = @transform_34, window_bounds = array<i64: 64, 64>}, {pipeline_mode = #tpu.pipeline_mode<synchronous>, transform_indices = @transform_35, window_bounds = array<i64: 1, 64>}, {pipeline_mode = #tpu.pipeline_mode<synchronous>, transform_indices = @transform_36, window_bounds = array<i64: 1, 32>}, {pipeline_mode = #tpu.pipeline_mode<synchronous>, transform_indices = @transform_37, window_bounds = array<i64: 1, 32>}, {pipeline_mode = #tpu.pipeline_mode<synchronous>, transform_indices = @transform_38, window_bounds = array<i64: 8, 8>}, {pipeline_mode = #tpu.pipeline_mode<synchronous>, transform_indices = @transform_39, window_bounds = array<i64: 32, 64>}, {pipeline_mode = #tpu.pipeline_mode<synchronous>, transform_indices = @transform_40, window_bounds = array<i64: 1, 64>}, {pipeline_mode = #tpu.pipeline_mode<synchronous>, transform_indices = @transform_41, window_bounds = array<i64: 64, 64>}, {pipeline_mode = #tpu.pipeline_mode<synchronous>, transform_indices = @transform_42, window_bounds = array<i64: 1, 64>}, {pipeline_mode = #tpu.pipeline_mode<synchronous>, transform_indices = @transform_43, window_bounds = array<i64: 4, 8>}, {pipeline_mode = #tpu.pipeline_mode<synchronous>, transform_indices = @transform_44, window_bounds = array<i64: 4, 8>}, {pipeline_mode = #tpu.pipeline_mode<synchronous>, transform_indices = @transform_45, window_bounds = array<i64: 64, 32>}, {pipeline_mode = #tpu.pipeline_mode<synchronous>, transform_indices = @transform_46, window_bounds = array<i64: 1, 32>}, {pipeline_mode = #tpu.pipeline_mode<synchronous>, transform_indices = @transform_47, window_bounds = array<i64: 1, 32>}, {pipeline_mode = #tpu.pipeline_mode<synchronous>, transform_indices = @transform_48, window_bounds = array<i64: 1, 32>}, {pipeline_mode = #tpu.pipeline_mode<synchronous>, transform_indices = @transform_49, window_bounds = array<i64: 32, 64>}, {pipeline_mode = #tpu.pipeline_mode<synchronous>, transform_indices = @transform_50, window_bounds = array<i64: 1, 64>}, {pipeline_mode = #tpu.pipeline_mode<synchronous>, transform_indices = @transform_51, window_bounds = array<i64: 64, 64>}, {pipeline_mode = #tpu.pipeline_mode<synchronous>, transform_indices = @transform_52, window_bounds = array<i64: 1, 64>}, {pipeline_mode = #tpu.pipeline_mode<synchronous>, transform_indices = @transform_53, window_bounds = array<i64: 1, 32>}, {pipeline_mode = #tpu.pipeline_mode<synchronous>, transform_indices = @transform_54, window_bounds = array<i64: 1, 32>}, {pipeline_mode = #tpu.pipeline_mode<synchronous>, transform_indices = @transform_55, window_bounds = array<i64: 4, 4>}, {pipeline_mode = #tpu.pipeline_mode<synchronous>, transform_indices = @transform_56, window_bounds = array<i64: 32, 64>}, {pipeline_mode = #tpu.pipeline_mode<synchronous>, transform_indices = @transform_57, window_bounds = array<i64: 1, 64>}, {pipeline_mode = #tpu.pipeline_mode<synchronous>, transform_indices = @transform_58, window_bounds = array<i64: 64, 64>}, {pipeline_mode = #tpu.pipeline_mode<synchronous>, transform_indices = @transform_59, window_bounds = array<i64: 1, 64>}, {transform_indices = @transform_60, window_bounds = array<i64: 1, 16, 32>}, {transform_indices = @transform_61, window_bounds = array<i64: 1, 8, 32>}, {transform_indices = @transform_62, window_bounds = array<i64: 1, 4, 32>}]} {
    %c0 = arith.constant 0 : index
    %c0_0 = arith.constant 0 : index
    %c0_1 = arith.constant 0 : index
    %0 = vector.load %arg1[%c0, %c0_0, %c0_1] : memref<1x16x32xf32, #tpu.memory_space<vmem>>, vector<1x16x32xf32>
    %1 = vector.shape_cast %0 : vector<1x16x32xf32> to vector<16x32xf32>
    %c0_2 = arith.constant 0 : index
    %c0_3 = arith.constant 0 : index
    %2 = vector.load %arg2[%c0_2, %c0_3] : memref<1x32xf32, #tpu.memory_space<vmem>>, vector<1x32xf32>
    %c0_4 = arith.constant 0 : index
    %c0_5 = arith.constant 0 : index
    %3 = vector.load %arg3[%c0_4, %c0_5] : memref<1x32xf32, #tpu.memory_space<vmem>>, vector<1x32xf32>
    %cst = arith.constant dense<0.000000e+00> : vector<16xf32>
    %4 = vector.multi_reduction <add>, %1, %cst [1] : vector<16x32xf32> to vector<16xf32>
    %5 = vector.shape_cast %4 : vector<16xf32> to vector<16x1xf32>
    %cst_6 = arith.constant 3.200000e+01 : f32
    %6 = vector.broadcast %cst_6 : f32 to vector<16x1xf32>
    %7 = arith.divf %5, %6 : vector<16x1xf32>
    %8 = vector.broadcast %7 : vector<16x1xf32> to vector<16x32xf32>
    %9 = arith.subf %1, %8 : vector<16x32xf32>
    %10 = arith.mulf %9, %9 : vector<16x32xf32>
    %cst_7 = arith.constant dense<0.000000e+00> : vector<16xf32>
    %11 = vector.multi_reduction <add>, %10, %cst_7 [1] : vector<16x32xf32> to vector<16xf32>
    %12 = vector.shape_cast %11 : vector<16xf32> to vector<16x1xf32>
    %cst_8 = arith.constant 3.200000e+01 : f32
    %13 = vector.broadcast %cst_8 : f32 to vector<16x1xf32>
    %14 = arith.divf %12, %13 : vector<16x1xf32>
    %15 = vector.broadcast %7 : vector<16x1xf32> to vector<16x32xf32>
    %16 = arith.subf %1, %15 : vector<16x32xf32>
    %cst_9 = arith.constant 9.99999974E-6 : f32
    %17 = vector.broadcast %cst_9 : f32 to vector<16x1xf32>
    %18 = arith.addf %14, %17 : vector<16x1xf32>
    %19 = math.rsqrt %18 : vector<16x1xf32>
    %20 = vector.broadcast %19 : vector<16x1xf32> to vector<16x32xf32>
    %21 = arith.mulf %16, %20 : vector<16x32xf32>
    %22 = vector.broadcast %2 : vector<1x32xf32> to vector<16x32xf32>
    %23 = arith.mulf %21, %22 : vector<16x32xf32>
    %24 = vector.broadcast %3 : vector<1x32xf32> to vector<16x32xf32>
    %25 = arith.addf %23, %24 : vector<16x32xf32>
    %c0_10 = arith.constant 0 : index
    %c0_11 = arith.constant 0 : index
    %26 = vector.load %arg4[%c0_10, %c0_11] : memref<32x16xf32, #tpu.memory_space<vmem>>, vector<32x16xf32>
    %cst_12 = arith.constant dense<0.000000e+00> : vector<32x32xf32>
    %27 = tpu.matmul %26, %25, %cst_12 {dimension_numbers = #tpu.dot_dimension_numbers<[1], [0], [0], [1], [0, 0, 1, 1], [], []>} : vector<32x16xf32>, vector<16x32xf32>, vector<32x32xf32> -> vector<32x32xf32>
    %c0_13 = arith.constant 0 : index
    %c0_14 = arith.constant 0 : index
    %28 = vector.load %arg5[%c0_13, %c0_14] : memref<32x1xf32, #tpu.memory_space<vmem>>, vector<32x1xf32>
    %29 = vector.broadcast %28 : vector<32x1xf32> to vector<32x32xf32>
    %30 = arith.addf %27, %29 : vector<32x32xf32>
    %31 = arith.mulf %30, %30 : vector<32x32xf32>
    %32 = arith.mulf %30, %31 : vector<32x32xf32>
    %cst_15 = arith.constant 4.471500e-02 : f32
    %33 = vector.broadcast %cst_15 : f32 to vector<32x32xf32>
    %34 = arith.mulf %33, %32 : vector<32x32xf32>
    %35 = arith.addf %30, %34 : vector<32x32xf32>
    %cst_16 = arith.constant 0.797884583 : f32
    %36 = vector.broadcast %cst_16 : f32 to vector<32x32xf32>
    %37 = arith.mulf %36, %35 : vector<32x32xf32>
    %38 = math.tanh %37 : vector<32x32xf32>
    %cst_17 = arith.constant 1.000000e+00 : f32
    %39 = vector.broadcast %cst_17 : f32 to vector<32x32xf32>
    %40 = arith.addf %39, %38 : vector<32x32xf32>
    %cst_18 = arith.constant 5.000000e-01 : f32
    %41 = vector.broadcast %cst_18 : f32 to vector<32x32xf32>
    %42 = arith.mulf %41, %40 : vector<32x32xf32>
    %43 = arith.mulf %30, %42 : vector<32x32xf32>
    %c0_19 = arith.constant 0 : index
    %c0_20 = arith.constant 0 : index
    %44 = vector.load %arg6[%c0_19, %c0_20] : memref<32x32xf32, #tpu.memory_space<vmem>>, vector<32x32xf32>
    %cst_21 = arith.constant dense<0.000000e+00> : vector<32x32xf32>
    %45 = tpu.matmul %44, %43, %cst_21 {dimension_numbers = #tpu.dot_dimension_numbers<[1], [0], [0], [1], [0, 0, 1, 1], [], []>} : vector<32x32xf32>, vector<32x32xf32>, vector<32x32xf32> -> vector<32x32xf32>
    %c0_22 = arith.constant 0 : index
    %c0_23 = arith.constant 0 : index
    %46 = vector.load %arg7[%c0_22, %c0_23] : memref<32x1xf32, #tpu.memory_space<vmem>>, vector<32x1xf32>
    %47 = vector.broadcast %46 : vector<32x1xf32> to vector<32x32xf32>
    %48 = arith.addf %45, %47 : vector<32x32xf32>
    %49 = vector.extract_strided_slice %48 {offsets = [0, 0], sizes = [16, 32], strides = [1, 1]} : vector<32x32xf32> to vector<16x32xf32>
    %50 = vector.extract_strided_slice %48 {offsets = [16, 0], sizes = [16, 32], strides = [1, 1]} : vector<32x32xf32> to vector<16x32xf32>
    %51 = arith.negf %50 : vector<16x32xf32>
    %52 = math.exp %51 : vector<16x32xf32>
    %cst_24 = arith.constant 1.000000e+00 : f32
    %53 = vector.broadcast %cst_24 : f32 to vector<16x32xf32>
    %54 = arith.addf %53, %52 : vector<16x32xf32>
    %55 = arith.divf %53, %54 : vector<16x32xf32>
    %56 = arith.mulf %50, %55 : vector<16x32xf32>
    %57 = arith.mulf %49, %56 : vector<16x32xf32>
    %58 = arith.addf %57, %1 : vector<16x32xf32>
    %c0_25 = arith.constant 0 : index
    %c0_26 = arith.constant 0 : index
    %59 = vector.load %arg8[%c0_25, %c0_26] : memref<1x32xf32, #tpu.memory_space<vmem>>, vector<1x32xf32>
    %c0_27 = arith.constant 0 : index
    %c0_28 = arith.constant 0 : index
    %60 = vector.load %arg9[%c0_27, %c0_28] : memref<1x32xf32, #tpu.memory_space<vmem>>, vector<1x32xf32>
    %cst_29 = arith.constant dense<0.000000e+00> : vector<16xf32>
    %61 = vector.multi_reduction <add>, %58, %cst_29 [1] : vector<16x32xf32> to vector<16xf32>
    %62 = vector.shape_cast %61 : vector<16xf32> to vector<16x1xf32>
    %cst_30 = arith.constant 3.200000e+01 : f32
    %63 = vector.broadcast %cst_30 : f32 to vector<16x1xf32>
    %64 = arith.divf %62, %63 : vector<16x1xf32>
    %65 = vector.broadcast %64 : vector<16x1xf32> to vector<16x32xf32>
    %66 = arith.subf %58, %65 : vector<16x32xf32>
    %67 = arith.mulf %66, %66 : vector<16x32xf32>
    %cst_31 = arith.constant dense<0.000000e+00> : vector<16xf32>
    %68 = vector.multi_reduction <add>, %67, %cst_31 [1] : vector<16x32xf32> to vector<16xf32>
    %69 = vector.shape_cast %68 : vector<16xf32> to vector<16x1xf32>
    %cst_32 = arith.constant 3.200000e+01 : f32
    %70 = vector.broadcast %cst_32 : f32 to vector<16x1xf32>
    %71 = arith.divf %69, %70 : vector<16x1xf32>
    %72 = vector.broadcast %64 : vector<16x1xf32> to vector<16x32xf32>
    %73 = arith.subf %58, %72 : vector<16x32xf32>
    %cst_33 = arith.constant 9.99999974E-6 : f32
    %74 = vector.broadcast %cst_33 : f32 to vector<16x1xf32>
    %75 = arith.addf %71, %74 : vector<16x1xf32>
    %76 = math.rsqrt %75 : vector<16x1xf32>
    %77 = vector.broadcast %76 : vector<16x1xf32> to vector<16x32xf32>
    %78 = arith.mulf %73, %77 : vector<16x32xf32>
    %79 = vector.broadcast %59 : vector<1x32xf32> to vector<16x32xf32>
    %80 = arith.mulf %78, %79 : vector<16x32xf32>
    %81 = vector.broadcast %60 : vector<1x32xf32> to vector<16x32xf32>
    %82 = arith.addf %80, %81 : vector<16x32xf32>
    %c0_34 = arith.constant 0 : index
    %c0_35 = arith.constant 0 : index
    %83 = vector.load %arg10[%c0_34, %c0_35] : memref<32x64xf32, #tpu.memory_space<vmem>>, vector<32x64xf32>
    %cst_36 = arith.constant dense<0.000000e+00> : vector<16x64xf32>
    %84 = tpu.matmul %82, %83, %cst_36 {dimension_numbers = #tpu.dot_dimension_numbers<[1], [0], [0], [1], [0, 0, 1, 1], [], []>} : vector<16x32xf32>, vector<32x64xf32>, vector<16x64xf32> -> vector<16x64xf32>
    %c0_37 = arith.constant 0 : index
    %c0_38 = arith.constant 0 : index
    %85 = vector.load %arg11[%c0_37, %c0_38] : memref<1x64xf32, #tpu.memory_space<vmem>>, vector<1x64xf32>
    %86 = vector.broadcast %85 : vector<1x64xf32> to vector<16x64xf32>
    %87 = arith.addf %84, %86 : vector<16x64xf32>
    %88 = arith.mulf %87, %87 : vector<16x64xf32>
    %89 = arith.mulf %87, %88 : vector<16x64xf32>
    %cst_39 = arith.constant 4.471500e-02 : f32
    %90 = vector.broadcast %cst_39 : f32 to vector<16x64xf32>
    %91 = arith.mulf %90, %89 : vector<16x64xf32>
    %92 = arith.addf %87, %91 : vector<16x64xf32>
    %cst_40 = arith.constant 0.797884583 : f32
    %93 = vector.broadcast %cst_40 : f32 to vector<16x64xf32>
    %94 = arith.mulf %93, %92 : vector<16x64xf32>
    %95 = math.tanh %94 : vector<16x64xf32>
    %cst_41 = arith.constant 1.000000e+00 : f32
    %96 = vector.broadcast %cst_41 : f32 to vector<16x64xf32>
    %97 = arith.addf %96, %95 : vector<16x64xf32>
    %cst_42 = arith.constant 5.000000e-01 : f32
    %98 = vector.broadcast %cst_42 : f32 to vector<16x64xf32>
    %99 = arith.mulf %98, %97 : vector<16x64xf32>
    %100 = arith.mulf %87, %99 : vector<16x64xf32>
    %c0_43 = arith.constant 0 : index
    %c0_44 = arith.constant 0 : index
    %101 = vector.load %arg12[%c0_43, %c0_44] : memref<64x64xf32, #tpu.memory_space<vmem>>, vector<64x64xf32>
    %cst_45 = arith.constant dense<0.000000e+00> : vector<16x64xf32>
    %102 = tpu.matmul %100, %101, %cst_45 {dimension_numbers = #tpu.dot_dimension_numbers<[1], [0], [0], [1], [0, 0, 1, 1], [], []>} : vector<16x64xf32>, vector<64x64xf32>, vector<16x64xf32> -> vector<16x64xf32>
    %c0_46 = arith.constant 0 : index
    %c0_47 = arith.constant 0 : index
    %103 = vector.load %arg13[%c0_46, %c0_47] : memref<1x64xf32, #tpu.memory_space<vmem>>, vector<1x64xf32>
    %104 = vector.broadcast %103 : vector<1x64xf32> to vector<16x64xf32>
    %105 = arith.addf %102, %104 : vector<16x64xf32>
    %106 = vector.extract_strided_slice %105 {offsets = [0, 0], sizes = [16, 32], strides = [1, 1]} : vector<16x64xf32> to vector<16x32xf32>
    %107 = vector.extract_strided_slice %105 {offsets = [0, 32], sizes = [16, 32], strides = [1, 1]} : vector<16x64xf32> to vector<16x32xf32>
    %108 = arith.negf %107 : vector<16x32xf32>
    %109 = math.exp %108 : vector<16x32xf32>
    %cst_48 = arith.constant 1.000000e+00 : f32
    %110 = vector.broadcast %cst_48 : f32 to vector<16x32xf32>
    %111 = arith.addf %110, %109 : vector<16x32xf32>
    %112 = arith.divf %110, %111 : vector<16x32xf32>
    %113 = arith.mulf %107, %112 : vector<16x32xf32>
    %114 = arith.mulf %106, %113 : vector<16x32xf32>
    %115 = arith.addf %114, %58 : vector<16x32xf32>
    %c0_49 = arith.constant 0 : index
    %c0_50 = arith.constant 0 : index
    %116 = vector.load %arg14[%c0_49, %c0_50] : memref<1x32xf32, #tpu.memory_space<vmem>>, vector<1x32xf32>
    %c0_51 = arith.constant 0 : index
    %c0_52 = arith.constant 0 : index
    %117 = vector.load %arg15[%c0_51, %c0_52] : memref<1x32xf32, #tpu.memory_space<vmem>>, vector<1x32xf32>
    %cst_53 = arith.constant dense<0.000000e+00> : vector<16xf32>
    %118 = vector.multi_reduction <add>, %115, %cst_53 [1] : vector<16x32xf32> to vector<16xf32>
    %119 = vector.shape_cast %118 : vector<16xf32> to vector<16x1xf32>
    %cst_54 = arith.constant 3.200000e+01 : f32
    %120 = vector.broadcast %cst_54 : f32 to vector<16x1xf32>
    %121 = arith.divf %119, %120 : vector<16x1xf32>
    %122 = vector.broadcast %121 : vector<16x1xf32> to vector<16x32xf32>
    %123 = arith.subf %115, %122 : vector<16x32xf32>
    %124 = arith.mulf %123, %123 : vector<16x32xf32>
    %cst_55 = arith.constant dense<0.000000e+00> : vector<16xf32>
    %125 = vector.multi_reduction <add>, %124, %cst_55 [1] : vector<16x32xf32> to vector<16xf32>
    %126 = vector.shape_cast %125 : vector<16xf32> to vector<16x1xf32>
    %cst_56 = arith.constant 3.200000e+01 : f32
    %127 = vector.broadcast %cst_56 : f32 to vector<16x1xf32>
    %128 = arith.divf %126, %127 : vector<16x1xf32>
    %129 = vector.broadcast %121 : vector<16x1xf32> to vector<16x32xf32>
    %130 = arith.subf %115, %129 : vector<16x32xf32>
    %cst_57 = arith.constant 9.99999974E-6 : f32
    %131 = vector.broadcast %cst_57 : f32 to vector<16x1xf32>
    %132 = arith.addf %128, %131 : vector<16x1xf32>
    %133 = math.rsqrt %132 : vector<16x1xf32>
    %134 = vector.broadcast %133 : vector<16x1xf32> to vector<16x32xf32>
    %135 = arith.mulf %130, %134 : vector<16x32xf32>
    %136 = vector.broadcast %116 : vector<1x32xf32> to vector<16x32xf32>
    %137 = arith.mulf %135, %136 : vector<16x32xf32>
    %138 = vector.broadcast %117 : vector<1x32xf32> to vector<16x32xf32>
    %139 = arith.addf %137, %138 : vector<16x32xf32>
    %c0_58 = arith.constant 0 : index
    %c0_59 = arith.constant 0 : index
    %140 = vector.load %arg16[%c0_58, %c0_59] : memref<16x16xf32, #tpu.memory_space<vmem>>, vector<16x16xf32>
    %cst_60 = arith.constant dense<0.000000e+00> : vector<16x32xf32>
    %141 = tpu.matmul %140, %139, %cst_60 {dimension_numbers = #tpu.dot_dimension_numbers<[1], [0], [0], [1], [0, 0, 1, 1], [], []>} : vector<16x16xf32>, vector<16x32xf32>, vector<16x32xf32> -> vector<16x32xf32>
    %c0_61 = arith.constant 0 : index
    %c0_62 = arith.constant 0 : index
    %142 = vector.load %arg17[%c0_61, %c0_62] : memref<32x64xf32, #tpu.memory_space<vmem>>, vector<32x64xf32>
    %cst_63 = arith.constant dense<0.000000e+00> : vector<16x64xf32>
    %143 = tpu.matmul %141, %142, %cst_63 {dimension_numbers = #tpu.dot_dimension_numbers<[1], [0], [0], [1], [0, 0, 1, 1], [], []>} : vector<16x32xf32>, vector<32x64xf32>, vector<16x64xf32> -> vector<16x64xf32>
    %c0_64 = arith.constant 0 : index
    %c0_65 = arith.constant 0 : index
    %144 = vector.load %arg18[%c0_64, %c0_65] : memref<1x64xf32, #tpu.memory_space<vmem>>, vector<1x64xf32>
    %145 = vector.broadcast %144 : vector<1x64xf32> to vector<16x64xf32>
    %146 = arith.addf %143, %145 : vector<16x64xf32>
    %147 = arith.mulf %146, %146 : vector<16x64xf32>
    %148 = arith.mulf %146, %147 : vector<16x64xf32>
    %cst_66 = arith.constant 4.471500e-02 : f32
    %149 = vector.broadcast %cst_66 : f32 to vector<16x64xf32>
    %150 = arith.mulf %149, %148 : vector<16x64xf32>
    %151 = arith.addf %146, %150 : vector<16x64xf32>
    %cst_67 = arith.constant 0.797884583 : f32
    %152 = vector.broadcast %cst_67 : f32 to vector<16x64xf32>
    %153 = arith.mulf %152, %151 : vector<16x64xf32>
    %154 = math.tanh %153 : vector<16x64xf32>
    %cst_68 = arith.constant 1.000000e+00 : f32
    %155 = vector.broadcast %cst_68 : f32 to vector<16x64xf32>
    %156 = arith.addf %155, %154 : vector<16x64xf32>
    %cst_69 = arith.constant 5.000000e-01 : f32
    %157 = vector.broadcast %cst_69 : f32 to vector<16x64xf32>
    %158 = arith.mulf %157, %156 : vector<16x64xf32>
    %159 = arith.mulf %146, %158 : vector<16x64xf32>
    %c0_70 = arith.constant 0 : index
    %c0_71 = arith.constant 0 : index
    %160 = vector.load %arg19[%c0_70, %c0_71] : memref<64x64xf32, #tpu.memory_space<vmem>>, vector<64x64xf32>
    %cst_72 = arith.constant dense<0.000000e+00> : vector<16x64xf32>
    %161 = tpu.matmul %159, %160, %cst_72 {dimension_numbers = #tpu.dot_dimension_numbers<[1], [0], [0], [1], [0, 0, 1, 1], [], []>} : vector<16x64xf32>, vector<64x64xf32>, vector<16x64xf32> -> vector<16x64xf32>
    %c0_73 = arith.constant 0 : index
    %c0_74 = arith.constant 0 : index
    %162 = vector.load %arg20[%c0_73, %c0_74] : memref<1x64xf32, #tpu.memory_space<vmem>>, vector<1x64xf32>
    %163 = vector.broadcast %162 : vector<1x64xf32> to vector<16x64xf32>
    %164 = arith.addf %161, %163 : vector<16x64xf32>
    %165 = vector.extract_strided_slice %164 {offsets = [0, 0], sizes = [16, 32], strides = [1, 1]} : vector<16x64xf32> to vector<16x32xf32>
    %166 = vector.extract_strided_slice %164 {offsets = [0, 32], sizes = [16, 32], strides = [1, 1]} : vector<16x64xf32> to vector<16x32xf32>
    %167 = arith.negf %166 : vector<16x32xf32>
    %168 = math.exp %167 : vector<16x32xf32>
    %cst_75 = arith.constant 1.000000e+00 : f32
    %169 = vector.broadcast %cst_75 : f32 to vector<16x32xf32>
    %170 = arith.addf %169, %168 : vector<16x32xf32>
    %171 = arith.divf %169, %170 : vector<16x32xf32>
    %172 = arith.mulf %166, %171 : vector<16x32xf32>
    %173 = arith.mulf %165, %172 : vector<16x32xf32>
    %174 = arith.addf %173, %115 : vector<16x32xf32>
    %c0_76 = arith.constant 0 : index
    %c0_77 = arith.constant 0 : index
    %c0_78 = arith.constant 0 : index
    %175 = vector.load %arg61[%c0_76, %c0_77, %c0_78] : memref<1x16x32xf32, #tpu.memory_space<vmem>>, vector<1x16x32xf32>
    %176 = vector.shape_cast %175 : vector<1x16x32xf32> to vector<16x32xf32>
    %177 = vector.shape_cast %174 : vector<16x32xf32> to vector<1x16x32xf32>
    tpu.vector_store %arg61[%c0_76, %c0_77, %c0_78], %177 {strides = array<i32>} : memref<1x16x32xf32, #tpu.memory_space<vmem>>, vector<1x16x32xf32>,
    %cst_79 = arith.constant 0.000000e+00 : f32
    %178 = vector.broadcast %cst_79 : f32 to vector<8x32xf32>
    %c0_80 = arith.constant 0 : index
    %c0_81 = arith.constant 0 : index
    %179 = vector.load %arg21[%c0_80, %c0_81] : memref<8x16xf32, #tpu.memory_space<vmem>>, vector<8x16xf32>
    %cst_82 = arith.constant dense<0.000000e+00> : vector<8x32xf32>
    %180 = tpu.matmul %179, %174, %cst_82 {dimension_numbers = #tpu.dot_dimension_numbers<[1], [0], [0], [1], [0, 0, 1, 1], [], []>} : vector<8x16xf32>, vector<16x32xf32>, vector<8x32xf32> -> vector<8x32xf32>
    %c0_83 = arith.constant 0 : index
    %c0_84 = arith.constant 0 : index
    %181 = vector.load %arg23[%c0_83, %c0_84] : memref<64x32xf32, #tpu.memory_space<vmem>>, vector<32x32xf32>
    %cst_85 = arith.constant dense<0.000000e+00> : vector<8x32xf32>
    %182 = tpu.matmul %180, %181, %cst_85 {dimension_numbers = #tpu.dot_dimension_numbers<[1], [0], [0], [1], [0, 0, 1, 1], [], []>} : vector<8x32xf32>, vector<32x32xf32>, vector<8x32xf32> -> vector<8x32xf32>
    %183 = arith.addf %178, %182 : vector<8x32xf32>
    %c0_86 = arith.constant 0 : index
    %c0_87 = arith.constant 0 : index
    %184 = vector.load %arg22[%c0_86, %c0_87] : memref<8x16xf32, #tpu.memory_space<vmem>>, vector<8x16xf32>
    %cst_88 = arith.constant dense<0.000000e+00> : vector<8x32xf32>
    %185 = tpu.matmul %184, %174, %cst_88 {dimension_numbers = #tpu.dot_dimension_numbers<[1], [0], [0], [1], [0, 0, 1, 1], [], []>} : vector<8x16xf32>, vector<16x32xf32>, vector<8x32xf32> -> vector<8x32xf32>
    %c32 = arith.constant 32 : index
    %c0_89 = arith.constant 0 : index
    %186 = vector.load %arg23[%c32, %c0_89] : memref<64x32xf32, #tpu.memory_space<vmem>>, vector<32x32xf32>
    %cst_90 = arith.constant dense<0.000000e+00> : vector<8x32xf32>
    %187 = tpu.matmul %185, %186, %cst_90 {dimension_numbers = #tpu.dot_dimension_numbers<[1], [0], [0], [1], [0, 0, 1, 1], [], []>} : vector<8x32xf32>, vector<32x32xf32>, vector<8x32xf32> -> vector<8x32xf32>
    %188 = arith.addf %183, %187 : vector<8x32xf32>
    %c0_91 = arith.constant 0 : index
    %c0_92 = arith.constant 0 : index
    %189 = vector.load %arg24[%c0_91, %c0_92] : memref<1x32xf32, #tpu.memory_space<vmem>>, vector<1x32xf32>
    %190 = vector.broadcast %189 : vector<1x32xf32> to vector<8x32xf32>
    %191 = arith.addf %188, %190 : vector<8x32xf32>
    %c0_93 = arith.constant 0 : index
    %c0_94 = arith.constant 0 : index
    %192 = vector.load %arg25[%c0_93, %c0_94] : memref<1x32xf32, #tpu.memory_space<vmem>>, vector<1x32xf32>
    %c0_95 = arith.constant 0 : index
    %c0_96 = arith.constant 0 : index
    %193 = vector.load %arg26[%c0_95, %c0_96] : memref<1x32xf32, #tpu.memory_space<vmem>>, vector<1x32xf32>
    %cst_97 = arith.constant dense<0.000000e+00> : vector<8xf32>
    %194 = vector.multi_reduction <add>, %191, %cst_97 [1] : vector<8x32xf32> to vector<8xf32>
    %195 = vector.shape_cast %194 : vector<8xf32> to vector<8x1xf32>
    %cst_98 = arith.constant 3.200000e+01 : f32
    %196 = vector.broadcast %cst_98 : f32 to vector<8x1xf32>
    %197 = arith.divf %195, %196 : vector<8x1xf32>
    %198 = vector.broadcast %197 : vector<8x1xf32> to vector<8x32xf32>
    %199 = arith.subf %191, %198 : vector<8x32xf32>
    %200 = arith.mulf %199, %199 : vector<8x32xf32>
    %cst_99 = arith.constant dense<0.000000e+00> : vector<8xf32>
    %201 = vector.multi_reduction <add>, %200, %cst_99 [1] : vector<8x32xf32> to vector<8xf32>
    %202 = vector.shape_cast %201 : vector<8xf32> to vector<8x1xf32>
    %cst_100 = arith.constant 3.200000e+01 : f32
    %203 = vector.broadcast %cst_100 : f32 to vector<8x1xf32>
    %204 = arith.divf %202, %203 : vector<8x1xf32>
    %205 = vector.broadcast %197 : vector<8x1xf32> to vector<8x32xf32>
    %206 = arith.subf %191, %205 : vector<8x32xf32>
    %cst_101 = arith.constant 9.99999974E-6 : f32
    %207 = vector.broadcast %cst_101 : f32 to vector<8x1xf32>
    %208 = arith.addf %204, %207 : vector<8x1xf32>
    %209 = math.rsqrt %208 : vector<8x1xf32>
    %210 = vector.broadcast %209 : vector<8x1xf32> to vector<8x32xf32>
    %211 = arith.mulf %206, %210 : vector<8x32xf32>
    %212 = vector.broadcast %192 : vector<1x32xf32> to vector<8x32xf32>
    %213 = arith.mulf %211, %212 : vector<8x32xf32>
    %214 = vector.broadcast %193 : vector<1x32xf32> to vector<8x32xf32>
    %215 = arith.addf %213, %214 : vector<8x32xf32>
    %c0_102 = arith.constant 0 : index
    %c0_103 = arith.constant 0 : index
    %216 = vector.load %arg27[%c0_102, %c0_103] : memref<16x8xf32, #tpu.memory_space<vmem>>, vector<16x8xf32>
    %cst_104 = arith.constant dense<0.000000e+00> : vector<16x32xf32>
    %217 = tpu.matmul %216, %215, %cst_104 {dimension_numbers = #tpu.dot_dimension_numbers<[1], [0], [0], [1], [0, 0, 1, 1], [], []>} : vector<16x8xf32>, vector<8x32xf32>, vector<16x32xf32> -> vector<16x32xf32>
    %c0_105 = arith.constant 0 : index
    %c0_106 = arith.constant 0 : index
    %218 = vector.load %arg28[%c0_105, %c0_106] : memref<16x1xf32, #tpu.memory_space<vmem>>, vector<16x1xf32>
    %219 = vector.broadcast %218 : vector<16x1xf32> to vector<16x32xf32>
    %220 = arith.addf %217, %219 : vector<16x32xf32>
    %221 = arith.mulf %220, %220 : vector<16x32xf32>
    %222 = arith.mulf %220, %221 : vector<16x32xf32>
    %cst_107 = arith.constant 4.471500e-02 : f32
    %223 = vector.broadcast %cst_107 : f32 to vector<16x32xf32>
    %224 = arith.mulf %223, %222 : vector<16x32xf32>
    %225 = arith.addf %220, %224 : vector<16x32xf32>
    %cst_108 = arith.constant 0.797884583 : f32
    %226 = vector.broadcast %cst_108 : f32 to vector<16x32xf32>
    %227 = arith.mulf %226, %225 : vector<16x32xf32>
    %228 = math.tanh %227 : vector<16x32xf32>
    %cst_109 = arith.constant 1.000000e+00 : f32
    %229 = vector.broadcast %cst_109 : f32 to vector<16x32xf32>
    %230 = arith.addf %229, %228 : vector<16x32xf32>
    %cst_110 = arith.constant 5.000000e-01 : f32
    %231 = vector.broadcast %cst_110 : f32 to vector<16x32xf32>
    %232 = arith.mulf %231, %230 : vector<16x32xf32>
    %233 = arith.mulf %220, %232 : vector<16x32xf32>
    %c0_111 = arith.constant 0 : index
    %c0_112 = arith.constant 0 : index
    %234 = vector.load %arg29[%c0_111, %c0_112] : memref<16x16xf32, #tpu.memory_space<vmem>>, vector<16x16xf32>
    %cst_113 = arith.constant dense<0.000000e+00> : vector<16x32xf32>
    %235 = tpu.matmul %234, %233, %cst_113 {dimension_numbers = #tpu.dot_dimension_numbers<[1], [0], [0], [1], [0, 0, 1, 1], [], []>} : vector<16x16xf32>, vector<16x32xf32>, vector<16x32xf32> -> vector<16x32xf32>
    %c0_114 = arith.constant 0 : index
    %c0_115 = arith.constant 0 : index
    %236 = vector.load %arg30[%c0_114, %c0_115] : memref<16x1xf32, #tpu.memory_space<vmem>>, vector<16x1xf32>
    %237 = vector.broadcast %236 : vector<16x1xf32> to vector<16x32xf32>
    %238 = arith.addf %235, %237 : vector<16x32xf32>
    %239 = vector.extract_strided_slice %238 {offsets = [0, 0], sizes = [8, 32], strides = [1, 1]} : vector<16x32xf32> to vector<8x32xf32>
    %240 = vector.extract_strided_slice %238 {offsets = [8, 0], sizes = [8, 32], strides = [1, 1]} : vector<16x32xf32> to vector<8x32xf32>
    %241 = arith.negf %240 : vector<8x32xf32>
    %242 = math.exp %241 : vector<8x32xf32>
    %cst_116 = arith.constant 1.000000e+00 : f32
    %243 = vector.broadcast %cst_116 : f32 to vector<8x32xf32>
    %244 = arith.addf %243, %242 : vector<8x32xf32>
    %245 = arith.divf %243, %244 : vector<8x32xf32>
    %246 = arith.mulf %240, %245 : vector<8x32xf32>
    %247 = arith.mulf %239, %246 : vector<8x32xf32>
    %248 = arith.addf %247, %191 : vector<8x32xf32>
    %c0_117 = arith.constant 0 : index
    %c0_118 = arith.constant 0 : index
    %249 = vector.load %arg31[%c0_117, %c0_118] : memref<1x32xf32, #tpu.memory_space<vmem>>, vector<1x32xf32>
    %c0_119 = arith.constant 0 : index
    %c0_120 = arith.constant 0 : index
    %250 = vector.load %arg32[%c0_119, %c0_120] : memref<1x32xf32, #tpu.memory_space<vmem>>, vector<1x32xf32>
    %cst_121 = arith.constant dense<0.000000e+00> : vector<8xf32>
    %251 = vector.multi_reduction <add>, %248, %cst_121 [1] : vector<8x32xf32> to vector<8xf32>
    %252 = vector.shape_cast %251 : vector<8xf32> to vector<8x1xf32>
    %cst_122 = arith.constant 3.200000e+01 : f32
    %253 = vector.broadcast %cst_122 : f32 to vector<8x1xf32>
    %254 = arith.divf %252, %253 : vector<8x1xf32>
    %255 = vector.broadcast %254 : vector<8x1xf32> to vector<8x32xf32>
    %256 = arith.subf %248, %255 : vector<8x32xf32>
    %257 = arith.mulf %256, %256 : vector<8x32xf32>
    %cst_123 = arith.constant dense<0.000000e+00> : vector<8xf32>
    %258 = vector.multi_reduction <add>, %257, %cst_123 [1] : vector<8x32xf32> to vector<8xf32>
    %259 = vector.shape_cast %258 : vector<8xf32> to vector<8x1xf32>
    %cst_124 = arith.constant 3.200000e+01 : f32
    %260 = vector.broadcast %cst_124 : f32 to vector<8x1xf32>
    %261 = arith.divf %259, %260 : vector<8x1xf32>
    %262 = vector.broadcast %254 : vector<8x1xf32> to vector<8x32xf32>
    %263 = arith.subf %248, %262 : vector<8x32xf32>
    %cst_125 = arith.constant 9.99999974E-6 : f32
    %264 = vector.broadcast %cst_125 : f32 to vector<8x1xf32>
    %265 = arith.addf %261, %264 : vector<8x1xf32>
    %266 = math.rsqrt %265 : vector<8x1xf32>
    %267 = vector.broadcast %266 : vector<8x1xf32> to vector<8x32xf32>
    %268 = arith.mulf %263, %267 : vector<8x32xf32>
    %269 = vector.broadcast %249 : vector<1x32xf32> to vector<8x32xf32>
    %270 = arith.mulf %268, %269 : vector<8x32xf32>
    %271 = vector.broadcast %250 : vector<1x32xf32> to vector<8x32xf32>
    %272 = arith.addf %270, %271 : vector<8x32xf32>
    %c0_126 = arith.constant 0 : index
    %c0_127 = arith.constant 0 : index
    %273 = vector.load %arg33[%c0_126, %c0_127] : memref<32x64xf32, #tpu.memory_space<vmem>>, vector<32x64xf32>
    %cst_128 = arith.constant dense<0.000000e+00> : vector<8x64xf32>
    %274 = tpu.matmul %272, %273, %cst_128 {dimension_numbers = #tpu.dot_dimension_numbers<[1], [0], [0], [1], [0, 0, 1, 1], [], []>} : vector<8x32xf32>, vector<32x64xf32>, vector<8x64xf32> -> vector<8x64xf32>
    %c0_129 = arith.constant 0 : index
    %c0_130 = arith.constant 0 : index
    %275 = vector.load %arg34[%c0_129, %c0_130] : memref<1x64xf32, #tpu.memory_space<vmem>>, vector<1x64xf32>
    %276 = vector.broadcast %275 : vector<1x64xf32> to vector<8x64xf32>
    %277 = arith.addf %274, %276 : vector<8x64xf32>
    %278 = arith.mulf %277, %277 : vector<8x64xf32>
    %279 = arith.mulf %277, %278 : vector<8x64xf32>
    %cst_131 = arith.constant 4.471500e-02 : f32
    %280 = vector.broadcast %cst_131 : f32 to vector<8x64xf32>
    %281 = arith.mulf %280, %279 : vector<8x64xf32>
    %282 = arith.addf %277, %281 : vector<8x64xf32>
    %cst_132 = arith.constant 0.797884583 : f32
    %283 = vector.broadcast %cst_132 : f32 to vector<8x64xf32>
    %284 = arith.mulf %283, %282 : vector<8x64xf32>
    %285 = math.tanh %284 : vector<8x64xf32>
    %cst_133 = arith.constant 1.000000e+00 : f32
    %286 = vector.broadcast %cst_133 : f32 to vector<8x64xf32>
    %287 = arith.addf %286, %285 : vector<8x64xf32>
    %cst_134 = arith.constant 5.000000e-01 : f32
    %288 = vector.broadcast %cst_134 : f32 to vector<8x64xf32>
    %289 = arith.mulf %288, %287 : vector<8x64xf32>
    %290 = arith.mulf %277, %289 : vector<8x64xf32>
    %c0_135 = arith.constant 0 : index
    %c0_136 = arith.constant 0 : index
    %291 = vector.load %arg35[%c0_135, %c0_136] : memref<64x64xf32, #tpu.memory_space<vmem>>, vector<64x64xf32>
    %cst_137 = arith.constant dense<0.000000e+00> : vector<8x64xf32>
    %292 = tpu.matmul %290, %291, %cst_137 {dimension_numbers = #tpu.dot_dimension_numbers<[1], [0], [0], [1], [0, 0, 1, 1], [], []>} : vector<8x64xf32>, vector<64x64xf32>, vector<8x64xf32> -> vector<8x64xf32>
    %c0_138 = arith.constant 0 : index
    %c0_139 = arith.constant 0 : index
    %293 = vector.load %arg36[%c0_138, %c0_139] : memref<1x64xf32, #tpu.memory_space<vmem>>, vector<1x64xf32>
    %294 = vector.broadcast %293 : vector<1x64xf32> to vector<8x64xf32>
    %295 = arith.addf %292, %294 : vector<8x64xf32>
    %296 = vector.extract_strided_slice %295 {offsets = [0, 0], sizes = [8, 32], strides = [1, 1]} : vector<8x64xf32> to vector<8x32xf32>
    %297 = vector.extract_strided_slice %295 {offsets = [0, 32], sizes = [8, 32], strides = [1, 1]} : vector<8x64xf32> to vector<8x32xf32>
    %298 = arith.negf %297 : vector<8x32xf32>
    %299 = math.exp %298 : vector<8x32xf32>
    %cst_140 = arith.constant 1.000000e+00 : f32
    %300 = vector.broadcast %cst_140 : f32 to vector<8x32xf32>
    %301 = arith.addf %300, %299 : vector<8x32xf32>
    %302 = arith.divf %300, %301 : vector<8x32xf32>
    %303 = arith.mulf %297, %302 : vector<8x32xf32>
    %304 = arith.mulf %296, %303 : vector<8x32xf32>
    %305 = arith.addf %304, %248 : vector<8x32xf32>
    %c0_141 = arith.constant 0 : index
    %c0_142 = arith.constant 0 : index
    %306 = vector.load %arg37[%c0_141, %c0_142] : memref<1x32xf32, #tpu.memory_space<vmem>>, vector<1x32xf32>
    %c0_143 = arith.constant 0 : index
    %c0_144 = arith.constant 0 : index
    %307 = vector.load %arg38[%c0_143, %c0_144] : memref<1x32xf32, #tpu.memory_space<vmem>>, vector<1x32xf32>
    %cst_145 = arith.constant dense<0.000000e+00> : vector<8xf32>
    %308 = vector.multi_reduction <add>, %305, %cst_145 [1] : vector<8x32xf32> to vector<8xf32>
    %309 = vector.shape_cast %308 : vector<8xf32> to vector<8x1xf32>
    %cst_146 = arith.constant 3.200000e+01 : f32
    %310 = vector.broadcast %cst_146 : f32 to vector<8x1xf32>
    %311 = arith.divf %309, %310 : vector<8x1xf32>
    %312 = vector.broadcast %311 : vector<8x1xf32> to vector<8x32xf32>
    %313 = arith.subf %305, %312 : vector<8x32xf32>
    %314 = arith.mulf %313, %313 : vector<8x32xf32>
    %cst_147 = arith.constant dense<0.000000e+00> : vector<8xf32>
    %315 = vector.multi_reduction <add>, %314, %cst_147 [1] : vector<8x32xf32> to vector<8xf32>
    %316 = vector.shape_cast %315 : vector<8xf32> to vector<8x1xf32>
    %cst_148 = arith.constant 3.200000e+01 : f32
    %317 = vector.broadcast %cst_148 : f32 to vector<8x1xf32>
    %318 = arith.divf %316, %317 : vector<8x1xf32>
    %319 = vector.broadcast %311 : vector<8x1xf32> to vector<8x32xf32>
    %320 = arith.subf %305, %319 : vector<8x32xf32>
    %cst_149 = arith.constant 9.99999974E-6 : f32
    %321 = vector.broadcast %cst_149 : f32 to vector<8x1xf32>
    %322 = arith.addf %318, %321 : vector<8x1xf32>
    %323 = math.rsqrt %322 : vector<8x1xf32>
    %324 = vector.broadcast %323 : vector<8x1xf32> to vector<8x32xf32>
    %325 = arith.mulf %320, %324 : vector<8x32xf32>
    %326 = vector.broadcast %306 : vector<1x32xf32> to vector<8x32xf32>
    %327 = arith.mulf %325, %326 : vector<8x32xf32>
    %328 = vector.broadcast %307 : vector<1x32xf32> to vector<8x32xf32>
    %329 = arith.addf %327, %328 : vector<8x32xf32>
    %c0_150 = arith.constant 0 : index
    %c0_151 = arith.constant 0 : index
    %330 = vector.load %arg39[%c0_150, %c0_151] : memref<8x8xf32, #tpu.memory_space<vmem>>, vector<8x8xf32>
    %cst_152 = arith.constant dense<0.000000e+00> : vector<8x32xf32>
    %331 = tpu.matmul %330, %329, %cst_152 {dimension_numbers = #tpu.dot_dimension_numbers<[1], [0], [0], [1], [0, 0, 1, 1], [], []>} : vector<8x8xf32>, vector<8x32xf32>, vector<8x32xf32> -> vector<8x32xf32>
    %c0_153 = arith.constant 0 : index
    %c0_154 = arith.constant 0 : index
    %332 = vector.load %arg40[%c0_153, %c0_154] : memref<32x64xf32, #tpu.memory_space<vmem>>, vector<32x64xf32>
    %cst_155 = arith.constant dense<0.000000e+00> : vector<8x64xf32>
    %333 = tpu.matmul %331, %332, %cst_155 {dimension_numbers = #tpu.dot_dimension_numbers<[1], [0], [0], [1], [0, 0, 1, 1], [], []>} : vector<8x32xf32>, vector<32x64xf32>, vector<8x64xf32> -> vector<8x64xf32>
    %c0_156 = arith.constant 0 : index
    %c0_157 = arith.constant 0 : index
    %334 = vector.load %arg41[%c0_156, %c0_157] : memref<1x64xf32, #tpu.memory_space<vmem>>, vector<1x64xf32>
    %335 = vector.broadcast %334 : vector<1x64xf32> to vector<8x64xf32>
    %336 = arith.addf %333, %335 : vector<8x64xf32>
    %337 = arith.mulf %336, %336 : vector<8x64xf32>
    %338 = arith.mulf %336, %337 : vector<8x64xf32>
    %cst_158 = arith.constant 4.471500e-02 : f32
    %339 = vector.broadcast %cst_158 : f32 to vector<8x64xf32>
    %340 = arith.mulf %339, %338 : vector<8x64xf32>
    %341 = arith.addf %336, %340 : vector<8x64xf32>
    %cst_159 = arith.constant 0.797884583 : f32
    %342 = vector.broadcast %cst_159 : f32 to vector<8x64xf32>
    %343 = arith.mulf %342, %341 : vector<8x64xf32>
    %344 = math.tanh %343 : vector<8x64xf32>
    %cst_160 = arith.constant 1.000000e+00 : f32
    %345 = vector.broadcast %cst_160 : f32 to vector<8x64xf32>
    %346 = arith.addf %345, %344 : vector<8x64xf32>
    %cst_161 = arith.constant 5.000000e-01 : f32
    %347 = vector.broadcast %cst_161 : f32 to vector<8x64xf32>
    %348 = arith.mulf %347, %346 : vector<8x64xf32>
    %349 = arith.mulf %336, %348 : vector<8x64xf32>
    %c0_162 = arith.constant 0 : index
    %c0_163 = arith.constant 0 : index
    %350 = vector.load %arg42[%c0_162, %c0_163] : memref<64x64xf32, #tpu.memory_space<vmem>>, vector<64x64xf32>
    %cst_164 = arith.constant dense<0.000000e+00> : vector<8x64xf32>
    %351 = tpu.matmul %349, %350, %cst_164 {dimension_numbers = #tpu.dot_dimension_numbers<[1], [0], [0], [1], [0, 0, 1, 1], [], []>} : vector<8x64xf32>, vector<64x64xf32>, vector<8x64xf32> -> vector<8x64xf32>
    %c0_165 = arith.constant 0 : index
    %c0_166 = arith.constant 0 : index
    %352 = vector.load %arg43[%c0_165, %c0_166] : memref<1x64xf32, #tpu.memory_space<vmem>>, vector<1x64xf32>
    %353 = vector.broadcast %352 : vector<1x64xf32> to vector<8x64xf32>
    %354 = arith.addf %351, %353 : vector<8x64xf32>
    %355 = vector.extract_strided_slice %354 {offsets = [0, 0], sizes = [8, 32], strides = [1, 1]} : vector<8x64xf32> to vector<8x32xf32>
    %356 = vector.extract_strided_slice %354 {offsets = [0, 32], sizes = [8, 32], strides = [1, 1]} : vector<8x64xf32> to vector<8x32xf32>
    %357 = arith.negf %356 : vector<8x32xf32>
    %358 = math.exp %357 : vector<8x32xf32>
    %cst_167 = arith.constant 1.000000e+00 : f32
    %359 = vector.broadcast %cst_167 : f32 to vector<8x32xf32>
    %360 = arith.addf %359, %358 : vector<8x32xf32>
    %361 = arith.divf %359, %360 : vector<8x32xf32>
    %362 = arith.mulf %356, %361 : vector<8x32xf32>
    %363 = arith.mulf %355, %362 : vector<8x32xf32>
    %364 = arith.addf %363, %305 : vector<8x32xf32>
    %c0_168 = arith.constant 0 : index
    %c0_169 = arith.constant 0 : index
    %c0_170 = arith.constant 0 : index
    %365 = vector.load %arg62[%c0_168, %c0_169, %c0_170] : memref<1x8x32xf32, #tpu.memory_space<vmem>>, vector<1x8x32xf32>
    %366 = vector.shape_cast %365 : vector<1x8x32xf32> to vector<8x32xf32>
    %367 = vector.shape_cast %364 : vector<8x32xf32> to vector<1x8x32xf32>
    tpu.vector_store %arg62[%c0_168, %c0_169, %c0_170], %367 {strides = array<i32>} : memref<1x8x32xf32, #tpu.memory_space<vmem>>, vector<1x8x32xf32>,
    %cst_171 = arith.constant 0.000000e+00 : f32
    %368 = vector.broadcast %cst_171 : f32 to vector<4x32xf32>
    %c0_172 = arith.constant 0 : index
    %c0_173 = arith.constant 0 : index
    %369 = vector.load %arg44[%c0_172, %c0_173] : memref<4x8xf32, #tpu.memory_space<vmem>>, vector<4x8xf32>
    %cst_174 = arith.constant dense<0.000000e+00> : vector<4x32xf32>
    %370 = tpu.matmul %369, %364, %cst_174 {dimension_numbers = #tpu.dot_dimension_numbers<[1], [0], [0], [1], [0, 0, 1, 1], [], []>} : vector<4x8xf32>, vector<8x32xf32>, vector<4x32xf32> -> vector<4x32xf32>
    %c0_175 = arith.constant 0 : index
    %c0_176 = arith.constant 0 : index
    %371 = vector.load %arg46[%c0_175, %c0_176] : memref<64x32xf32, #tpu.memory_space<vmem>>, vector<32x32xf32>
    %cst_177 = arith.constant dense<0.000000e+00> : vector<4x32xf32>
    %372 = tpu.matmul %370, %371, %cst_177 {dimension_numbers = #tpu.dot_dimension_numbers<[1], [0], [0], [1], [0, 0, 1, 1], [], []>} : vector<4x32xf32>, vector<32x32xf32>, vector<4x32xf32> -> vector<4x32xf32>
    %373 = arith.addf %368, %372 : vector<4x32xf32>
    %c0_178 = arith.constant 0 : index
    %c0_179 = arith.constant 0 : index
    %374 = vector.load %arg45[%c0_178, %c0_179] : memref<4x8xf32, #tpu.memory_space<vmem>>, vector<4x8xf32>
    %cst_180 = arith.constant dense<0.000000e+00> : vector<4x32xf32>
    %375 = tpu.matmul %374, %364, %cst_180 {dimension_numbers = #tpu.dot_dimension_numbers<[1], [0], [0], [1], [0, 0, 1, 1], [], []>} : vector<4x8xf32>, vector<8x32xf32>, vector<4x32xf32> -> vector<4x32xf32>
    %c32_181 = arith.constant 32 : index
    %c0_182 = arith.constant 0 : index
    %376 = vector.load %arg46[%c32_181, %c0_182] : memref<64x32xf32, #tpu.memory_space<vmem>>, vector<32x32xf32>
    %cst_183 = arith.constant dense<0.000000e+00> : vector<4x32xf32>
    %377 = tpu.matmul %375, %376, %cst_183 {dimension_numbers = #tpu.dot_dimension_numbers<[1], [0], [0], [1], [0, 0, 1, 1], [], []>} : vector<4x32xf32>, vector<32x32xf32>, vector<4x32xf32> -> vector<4x32xf32>
    %378 = arith.addf %373, %377 : vector<4x32xf32>
    %c0_184 = arith.constant 0 : index
    %c0_185 = arith.constant 0 : index
    %379 = vector.load %arg47[%c0_184, %c0_185] : memref<1x32xf32, #tpu.memory_space<vmem>>, vector<1x32xf32>
    %380 = vector.broadcast %379 : vector<1x32xf32> to vector<4x32xf32>
    %381 = arith.addf %378, %380 : vector<4x32xf32>
    %c0_186 = arith.constant 0 : index
    %c0_187 = arith.constant 0 : index
    %382 = vector.load %arg48[%c0_186, %c0_187] : memref<1x32xf32, #tpu.memory_space<vmem>>, vector<1x32xf32>
    %c0_188 = arith.constant 0 : index
    %c0_189 = arith.constant 0 : index
    %383 = vector.load %arg49[%c0_188, %c0_189] : memref<1x32xf32, #tpu.memory_space<vmem>>, vector<1x32xf32>
    %cst_190 = arith.constant dense<0.000000e+00> : vector<4xf32>
    %384 = vector.multi_reduction <add>, %381, %cst_190 [1] : vector<4x32xf32> to vector<4xf32>
    %385 = vector.shape_cast %384 : vector<4xf32> to vector<4x1xf32>
    %cst_191 = arith.constant 3.200000e+01 : f32
    %386 = vector.broadcast %cst_191 : f32 to vector<4x1xf32>
    %387 = arith.divf %385, %386 : vector<4x1xf32>
    %388 = vector.broadcast %387 : vector<4x1xf32> to vector<4x32xf32>
    %389 = arith.subf %381, %388 : vector<4x32xf32>
    %390 = arith.mulf %389, %389 : vector<4x32xf32>
    %cst_192 = arith.constant dense<0.000000e+00> : vector<4xf32>
    %391 = vector.multi_reduction <add>, %390, %cst_192 [1] : vector<4x32xf32> to vector<4xf32>
    %392 = vector.shape_cast %391 : vector<4xf32> to vector<4x1xf32>
    %cst_193 = arith.constant 3.200000e+01 : f32
    %393 = vector.broadcast %cst_193 : f32 to vector<4x1xf32>
    %394 = arith.divf %392, %393 : vector<4x1xf32>
    %395 = vector.broadcast %387 : vector<4x1xf32> to vector<4x32xf32>
    %396 = arith.subf %381, %395 : vector<4x32xf32>
    %cst_194 = arith.constant 9.99999974E-6 : f32
    %397 = vector.broadcast %cst_194 : f32 to vector<4x1xf32>
    %398 = arith.addf %394, %397 : vector<4x1xf32>
    %399 = math.rsqrt %398 : vector<4x1xf32>
    %400 = vector.broadcast %399 : vector<4x1xf32> to vector<4x32xf32>
    %401 = arith.mulf %396, %400 : vector<4x32xf32>
    %402 = vector.broadcast %382 : vector<1x32xf32> to vector<4x32xf32>
    %403 = arith.mulf %401, %402 : vector<4x32xf32>
    %404 = vector.broadcast %383 : vector<1x32xf32> to vector<4x32xf32>
    %405 = arith.addf %403, %404 : vector<4x32xf32>
    %c0_195 = arith.constant 0 : index
    %c0_196 = arith.constant 0 : index
    %406 = vector.load %arg50[%c0_195, %c0_196] : memref<32x64xf32, #tpu.memory_space<vmem>>, vector<32x64xf32>
    %cst_197 = arith.constant dense<0.000000e+00> : vector<4x64xf32>
    %407 = tpu.matmul %405, %406, %cst_197 {dimension_numbers = #tpu.dot_dimension_numbers<[1], [0], [0], [1], [0, 0, 1, 1], [], []>} : vector<4x32xf32>, vector<32x64xf32>, vector<4x64xf32> -> vector<4x64xf32>
    %c0_198 = arith.constant 0 : index
    %c0_199 = arith.constant 0 : index
    %408 = vector.load %arg51[%c0_198, %c0_199] : memref<1x64xf32, #tpu.memory_space<vmem>>, vector<1x64xf32>
    %409 = vector.broadcast %408 : vector<1x64xf32> to vector<4x64xf32>
    %410 = arith.addf %407, %409 : vector<4x64xf32>
    %411 = arith.mulf %410, %410 : vector<4x64xf32>
    %412 = arith.mulf %410, %411 : vector<4x64xf32>
    %cst_200 = arith.constant 4.471500e-02 : f32
    %413 = vector.broadcast %cst_200 : f32 to vector<4x64xf32>
    %414 = arith.mulf %413, %412 : vector<4x64xf32>
    %415 = arith.addf %410, %414 : vector<4x64xf32>
    %cst_201 = arith.constant 0.797884583 : f32
    %416 = vector.broadcast %cst_201 : f32 to vector<4x64xf32>
    %417 = arith.mulf %416, %415 : vector<4x64xf32>
    %418 = math.tanh %417 : vector<4x64xf32>
    %cst_202 = arith.constant 1.000000e+00 : f32
    %419 = vector.broadcast %cst_202 : f32 to vector<4x64xf32>
    %420 = arith.addf %419, %418 : vector<4x64xf32>
    %cst_203 = arith.constant 5.000000e-01 : f32
    %421 = vector.broadcast %cst_203 : f32 to vector<4x64xf32>
    %422 = arith.mulf %421, %420 : vector<4x64xf32>
    %423 = arith.mulf %410, %422 : vector<4x64xf32>
    %c0_204 = arith.constant 0 : index
    %c0_205 = arith.constant 0 : index
    %424 = vector.load %arg52[%c0_204, %c0_205] : memref<64x64xf32, #tpu.memory_space<vmem>>, vector<64x64xf32>
    %cst_206 = arith.constant dense<0.000000e+00> : vector<4x64xf32>
    %425 = tpu.matmul %423, %424, %cst_206 {dimension_numbers = #tpu.dot_dimension_numbers<[1], [0], [0], [1], [0, 0, 1, 1], [], []>} : vector<4x64xf32>, vector<64x64xf32>, vector<4x64xf32> -> vector<4x64xf32>
    %c0_207 = arith.constant 0 : index
    %c0_208 = arith.constant 0 : index
    %426 = vector.load %arg53[%c0_207, %c0_208] : memref<1x64xf32, #tpu.memory_space<vmem>>, vector<1x64xf32>
    %427 = vector.broadcast %426 : vector<1x64xf32> to vector<4x64xf32>
    %428 = arith.addf %425, %427 : vector<4x64xf32>
    %429 = vector.extract_strided_slice %428 {offsets = [0, 0], sizes = [4, 32], strides = [1, 1]} : vector<4x64xf32> to vector<4x32xf32>
    %430 = vector.extract_strided_slice %428 {offsets = [0, 32], sizes = [4, 32], strides = [1, 1]} : vector<4x64xf32> to vector<4x32xf32>
    %431 = arith.negf %430 : vector<4x32xf32>
    %432 = math.exp %431 : vector<4x32xf32>
    %cst_209 = arith.constant 1.000000e+00 : f32
    %433 = vector.broadcast %cst_209 : f32 to vector<4x32xf32>
    %434 = arith.addf %433, %432 : vector<4x32xf32>
    %435 = arith.divf %433, %434 : vector<4x32xf32>
    %436 = arith.mulf %430, %435 : vector<4x32xf32>
    %437 = arith.mulf %429, %436 : vector<4x32xf32>
    %438 = arith.addf %437, %381 : vector<4x32xf32>
    %c0_210 = arith.constant 0 : index
    %c0_211 = arith.constant 0 : index
    %439 = vector.load %arg54[%c0_210, %c0_211] : memref<1x32xf32, #tpu.memory_space<vmem>>, vector<1x32xf32>
    %c0_212 = arith.constant 0 : index
    %c0_213 = arith.constant 0 : index
    %440 = vector.load %arg55[%c0_212, %c0_213] : memref<1x32xf32, #tpu.memory_space<vmem>>, vector<1x32xf32>
    %cst_214 = arith.constant dense<0.000000e+00> : vector<4xf32>
    %441 = vector.multi_reduction <add>, %438, %cst_214 [1] : vector<4x32xf32> to vector<4xf32>
    %442 = vector.shape_cast %441 : vector<4xf32> to vector<4x1xf32>
    %cst_215 = arith.constant 3.200000e+01 : f32
    %443 = vector.broadcast %cst_215 : f32 to vector<4x1xf32>
    %444 = arith.divf %442, %443 : vector<4x1xf32>
    %445 = vector.broadcast %444 : vector<4x1xf32> to vector<4x32xf32>
    %446 = arith.subf %438, %445 : vector<4x32xf32>
    %447 = arith.mulf %446, %446 : vector<4x32xf32>
    %cst_216 = arith.constant dense<0.000000e+00> : vector<4xf32>
    %448 = vector.multi_reduction <add>, %447, %cst_216 [1] : vector<4x32xf32> to vector<4xf32>
    %449 = vector.shape_cast %448 : vector<4xf32> to vector<4x1xf32>
    %cst_217 = arith.constant 3.200000e+01 : f32
    %450 = vector.broadcast %cst_217 : f32 to vector<4x1xf32>
    %451 = arith.divf %449, %450 : vector<4x1xf32>
    %452 = vector.broadcast %444 : vector<4x1xf32> to vector<4x32xf32>
    %453 = arith.subf %438, %452 : vector<4x32xf32>
    %cst_218 = arith.constant 9.99999974E-6 : f32
    %454 = vector.broadcast %cst_218 : f32 to vector<4x1xf32>
    %455 = arith.addf %451, %454 : vector<4x1xf32>
    %456 = math.rsqrt %455 : vector<4x1xf32>
    %457 = vector.broadcast %456 : vector<4x1xf32> to vector<4x32xf32>
    %458 = arith.mulf %453, %457 : vector<4x32xf32>
    %459 = vector.broadcast %439 : vector<1x32xf32> to vector<4x32xf32>
    %460 = arith.mulf %458, %459 : vector<4x32xf32>
    %461 = vector.broadcast %440 : vector<1x32xf32> to vector<4x32xf32>
    %462 = arith.addf %460, %461 : vector<4x32xf32>
    %c0_219 = arith.constant 0 : index
    %c0_220 = arith.constant 0 : index
    %463 = vector.load %arg56[%c0_219, %c0_220] : memref<4x4xf32, #tpu.memory_space<vmem>>, vector<4x4xf32>
    %cst_221 = arith.constant dense<0.000000e+00> : vector<4x32xf32>
    %464 = tpu.matmul %463, %462, %cst_221 {dimension_numbers = #tpu.dot_dimension_numbers<[1], [0], [0], [1], [0, 0, 1, 1], [], []>} : vector<4x4xf32>, vector<4x32xf32>, vector<4x32xf32> -> vector<4x32xf32>
    %c0_222 = arith.constant 0 : index
    %c0_223 = arith.constant 0 : index
    %465 = vector.load %arg57[%c0_222, %c0_223] : memref<32x64xf32, #tpu.memory_space<vmem>>, vector<32x64xf32>
    %cst_224 = arith.constant dense<0.000000e+00> : vector<4x64xf32>
    %466 = tpu.matmul %464, %465, %cst_224 {dimension_numbers = #tpu.dot_dimension_numbers<[1], [0], [0], [1], [0, 0, 1, 1], [], []>} : vector<4x32xf32>, vector<32x64xf32>, vector<4x64xf32> -> vector<4x64xf32>
    %c0_225 = arith.constant 0 : index
    %c0_226 = arith.constant 0 : index
    %467 = vector.load %arg58[%c0_225, %c0_226] : memref<1x64xf32, #tpu.memory_space<vmem>>, vector<1x64xf32>
    %468 = vector.broadcast %467 : vector<1x64xf32> to vector<4x64xf32>
    %469 = arith.addf %466, %468 : vector<4x64xf32>
    %470 = arith.mulf %469, %469 : vector<4x64xf32>
    %471 = arith.mulf %469, %470 : vector<4x64xf32>
    %cst_227 = arith.constant 4.471500e-02 : f32
    %472 = vector.broadcast %cst_227 : f32 to vector<4x64xf32>
    %473 = arith.mulf %472, %471 : vector<4x64xf32>
    %474 = arith.addf %469, %473 : vector<4x64xf32>
    %cst_228 = arith.constant 0.797884583 : f32
    %475 = vector.broadcast %cst_228 : f32 to vector<4x64xf32>
    %476 = arith.mulf %475, %474 : vector<4x64xf32>
    %477 = math.tanh %476 : vector<4x64xf32>
    %cst_229 = arith.constant 1.000000e+00 : f32
    %478 = vector.broadcast %cst_229 : f32 to vector<4x64xf32>
    %479 = arith.addf %478, %477 : vector<4x64xf32>
    %cst_230 = arith.constant 5.000000e-01 : f32
    %480 = vector.broadcast %cst_230 : f32 to vector<4x64xf32>
    %481 = arith.mulf %480, %479 : vector<4x64xf32>
    %482 = arith.mulf %469, %481 : vector<4x64xf32>
    %c0_231 = arith.constant 0 : index
    %c0_232 = arith.constant 0 : index
    %483 = vector.load %arg59[%c0_231, %c0_232] : memref<64x64xf32, #tpu.memory_space<vmem>>, vector<64x64xf32>
    %cst_233 = arith.constant dense<0.000000e+00> : vector<4x64xf32>
    %484 = tpu.matmul %482, %483, %cst_233 {dimension_numbers = #tpu.dot_dimension_numbers<[1], [0], [0], [1], [0, 0, 1, 1], [], []>} : vector<4x64xf32>, vector<64x64xf32>, vector<4x64xf32> -> vector<4x64xf32>
    %c0_234 = arith.constant 0 : index
    %c0_235 = arith.constant 0 : index
    %485 = vector.load %arg60[%c0_234, %c0_235] : memref<1x64xf32, #tpu.memory_space<vmem>>, vector<1x64xf32>
    %486 = vector.broadcast %485 : vector<1x64xf32> to vector<4x64xf32>
    %487 = arith.addf %484, %486 : vector<4x64xf32>
    %488 = vector.extract_strided_slice %487 {offsets = [0, 0], sizes = [4, 32], strides = [1, 1]} : vector<4x64xf32> to vector<4x32xf32>
    %489 = vector.extract_strided_slice %487 {offsets = [0, 32], sizes = [4, 32], strides = [1, 1]} : vector<4x64xf32> to vector<4x32xf32>
    %490 = arith.negf %489 : vector<4x32xf32>
    %491 = math.exp %490 : vector<4x32xf32>
    %cst_236 = arith.constant 1.000000e+00 : f32
    %492 = vector.broadcast %cst_236 : f32 to vector<4x32xf32>
    %493 = arith.addf %492, %491 : vector<4x32xf32>
    %494 = arith.divf %492, %493 : vector<4x32xf32>
    %495 = arith.mulf %489, %494 : vector<4x32xf32>
    %496 = arith.mulf %488, %495 : vector<4x32xf32>
    %497 = arith.addf %496, %438 : vector<4x32xf32>
    %c0_237 = arith.constant 0 : index
    %c0_238 = arith.constant 0 : index
    %c0_239 = arith.constant 0 : index
    %498 = vector.load %arg63[%c0_237, %c0_238, %c0_239] : memref<1x4x32xf32, #tpu.memory_space<vmem>>, vector<1x4x32xf32>
    %499 = vector.shape_cast %498 : vector<1x4x32xf32> to vector<4x32xf32>
    %500 = vector.shape_cast %497 : vector<4x32xf32> to vector<1x4x32xf32>
    tpu.vector_store %arg63[%c0_237, %c0_238, %c0_239], %500 {strides = array<i32>} : memref<1x4x32xf32, #tpu.memory_space<vmem>>, vector<1x4x32xf32>,
    return
  }
  func.func @transform_0(%arg0: i32) -> (i32, i32, i32) {
    %c0_i32 = arith.constant 0 : i32
    %c0_i32_0 = arith.constant 0 : i32
    %c0_i32_1 = arith.constant 0 : i32
    return %arg0, %c0_i32, %c0_i32_0 : i32, i32, i32
  }
  func.func @transform_1(%arg0: i32) -> (i32, i32) {
    %c0_i32 = arith.constant 0 : i32
    %c0_i32_0 = arith.constant 0 : i32
    %c0_i32_1 = arith.constant 0 : i32
    return %c0_i32, %c0_i32_0 : i32, i32
  }
  func.func @transform_2(%arg0: i32) -> (i32, i32) {
    %c0_i32 = arith.constant 0 : i32
    %c0_i32_0 = arith.constant 0 : i32
    %c0_i32_1 = arith.constant 0 : i32
    return %c0_i32, %c0_i32_0 : i32, i32
  }
  func.func @transform_3(%arg0: i32) -> (i32, i32) {
    %c0_i32 = arith.constant 0 : i32
    %c0_i32_0 = arith.constant 0 : i32
    %c0_i32_1 = arith.constant 0 : i32
    return %c0_i32, %c0_i32_0 : i32, i32
  }
  func.func @transform_4(%arg0: i32) -> (i32, i32) {
    %c0_i32 = arith.constant 0 : i32
    %c0_i32_0 = arith.constant 0 : i32
    %c0_i32_1 = arith.constant 0 : i32
    return %c0_i32, %c0_i32_0 : i32, i32
  }
  func.func @transform_5(%arg0: i32) -> (i32, i32) {
    %c0_i32 = arith.constant 0 : i32
    %c0_i32_0 = arith.constant 0 : i32
    %c0_i32_1 = arith.constant 0 : i32
    return %c0_i32, %c0_i32_0 : i32, i32
  }
  func.func @transform_6(%arg0: i32) -> (i32, i32) {
    %c0_i32 = arith.constant 0 : i32
    %c0_i32_0 = arith.constant 0 : i32
    %c0_i32_1 = arith.constant 0 : i32
    return %c0_i32, %c0_i32_0 : i32, i32
  }
  func.func @transform_7(%arg0: i32) -> (i32, i32) {
    %c0_i32 = arith.constant 0 : i32
    %c0_i32_0 = arith.constant 0 : i32
    %c0_i32_1 = arith.constant 0 : i32
    return %c0_i32, %c0_i32_0 : i32, i32
  }
  func.func @transform_8(%arg0: i32) -> (i32, i32) {
    %c0_i32 = arith.constant 0 : i32
    %c0_i32_0 = arith.constant 0 : i32
    %c0_i32_1 = arith.constant 0 : i32
    return %c0_i32, %c0_i32_0 : i32, i32
  }
  func.func @transform_9(%arg0: i32) -> (i32, i32) {
    %c0_i32 = arith.constant 0 : i32
    %c0_i32_0 = arith.constant 0 : i32
    %c0_i32_1 = arith.constant 0 : i32
    return %c0_i32, %c0_i32_0 : i32, i32
  }
  func.func @transform_10(%arg0: i32) -> (i32, i32) {
    %c0_i32 = arith.constant 0 : i32
    %c0_i32_0 = arith.constant 0 : i32
    %c0_i32_1 = arith.constant 0 : i32
    return %c0_i32, %c0_i32_0 : i32, i32
  }
  func.func @transform_11(%arg0: i32) -> (i32, i32) {
    %c0_i32 = arith.constant 0 : i32
    %c0_i32_0 = arith.constant 0 : i32
    %c0_i32_1 = arith.constant 0 : i32
    return %c0_i32, %c0_i32_0 : i32, i32
  }
  func.func @transform_12(%arg0: i32) -> (i32, i32) {
    %c0_i32 = arith.constant 0 : i32
    %c0_i32_0 = arith.constant 0 : i32
    %c0_i32_1 = arith.constant 0 : i32
    return %c0_i32, %c0_i32_0 : i32, i32
  }
  func.func @transform_13(%arg0: i32) -> (i32, i32) {
    %c0_i32 = arith.constant 0 : i32
    %c0_i32_0 = arith.constant 0 : i32
    %c0_i32_1 = arith.constant 0 : i32
    return %c0_i32, %c0_i32_0 : i32, i32
  }
  func.func @transform_14(%arg0: i32) -> (i32, i32) {
    %c0_i32 = arith.constant 0 : i32
    %c0_i32_0 = arith.constant 0 : i32
    %c0_i32_1 = arith.constant 0 : i32
    return %c0_i32, %c0_i32_0 : i32, i32
  }
  func.func @transform_15(%arg0: i32) -> (i32, i32) {
    %c0_i32 = arith.constant 0 : i32
    %c0_i32_0 = arith.constant 0 : i32
    %c0_i32_1 = arith.constant 0 : i32
    return %c0_i32, %c0_i32_0 : i32, i32
  }
  func.func @transform_16(%arg0: i32) -> (i32, i32) {
    %c0_i32 = arith.constant 0 : i32
    %c0_i32_0 = arith.constant 0 : i32
    %c0_i32_1 = arith.constant 0 : i32
    return %c0_i32, %c0_i32_0 : i32, i32
  }
  func.func @transform_17(%arg0: i32) -> (i32, i32) {
    %c0_i32 = arith.constant 0 : i32
    %c0_i32_0 = arith.constant 0 : i32
    %c0_i32_1 = arith.constant 0 : i32
    return %c0_i32, %c0_i32_0 : i32, i32
  }
  func.func @transform_18(%arg0: i32) -> (i32, i32) {
    %c0_i32 = arith.constant 0 : i32
    %c0_i32_0 = arith.constant 0 : i32
    %c0_i32_1 = arith.constant 0 : i32
    return %c0_i32, %c0_i32_0 : i32, i32
  }
  func.func @transform_19(%arg0: i32) -> (i32, i32) {
    %c0_i32 = arith.constant 0 : i32
    %c0_i32_0 = arith.constant 0 : i32
    %c0_i32_1 = arith.constant 0 : i32
    return %c0_i32, %c0_i32_0 : i32, i32
  }
  func.func @transform_20(%arg0: i32) -> (i32, i32) {
    %c0_i32 = arith.constant 0 : i32
    %c0_i32_0 = arith.constant 0 : i32
    %c0_i32_1 = arith.constant 0 : i32
    return %c0_i32, %c0_i32_0 : i32, i32
  }
  func.func @transform_21(%arg0: i32) -> (i32, i32) {
    %c0_i32 = arith.constant 0 : i32
    %c0_i32_0 = arith.constant 0 : i32
    %c0_i32_1 = arith.constant 0 : i32
    return %c0_i32, %c0_i32_0 : i32, i32
  }
  func.func @transform_22(%arg0: i32) -> (i32, i32) {
    %c0_i32 = arith.constant 0 : i32
    %c0_i32_0 = arith.constant 0 : i32
    %c0_i32_1 = arith.constant 0 : i32
    return %c0_i32, %c0_i32_0 : i32, i32
  }
  func.func @transform_23(%arg0: i32) -> (i32, i32) {
    %c0_i32 = arith.constant 0 : i32
    %c0_i32_0 = arith.constant 0 : i32
    %c0_i32_1 = arith.constant 0 : i32
    return %c0_i32, %c0_i32_0 : i32, i32
  }
  func.func @transform_24(%arg0: i32) -> (i32, i32) {
    %c0_i32 = arith.constant 0 : i32
    %c0_i32_0 = arith.constant 0 : i32
    %c0_i32_1 = arith.constant 0 : i32
    return %c0_i32, %c0_i32_0 : i32, i32
  }
  func.func @transform_25(%arg0: i32) -> (i32, i32) {
    %c0_i32 = arith.constant 0 : i32
    %c0_i32_0 = arith.constant 0 : i32
    %c0_i32_1 = arith.constant 0 : i32
    return %c0_i32, %c0_i32_0 : i32, i32
  }
  func.func @transform_26(%arg0: i32) -> (i32, i32) {
    %c0_i32 = arith.constant 0 : i32
    %c0_i32_0 = arith.constant 0 : i32
    %c0_i32_1 = arith.constant 0 : i32
    return %c0_i32, %c0_i32_0 : i32, i32
  }
  func.func @transform_27(%arg0: i32) -> (i32, i32) {
    %c0_i32 = arith.constant 0 : i32
    %c0_i32_0 = arith.constant 0 : i32
    %c0_i32_1 = arith.constant 0 : i32
    return %c0_i32, %c0_i32_0 : i32, i32
  }
  func.func @transform_28(%arg0: i32) -> (i32, i32) {
    %c0_i32 = arith.constant 0 : i32
    %c0_i32_0 = arith.constant 0 : i32
    %c0_i32_1 = arith.constant 0 : i32
    return %c0_i32, %c0_i32_0 : i32, i32
  }
  func.func @transform_29(%arg0: i32) -> (i32, i32) {
    %c0_i32 = arith.constant 0 : i32
    %c0_i32_0 = arith.constant 0 : i32
    %c0_i32_1 = arith.constant 0 : i32
    return %c0_i32, %c0_i32_0 : i32, i32
  }
  func.func @transform_30(%arg0: i32) -> (i32, i32) {
    %c0_i32 = arith.constant 0 : i32
    %c0_i32_0 = arith.constant 0 : i32
    %c0_i32_1 = arith.constant 0 : i32
    return %c0_i32, %c0_i32_0 : i32, i32
  }
  func.func @transform_31(%arg0: i32) -> (i32, i32) {
    %c0_i32 = arith.constant 0 : i32
    %c0_i32_0 = arith.constant 0 : i32
    %c0_i32_1 = arith.constant 0 : i32
    return %c0_i32, %c0_i32_0 : i32, i32
  }
  func.func @transform_32(%arg0: i32) -> (i32, i32) {
    %c0_i32 = arith.constant 0 : i32
    %c0_i32_0 = arith.constant 0 : i32
    %c0_i32_1 = arith.constant 0 : i32
    return %c0_i32, %c0_i32_0 : i32, i32
  }
  func.func @transform_33(%arg0: i32) -> (i32, i32) {
    %c0_i32 = arith.constant 0 : i32
    %c0_i32_0 = arith.constant 0 : i32
    %c0_i32_1 = arith.constant 0 : i32
    return %c0_i32, %c0_i32_0 : i32, i32
  }
  func.func @transform_34(%arg0: i32) -> (i32, i32) {
    %c0_i32 = arith.constant 0 : i32
    %c0_i32_0 = arith.constant 0 : i32
    %c0_i32_1 = arith.constant 0 : i32
    return %c0_i32, %c0_i32_0 : i32, i32
  }
  func.func @transform_35(%arg0: i32) -> (i32, i32) {
    %c0_i32 = arith.constant 0 : i32
    %c0_i32_0 = arith.constant 0 : i32
    %c0_i32_1 = arith.constant 0 : i32
    return %c0_i32, %c0_i32_0 : i32, i32
  }
  func.func @transform_36(%arg0: i32) -> (i32, i32) {
    %c0_i32 = arith.constant 0 : i32
    %c0_i32_0 = arith.constant 0 : i32
    %c0_i32_1 = arith.constant 0 : i32
    return %c0_i32, %c0_i32_0 : i32, i32
  }
  func.func @transform_37(%arg0: i32) -> (i32, i32) {
    %c0_i32 = arith.constant 0 : i32
    %c0_i32_0 = arith.constant 0 : i32
    %c0_i32_1 = arith.constant 0 : i32
    return %c0_i32, %c0_i32_0 : i32, i32
  }
  func.func @transform_38(%arg0: i32) -> (i32, i32) {
    %c0_i32 = arith.constant 0 : i32
    %c0_i32_0 = arith.constant 0 : i32
    %c0_i32_1 = arith.constant 0 : i32
    return %c0_i32, %c0_i32_0 : i32, i32
  }
  func.func @transform_39(%arg0: i32) -> (i32, i32) {
    %c0_i32 = arith.constant 0 : i32
    %c0_i32_0 = arith.constant 0 : i32
    %c0_i32_1 = arith.constant 0 : i32
    return %c0_i32, %c0_i32_0 : i32, i32
  }
  func.func @transform_40(%arg0: i32) -> (i32, i32) {
    %c0_i32 = arith.constant 0 : i32
    %c0_i32_0 = arith.constant 0 : i32
    %c0_i32_1 = arith.constant 0 : i32
    return %c0_i32, %c0_i32_0 : i32, i32
  }
  func.func @transform_41(%arg0: i32) -> (i32, i32) {
    %c0_i32 = arith.constant 0 : i32
    %c0_i32_0 = arith.constant 0 : i32
    %c0_i32_1 = arith.constant 0 : i32
    return %c0_i32, %c0_i32_0 : i32, i32
  }
  func.func @transform_42(%arg0: i32) -> (i32, i32) {
    %c0_i32 = arith.constant 0 : i32
    %c0_i32_0 = arith.constant 0 : i32
    %c0_i32_1 = arith.constant 0 : i32
    return %c0_i32, %c0_i32_0 : i32, i32
  }
  func.func @transform_43(%arg0: i32) -> (i32, i32) {
    %c0_i32 = arith.constant 0 : i32
    %c0_i32_0 = arith.constant 0 : i32
    %c0_i32_1 = arith.constant 0 : i32
    return %c0_i32, %c0_i32_0 : i32, i32
  }
  func.func @transform_44(%arg0: i32) -> (i32, i32) {
    %c0_i32 = arith.constant 0 : i32
    %c0_i32_0 = arith.constant 0 : i32
    %c0_i32_1 = arith.constant 0 : i32
    return %c0_i32, %c0_i32_0 : i32, i32
  }
  func.func @transform_45(%arg0: i32) -> (i32, i32) {
    %c0_i32 = arith.constant 0 : i32
    %c0_i32_0 = arith.constant 0 : i32
    %c0_i32_1 = arith.constant 0 : i32
    return %c0_i32, %c0_i32_0 : i32, i32
  }
  func.func @transform_46(%arg0: i32) -> (i32, i32) {
    %c0_i32 = arith.constant 0 : i32
    %c0_i32_0 = arith.constant 0 : i32
    %c0_i32_1 = arith.constant 0 : i32
    return %c0_i32, %c0_i32_0 : i32, i32
  }
  func.func @transform_47(%arg0: i32) -> (i32, i32) {
    %c0_i32 = arith.constant 0 : i32
    %c0_i32_0 = arith.constant 0 : i32
    %c0_i32_1 = arith.constant 0 : i32
    return %c0_i32, %c0_i32_0 : i32, i32
  }
  func.func @transform_48(%arg0: i32) -> (i32, i32) {
    %c0_i32 = arith.constant 0 : i32
    %c0_i32_0 = arith.constant 0 : i32
    %c0_i32_1 = arith.constant 0 : i32
    return %c0_i32, %c0_i32_0 : i32, i32
  }
  func.func @transform_49(%arg0: i32) -> (i32, i32) {
    %c0_i32 = arith.constant 0 : i32
    %c0_i32_0 = arith.constant 0 : i32
    %c0_i32_1 = arith.constant 0 : i32
    return %c0_i32, %c0_i32_0 : i32, i32
  }
  func.func @transform_50(%arg0: i32) -> (i32, i32) {
    %c0_i32 = arith.constant 0 : i32
    %c0_i32_0 = arith.constant 0 : i32
    %c0_i32_1 = arith.constant 0 : i32
    return %c0_i32, %c0_i32_0 : i32, i32
  }
  func.func @transform_51(%arg0: i32) -> (i32, i32) {
    %c0_i32 = arith.constant 0 : i32
    %c0_i32_0 = arith.constant 0 : i32
    %c0_i32_1 = arith.constant 0 : i32
    return %c0_i32, %c0_i32_0 : i32, i32
  }
  func.func @transform_52(%arg0: i32) -> (i32, i32) {
    %c0_i32 = arith.constant 0 : i32
    %c0_i32_0 = arith.constant 0 : i32
    %c0_i32_1 = arith.constant 0 : i32
    return %c0_i32, %c0_i32_0 : i32, i32
  }
  func.func @transform_53(%arg0: i32) -> (i32, i32) {
    %c0_i32 = arith.constant 0 : i32
    %c0_i32_0 = arith.constant 0 : i32
    %c0_i32_1 = arith.constant 0 : i32
    return %c0_i32, %c0_i32_0 : i32, i32
  }
  func.func @transform_54(%arg0: i32) -> (i32, i32) {
    %c0_i32 = arith.constant 0 : i32
    %c0_i32_0 = arith.constant 0 : i32
    %c0_i32_1 = arith.constant 0 : i32
    return %c0_i32, %c0_i32_0 : i32, i32
  }
  func.func @transform_55(%arg0: i32) -> (i32, i32) {
    %c0_i32 = arith.constant 0 : i32
    %c0_i32_0 = arith.constant 0 : i32
    %c0_i32_1 = arith.constant 0 : i32
    return %c0_i32, %c0_i32_0 : i32, i32
  }
  func.func @transform_56(%arg0: i32) -> (i32, i32) {
    %c0_i32 = arith.constant 0 : i32
    %c0_i32_0 = arith.constant 0 : i32
    %c0_i32_1 = arith.constant 0 : i32
    return %c0_i32, %c0_i32_0 : i32, i32
  }
  func.func @transform_57(%arg0: i32) -> (i32, i32) {
    %c0_i32 = arith.constant 0 : i32
    %c0_i32_0 = arith.constant 0 : i32
    %c0_i32_1 = arith.constant 0 : i32
    return %c0_i32, %c0_i32_0 : i32, i32
  }
  func.func @transform_58(%arg0: i32) -> (i32, i32) {
    %c0_i32 = arith.constant 0 : i32
    %c0_i32_0 = arith.constant 0 : i32
    %c0_i32_1 = arith.constant 0 : i32
    return %c0_i32, %c0_i32_0 : i32, i32
  }
  func.func @transform_59(%arg0: i32) -> (i32, i32) {
    %c0_i32 = arith.constant 0 : i32
    %c0_i32_0 = arith.constant 0 : i32
    %c0_i32_1 = arith.constant 0 : i32
    return %c0_i32, %c0_i32_0 : i32, i32
  }
  func.func @transform_60(%arg0: i32) -> (i32, i32, i32) {
    %c0_i32 = arith.constant 0 : i32
    %c0_i32_0 = arith.constant 0 : i32
    %c0_i32_1 = arith.constant 0 : i32
    return %arg0, %c0_i32, %c0_i32_0 : i32, i32, i32
  }
  func.func @transform_61(%arg0: i32) -> (i32, i32, i32) {
    %c0_i32 = arith.constant 0 : i32
    %c0_i32_0 = arith.constant 0 : i32
    %c0_i32_1 = arith.constant 0 : i32
    return %arg0, %c0_i32, %c0_i32_0 : i32, i32, i32
  }
  func.func @transform_62(%arg0: i32) -> (i32, i32, i32) {
    %c0_i32 = arith.constant 0 : i32
    %c0_i32_0 = arith.constant 0 : i32
    %c0_i32_1 = arith.constant 0 : i32
    return %arg0, %c0_i32, %c0_i32_0 : i32, i32, i32
  }
}

</mosaic_0001>

<bundles_post_ra>
// kernel: tile.43
= control target key start
LH: loop header
LB: loop body
LE: loop exit
PB: predicated region body
PF: predicated region fallthrough
CT: control target
= control target key end

     0   :  { %s22_s0 = inlined_call_operand.vmem [shape: f32[4], index: 0, kind: input, shape index: {}]   ;;  %s23_s1 = inlined_call_operand.vmem [shape: f32[4,4], index: 1, kind: output, shape index: {}]  }
   0x1   :  { %v4_v0 = vld [vmem:[%s22_s0] ss:$0 sm:$0xff] }
   0x2   :  { %5 = vst [vmem:[%s23_s1] sm:$0xf] %v4_v0 }

// kernel: tile.44
= control target key start
LH: loop header
LB: loop body
LE: loop exit
PB: predicated region body
PF: predicated region fallthrough
CT: control target
= control target key end

     0   :  { %vm7_vm0 = vcmask 31744   ;;  %s37_s8 = smov 4   ;;  %s38_s9 = smov 8   ;;  %vm13_vm1 = vcmask 130144   ;;  %vm19_vm2 = vcmask 97344   ;;  %vm25_vm3 = vcmask 64544   ;;  %s55_s0 = inlined_call_operand.vmem [shape: f32[4,4], index: 0, kind: input, shape index: {}]   ;;  %s56_s1 = inlined_call_operand.vmem [shape: f32[16], index: 1, kind: output, shape index: {}]  }
   0x1   :  { %v4_v0 = vld [vmem:[%s55_s0] sm:$0xf]  ;;  %s36_s0 = smov 12  }
   0x2   :  { %5 = vst [vmem:[#allocation1] sm:$0xf] %v4_v0 }
   0x9   :  { %v10_v1 = vld [vmem:[#allocation1 + $0x3] sm:$0x1]   ;;  %v22_v2 = vld [vmem:[#allocation1 + $0x1] sm:$0x1]   ;;  %v6_v3 = vld [vmem:[#allocation1] sm:$0x1]  }
   0xa   :  { %11 = vrot.lane.b32.xlu0 %v10_v1, %s36_s0  ;;  %23 = vrot.lane.b32.xlu1 %v22_v2, %s37_s8  ;;  %v16_v4 = vld [vmem:[#allocation1 + $0x2] sm:$0x1]   ;;  %8 = vst.msk [vmem:[#allocation0] sm:$0x1] %vm7_vm0, %v6_v3  }
   0xe   :  { %17 = vrot.lane.b32.xlu0 %v16_v4, %s38_s9 }
  0x7c   :  { %v12_v5 = vpop.permute.xlu0 %11   ;;  %v24_v6 = vpop.permute.xlu1 %23  }
  0x7d   :  { %14 = vst.msk [vmem:[#allocation0] sm:$0x1] %vm13_vm1, %v12_v5  }
  0x80   :  { %v18_v7 = vpop.permute.xlu0 %17  }
  0x81   :  { %20 = vst.msk [vmem:[#allocation0] sm:$0x1] %vm19_vm2, %v18_v7  }
  0x82   :  { %26 = vst.msk [vmem:[#allocation0] sm:$0x1] %vm25_vm3, %v24_v6  }
  0x89   :  { %v30_v8 = vld [vmem:[#allocation0] sm:$0x1] }
  0x8a   :  { %32 = vst [vmem:[%s56_s1] sm:$0x1] %v30_v8 }

// kernel: tile.33
= control target key start
LH: loop header
LB: loop body
LE: loop exit
PB: predicated region body
PF: predicated region fallthrough
CT: control target
= control target key end

     0   :  { %s22_s0 = inlined_call_operand.vmem [shape: f32[8], index: 0, kind: input, shape index: {}]   ;;  %s23_s1 = inlined_call_operand.vmem [shape: f32[4,8], index: 1, kind: output, shape index: {}]  }
   0x1   :  { %v4_v0 = vld [vmem:[%s22_s0] ss:$0 sm:$0xff] }
   0x2   :  { %5 = vst [vmem:[%s23_s1] sm:$0xf] %v4_v0 }

// kernel: tile.0
= control target key start
LH: loop header
LB: loop body
LE: loop exit
PB: predicated region body
PF: predicated region fallthrough
CT: control target
= control target key end

     0   :  { %s66_s8 = smov 125   ;;  %vm7_vm0 = vcmask 7168   ;;  %s67_s11 = smov 126   ;;  %s117_s0 = inlined_call_operand.vmem [shape: f32[4,8], index: 0, kind: input, shape index: {}]   ;;  %s118_s1 = inlined_call_operand.vmem [shape: f32[32,1], index: 1, kind: output, shape index: {}]  }
   0x1   :  { %v4_v0 = vld [vmem:[%s117_s0] sm:$0xf]  ;;  %s65_s0 = smov 127   ;;  %s68_s12 = smov 124  }
   0x2   :  { %5 = vst [vmem:[#allocation0] sm:$0xf] %v4_v0  ;;  %s69_s13 = smov 123   ;;  %s70_s14 = smov 122  }
   0x3   :  { %s71_s15 = smov 121  }
   0x9   :  { %v9_v1 = vld [vmem:[#allocation0] sm:$0xf]  }
   0xa   :  { %v21_v2 = vld [vmem:[#allocation0] sm:$0xf]   ;;  %10 = vrot.lane.b32.xlu0 %v9_v1, %s65_s0 }
   0xb   :  { %22 = vrot.lane.b32.xlu1 %v21_v2, %s66_s8  ;;  %v15_v3 = vld [vmem:[#allocation0] sm:$0xf]  }
   0xc   :  { %v27_v4 = vld [vmem:[#allocation0] sm:$0xf]  }
   0xd   :  { %v6_v5 = vld [vmem:[#allocation0] sm:$0xf]  }
   0xe   :  { %8 = vst.msk [vmem:[%s118_s1] ss:$8 sm:$0xf] %vm7_vm0, %v6_v5   ;;  %16 = vrot.lane.b32.xlu0 %v15_v3, %s67_s11  ;;  %v33_v6 = vld [vmem:[#allocation0] sm:$0xf]  }
   0xf   :  { %28 = vrot.lane.b32.xlu1 %v27_v4, %s68_s12  ;;  %v39_v7 = vld [vmem:[#allocation0] sm:$0xf]  }
  0x10   :  { %v45_v8 = vld [vmem:[#allocation0] sm:$0xf]  }
  0x12   :  { %34 = vrot.lane.b32.xlu0 %v33_v6, %s69_s13 }
  0x13   :  { %40 = vrot.lane.b32.xlu1 %v39_v7, %s70_s14 }
  0x16   :  { %46 = vrot.lane.b32.xlu0 %v45_v8, %s71_s15 }
  0x7c   :  { %v11_v9 = vpop.permute.xlu0 %10  }
  0x7d   :  { %v23_v10 = vpop.permute.xlu1 %22   ;;  %51 = vst.msk [vmem:[%s118_s1 + $0x1] ss:$8 sm:$0xf] %vm7_vm0, %v11_v9  }
  0x7e   :  { %53 = vst.msk [vmem:[%s118_s1 + $0x3] ss:$8 sm:$0xf] %vm7_vm0, %v23_v10  }
  0x80   :  { %v17_v11 = vpop.permute.xlu0 %16  }
  0x81   :  { %v29_v12 = vpop.permute.xlu1 %28   ;;  %52 = vst.msk [vmem:[%s118_s1 + $0x2] ss:$8 sm:$0xf] %vm7_vm0, %v17_v11  }
  0x82   :  { %54 = vst.msk [vmem:[%s118_s1 + $0x4] ss:$8 sm:$0xf] %vm7_vm0, %v29_v12  }
  0x84   :  { %v35_v13 = vpop.permute.xlu0 %34  }
  0x85   :  { %v41_v14 = vpop.permute.xlu1 %40   ;;  %55 = vst.msk [vmem:[%s118_s1 + $0x5] ss:$8 sm:$0xf] %vm7_vm0, %v35_v13  }
  0x86   :  { %56 = vst.msk [vmem:[%s118_s1 + $0x6] ss:$8 sm:$0xf] %vm7_vm0, %v41_v14  }
  0x88   :  { %v47_v15 = vpop.permute.xlu0 %46  }
  0x89   :  { %57 = vst.msk [vmem:[%s118_s1 + $0x7] ss:$8 sm:$0xf] %vm7_vm0, %v47_v15  }

// kernel: tile.58
= control target key start
LH: loop header
LB: loop body
LE: loop exit
PB: predicated region body
PF: predicated region fallthrough
CT: control target
= control target key end

     0   :  { %s22_s0 = inlined_call_operand.vmem [shape: f32[2], index: 0, kind: input, shape index: {}]   ;;  %s23_s1 = inlined_call_operand.vmem [shape: f32[4,2], index: 1, kind: output, shape index: {}]  }
   0x1   :  { %v4_v0 = vld [vmem:[%s22_s0] ss:$0 sm:$0xff] }
   0x2   :  { %5 = vst [vmem:[%s23_s1] sm:$0xf] %v4_v0 }

// kernel: tile.59
= control target key start
LH: loop header
LB: loop body
LE: loop exit
PB: predicated region body
PF: predicated region fallthrough
CT: control target
= control target key end

     0   :  { %vm7_vm0 = vcmask 15360   ;;  %s37_s8 = smov 2   ;;  %s38_s9 = smov 4   ;;  %vm13_vm1 = vcmask 64560   ;;  %vm19_vm2 = vcmask 48160   ;;  %vm25_vm3 = vcmask 31760   ;;  %s55_s0 = inlined_call_operand.vmem [shape: f32[4,2], index: 0, kind: input, shape index: {}]   ;;  %s56_s1 = inlined_call_operand.vmem [shape: f32[8], index: 1, kind: output, shape index: {}]  }
   0x1   :  { %v4_v0 = vld [vmem:[%s55_s0] sm:$0xf]  ;;  %s36_s0 = smov 6  }
   0x2   :  { %5 = vst [vmem:[#allocation1] sm:$0xf] %v4_v0 }
   0x9   :  { %v10_v1 = vld [vmem:[#allocation1 + $0x3] sm:$0x1]   ;;  %v22_v2 = vld [vmem:[#allocation1 + $0x1] sm:$0x1]   ;;  %v6_v3 = vld [vmem:[#allocation1] sm:$0x1]  }
   0xa   :  { %11 = vrot.lane.b32.xlu0 %v10_v1, %s36_s0  ;;  %23 = vrot.lane.b32.xlu1 %v22_v2, %s37_s8  ;;  %v16_v4 = vld [vmem:[#allocation1 + $0x2] sm:$0x1]   ;;  %8 = vst.msk [vmem:[#allocation0] sm:$0x1] %vm7_vm0, %v6_v3  }
   0xe   :  { %17 = vrot.lane.b32.xlu0 %v16_v4, %s38_s9 }
  0x7c   :  { %v12_v5 = vpop.permute.xlu0 %11   ;;  %v24_v6 = vpop.permute.xlu1 %23  }
  0x7d   :  { %14 = vst.msk [vmem:[#allocation0] sm:$0x1] %vm13_vm1, %v12_v5  }
  0x80   :  { %v18_v7 = vpop.permute.xlu0 %17  }
  0x81   :  { %20 = vst.msk [vmem:[#allocation0] sm:$0x1] %vm19_vm2, %v18_v7  }
  0x82   :  { %26 = vst.msk [vmem:[#allocation0] sm:$0x1] %vm25_vm3, %v24_v6  }
  0x89   :  { %v30_v8 = vld [vmem:[#allocation0] sm:$0x1] }
  0x8a   :  { %32 = vst [vmem:[%s56_s1] sm:$0x1] %v30_v8 }

// kernel: tile.1
= control target key start
LH: loop header
LB: loop body
LE: loop exit
PB: predicated region body
PF: predicated region fallthrough
CT: control target
= control target key end

     0   :  { %s34_s8 = smov 125   ;;  %vm7_vm0 = vcmask 7168   ;;  %s35_s11 = smov 126   ;;  %s61_s0 = inlined_call_operand.vmem [shape: f32[4,4], index: 0, kind: input, shape index: {}]   ;;  %s62_s1 = inlined_call_operand.vmem [shape: f32[16,1], index: 1, kind: output, shape index: {}]  }
   0x1   :  { %v4_v0 = vld [vmem:[%s61_s0] sm:$0xf]  ;;  %s33_s0 = smov 127  }
   0x2   :  { %5 = vst [vmem:[#allocation0] sm:$0xf] %v4_v0 }
   0x9   :  { %v9_v1 = vld [vmem:[#allocation0] sm:$0xf]  }
   0xa   :  { %v21_v2 = vld [vmem:[#allocation0] sm:$0xf]   ;;  %10 = vrot.lane.b32.xlu0 %v9_v1, %s33_s0 }
   0xb   :  { %22 = vrot.lane.b32.xlu1 %v21_v2, %s34_s8  ;;  %v6_v3 = vld [vmem:[#allocation0] sm:$0xf]  }
   0xc   :  { %v15_v4 = vld [vmem:[#allocation0] sm:$0xf]   ;;  %8 = vst.msk [vmem:[%s62_s1] ss:$4 sm:$0xf] %vm7_vm0, %v6_v3  }
   0xe   :  { %16 = vrot.lane.b32.xlu0 %v15_v4, %s35_s11 }
  0x7c   :  { %v11_v5 = vpop.permute.xlu0 %10  }
  0x7d   :  { %v23_v6 = vpop.permute.xlu1 %22   ;;  %27 = vst.msk [vmem:[%s62_s1 + $0x1] ss:$4 sm:$0xf] %vm7_vm0, %v11_v5  }
  0x7e   :  { %29 = vst.msk [vmem:[%s62_s1 + $0x3] ss:$4 sm:$0xf] %vm7_vm0, %v23_v6  }
  0x80   :  { %v17_v7 = vpop.permute.xlu0 %16  }
  0x81   :  { %28 = vst.msk [vmem:[%s62_s1 + $0x2] ss:$4 sm:$0xf] %vm7_vm0, %v17_v7  }

// kernel: _lambda_.1
= control target key start
LH: loop header
LB: loop body
LE: loop exit
PB: predicated region body
PF: predicated region fallthrough
CT: control target
= control target key end

     0   :  { %s6064_s6 = smov 1   ;;  %s6065_s10 = smov 2   ;;  %s6970_s0 = inlined_call_operand.smem [shape: u32[63], index: -1, kind: input, shape index: {}] }
   0x1   :  { %s6144_s5 = sld [smem:[%s6970_s0]]   ;;  %s6066_s14 = smov 3  }
   0x2   :  { %s6149_s9 = sld [smem:[%s6970_s0 + %s6064_s6]]   ;;  %s6067_s18 = smov 4  }
   0x3   :  { %s6154_s13 = sld [smem:[%s6970_s0 + %s6065_s10]]   ;;  %s6068_s22 = smov 5  }
   0x4   :  { %s6159_s17 = sld [smem:[%s6970_s0 + %s6066_s14]]   ;;  %s6069_s26 = smov 6  }
   0x5   :  { %s6164_s21 = sld [smem:[%s6970_s0 + %s6067_s18]]   ;;  %s6070_s30 = smov 7  }
   0x6   :  { %s6169_s25 = sld [smem:[%s6970_s0 + %s6068_s22]]   ;;  %s6071_s4 = smov 8  }
   0x7   :  { %7015 = sst [smem:[#allocation11_spill]] %s6144_s5  ;;  %s6072_s10 = smov 9  }
   0x8   :  { %7016 = sst [smem:[#allocation12_spill]] %s6149_s9  ;;  %s6073_s15 = smov 10  }
   0x9   :  { %7017 = sst [smem:[#allocation13_spill]] %s6154_s13  ;;  %s6074_s20 = smov 11  }
   0xa   :  { %7018 = sst [smem:[#allocation14_spill]] %s6159_s17  ;;  %s6076_s1 = smov 13  }
   0xb   :  { %7019 = sst [smem:[#allocation15_spill]] %s6164_s21  ;;  %s6077_s7 = smov 14  }
   0xc   :  { %s6174_s29 = sld [smem:[%s6970_s0 + %s6069_s26]]   ;;  %s6075_s26 = smov 12  }
   0xd   :  { %s6179_s3 = sld [smem:[%s6970_s0 + %s6070_s30]]   ;;  %s6079_s22 = smov 16  }
   0xe   :  { %s6184_s8 = sld [smem:[%s6970_s0 + %s6071_s4]]   ;;  %s6080_s28 = smov 17  }
   0xf   :  { %s6189_s14 = sld [smem:[%s6970_s0 + %s6072_s10]]  }
  0x10   :  { %s6194_s19 = sld [smem:[%s6970_s0 + %s6073_s15]]   ;;  %s6078_s15 = smov 15  }
  0x11   :  { %s6199_s24 = sld [smem:[%s6970_s0 + %s6074_s20]]  }
  0x12   :  { %s6204_s30 = sld [smem:[%s6970_s0 + %s6075_s26]]  }
  0x13   :  { %7020 = sst [smem:[#allocation16_spill]] %s6179_s3 }
  0x14   :  { %7021 = sst [smem:[#allocation17_spill]] %s6184_s8 }
  0x15   :  { %7022 = sst [smem:[#allocation18_spill]] %s6189_s14 }
  0x16   :  { %7023 = sst [smem:[#allocation19_spill]] %s6194_s19 }
  0x17   :  { %7024 = sst [smem:[#allocation20_spill]] %s6199_s24 }
  0x18   :  { %s6209_s6 = sld [smem:[%s6970_s0 + %s6076_s1]]  }
  0x19   :  { %s6214_s12 = sld [smem:[%s6970_s0 + %s6077_s7]]   ;;  %s6081_s7 = smov 18  }
  0x1a   :  { %s6219_s20 = sld [smem:[%s6970_s0 + %s6078_s15]]   ;;  %s6082_s15 = smov 19  }
  0x1b   :  { %s6224_s27 = sld [smem:[%s6970_s0 + %s6079_s22]]   ;;  %s6083_s22 = smov 20  }
  0x1c   :  { %s6229_s4 = sld [smem:[%s6970_s0 + %s6080_s28]]   ;;  %s6084_s28 = smov 21  }
  0x1e   :  { %7025 = sst [smem:[#allocation21_spill]] %s6209_s6 }
  0x1f   :  { %7026 = sst [smem:[#allocation22_spill]] %s6214_s12 }
  0x20   :  { %7027 = sst [smem:[#allocation23_spill]] %s6219_s20 }
  0x21   :  { %7028 = sst [smem:[#allocation24_spill]] %s6224_s27 }
  0x22   :  { %7029 = sst [smem:[#allocation25_spill]] %s6229_s4 }
  0x23   :  { %s6234_s12 = sld [smem:[%s6970_s0 + %s6081_s7]]   ;;  %s6085_s7 = smov 22  }
  0x24   :  { %s6239_s6 = sld [smem:[%s6970_s0 + %s6082_s15]]   ;;  %s6086_s15 = smov 23  }
  0x25   :  { %s6244_s27 = sld [smem:[%s6970_s0 + %s6083_s22]]   ;;  %s6087_s22 = smov 24  }
  0x26   :  { %s6249_s4 = sld [smem:[%s6970_s0 + %s6084_s28]]   ;;  %s6088_s28 = smov 25  }
  0x29   :  { %7030 = sst [smem:[#allocation26_spill]] %s6234_s12 }
  0x2a   :  { %7031 = sst [smem:[#allocation27_spill]] %s6239_s6 }
  0x2b   :  { %7032 = sst [smem:[#allocation28_spill]] %s6244_s27 }
  0x2c   :  { %7033 = sst [smem:[#allocation29_spill]] %s6249_s4 }
  0x2d   :  { %s6254_s12 = sld [smem:[%s6970_s0 + %s6085_s7]]   ;;  %s6089_s7 = smov 26  }
  0x2e   :  { %s6259_s6 = sld [smem:[%s6970_s0 + %s6086_s15]]   ;;  %s6090_s15 = smov 27  }
  0x2f   :  { %s6264_s27 = sld [smem:[%s6970_s0 + %s6087_s22]]   ;;  %s6091_s22 = smov 28  }
  0x30   :  { %s6269_s4 = sld [smem:[%s6970_s0 + %s6088_s28]]   ;;  %s6092_s28 = smov 29  }
  0x33   :  { %7034 = sst [smem:[#allocation30_spill]] %s6254_s12 }
  0x34   :  { %7035 = sst [smem:[#allocation31_spill]] %s6259_s6 }
  0x35   :  { %7036 = sst [smem:[#allocation32_spill]] %s6264_s27 }
  0x36   :  { %7037 = sst [smem:[#allocation33_spill]] %s6269_s4 }
  0x37   :  { %s6274_s12 = sld [smem:[%s6970_s0 + %s6089_s7]]   ;;  %s6093_s7 = smov 30  }
  0x38   :  { %s6279_s6 = sld [smem:[%s6970_s0 + %s6090_s15]]   ;;  %s6094_s15 = smov 31  }
  0x39   :  { %s6284_s27 = sld [smem:[%s6970_s0 + %s6091_s22]]   ;;  %s6095_s22 = smov 32  }
  0x3a   :  { %s6289_s4 = sld [smem:[%s6970_s0 + %s6092_s28]]   ;;  %s6096_s28 = smov 33  }
  0x3d   :  { %7038 = sst [smem:[#allocation34_spill]] %s6274_s12 }
  0x3e   :  { %7039 = sst [smem:[#allocation35_spill]] %s6279_s6 }
  0x3f   :  { %7040 = sst [smem:[#allocation36_spill]] %s6284_s27 }
  0x40   :  { %7041 = sst [smem:[#allocation37_spill]] %s6289_s4 }
  0x41   :  { %s6294_s12 = sld [smem:[%s6970_s0 + %s6093_s7]]   ;;  %s6097_s7 = smov 34  }
  0x42   :  { %s6299_s6 = sld [smem:[%s6970_s0 + %s6094_s15]]   ;;  %s6098_s15 = smov 35  }
  0x43   :  { %s6304_s27 = sld [smem:[%s6970_s0 + %s6095_s22]]   ;;  %s6099_s22 = smov 36  }
  0x44   :  { %s6309_s4 = sld [smem:[%s6970_s0 + %s6096_s28]]   ;;  %s6100_s28 = smov 37  }
  0x47   :  { %7042 = sst [smem:[#allocation38_spill]] %s6294_s12 }
  0x48   :  { %7043 = sst [smem:[#allocation39_spill]] %s6299_s6 }
  0x49   :  { %7044 = sst [smem:[#allocation40_spill]] %s6304_s27 }
  0x4a   :  { %7045 = sst [smem:[#allocation41_spill]] %s6309_s4 }
  0x4b   :  { %s6314_s12 = sld [smem:[%s6970_s0 + %s6097_s7]]   ;;  %s6101_s7 = smov 38  }
  0x4c   :  { %s6319_s6 = sld [smem:[%s6970_s0 + %s6098_s15]]   ;;  %s6102_s15 = smov 39  }
  0x4d   :  { %s6324_s27 = sld [smem:[%s6970_s0 + %s6099_s22]]   ;;  %s6103_s22 = smov 40  }
  0x4e   :  { %s6329_s4 = sld [smem:[%s6970_s0 + %s6100_s28]]   ;;  %s6104_s28 = smov 41  }
  0x51   :  { %7046 = sst [smem:[#allocation42_spill]] %s6314_s12 }
  0x52   :  { %7047 = sst [smem:[#allocation43_spill]] %s6319_s6 }
  0x53   :  { %7048 = sst [smem:[#allocation44_spill]] %s6324_s27 }
  0x54   :  { %7049 = sst [smem:[#allocation45_spill]] %s6329_s4 }
  0x55   :  { %s6334_s12 = sld [smem:[%s6970_s0 + %s6101_s7]]   ;;  %s6105_s7 = smov 42  }
  0x56   :  { %s6339_s6 = sld [smem:[%s6970_s0 + %s6102_s15]]   ;;  %s6106_s15 = smov 43  }
  0x57   :  { %s6344_s27 = sld [smem:[%s6970_s0 + %s6103_s22]]   ;;  %s6107_s22 = smov 44  }
  0x58   :  { %s6349_s4 = sld [smem:[%s6970_s0 + %s6104_s28]]   ;;  %s6108_s28 = smov 45  }
  0x5b   :  { %7050 = sst [smem:[#allocation46_spill]] %s6334_s12 }
  0x5c   :  { %7051 = sst [smem:[#allocation47_spill]] %s6339_s6 }
  0x5d   :  { %7052 = sst [smem:[#allocation48_spill]] %s6344_s27 }
  0x5e   :  { %7053 = sst [smem:[#allocation49_spill]] %s6349_s4 }
  0x5f   :  { %s6354_s12 = sld [smem:[%s6970_s0 + %s6105_s7]]   ;;  %s6109_s7 = smov 46  }
  0x60   :  { %s6359_s6 = sld [smem:[%s6970_s0 + %s6106_s15]]   ;;  %s6110_s15 = smov 47  }
  0x61   :  { %s6364_s27 = sld [smem:[%s6970_s0 + %s6107_s22]]   ;;  %s6111_s22 = smov 48  }
  0x62   :  { %s6369_s4 = sld [smem:[%s6970_s0 + %s6108_s28]]   ;;  %s6112_s28 = smov 49  }
  0x65   :  { %7054 = sst [smem:[#allocation50_spill]] %s6354_s12 }
  0x66   :  { %7055 = sst [smem:[#allocation51_spill]] %s6359_s6 }
  0x67   :  { %7056 = sst [smem:[#allocation52_spill]] %s6364_s27 }
  0x68   :  { %7057 = sst [smem:[#allocation53_spill]] %s6369_s4 }
  0x69   :  { %s6374_s12 = sld [smem:[%s6970_s0 + %s6109_s7]]   ;;  %s6113_s7 = smov 50  }
  0x6a   :  { %s6379_s6 = sld [smem:[%s6970_s0 + %s6110_s15]]   ;;  %s6114_s15 = smov 51  }
  0x6b   :  { %s6384_s27 = sld [smem:[%s6970_s0 + %s6111_s22]]   ;;  %s6115_s22 = smov 52  }
  0x6c   :  { %s6389_s4 = sld [smem:[%s6970_s0 + %s6112_s28]]   ;;  %s6116_s28 = smov 53  }
  0x6f   :  { %7058 = sst [smem:[#allocation54_spill]] %s6374_s12 }
  0x70   :  { %7059 = sst [smem:[#allocation55_spill]] %s6379_s6 }
  0x71   :  { %7060 = sst [smem:[#allocation56_spill]] %s6384_s27 }
  0x72   :  { %7061 = sst [smem:[#allocation57_spill]] %s6389_s4 }
  0x73   :  { %s6394_s12 = sld [smem:[%s6970_s0 + %s6113_s7]]   ;;  %s6117_s7 = smov 54  }
  0x74   :  { %s6399_s6 = sld [smem:[%s6970_s0 + %s6114_s15]]   ;;  %s6118_s15 = smov 55  }
  0x75   :  { %s6404_s27 = sld [smem:[%s6970_s0 + %s6115_s22]]   ;;  %s6119_s22 = smov 56  }
  0x76   :  { %s6409_s4 = sld [smem:[%s6970_s0 + %s6116_s28]]   ;;  %s6120_s28 = smov 57  }
  0x79   :  { %7062 = sst [smem:[#allocation58_spill]] %s6394_s12 }
  0x7a   :  { %7063 = sst [smem:[#allocation59_spill]] %s6399_s6 }
  0x7b   :  { %7064 = sst [smem:[#allocation60_spill]] %s6404_s27 }
  0x7c   :  { %7065 = sst [smem:[#allocation61_spill]] %s6409_s4 }
  0x7d   :  { %s6414_s12 = sld [smem:[%s6970_s0 + %s6117_s7]]   ;;  %s6121_s7 = smov 58  }
  0x7e   :  { %s6419_s6 = sld [smem:[%s6970_s0 + %s6118_s15]]   ;;  %s6122_s15 = smov 59  }
  0x7f   :  { %s6424_s27 = sld [smem:[%s6970_s0 + %s6119_s22]]   ;;  %s6123_s22 = smov 60  }
  0x80   :  { %s6429_s4 = sld [smem:[%s6970_s0 + %s6120_s28]]   ;;  %s6124_s28 = smov 61  }
  0x81   :  { %s6449_s20 = sld [smem:[%s6970_s0 + %s6124_s28]]  }
  0x83   :  { %7066 = sst [smem:[#allocation62_spill]] %s6414_s12 }
  0x84   :  { %7067 = sst [smem:[#allocation63_spill]] %s6419_s6 }
  0x85   :  { %7068 = sst [smem:[#allocation64_spill]] %s6424_s27 }
  0x86   :  { %7069 = sst [smem:[#allocation65_spill]] %s6429_s4 }
  0x87   :  { %s6434_s12 = sld [smem:[%s6970_s0 + %s6121_s7]]   ;;  %s6125_s7 = smov 62  }
  0x88   :  { %s6439_s6 = sld [smem:[%s6970_s0 + %s6122_s15]]  }
  0x89   :  { %s6444_s27 = sld [smem:[%s6970_s0 + %s6123_s22]]  }
  0x8d   :  { %7070 = sst [smem:[#allocation66_spill]] %s6434_s12 }
  0x8e   :  { %7071 = sst [smem:[#allocation67_spill]] %s6439_s6 }
  0x8f   :  { %s6454_s12 = sld [smem:[%s6970_s0 + %s6125_s7]]  }
  0x90   :  { %131 = vsyncpa [#allocation3], 0 }
  0x91   :  { %132 = vsyncpa [#allocation4], 0 }
  0x92   :  { %134 = vsyncpa [#allocation4 + $0x1], 0 }
  0x93   :  { %135 = vsyncpa [#allocation7], 0 }
  0x94   :  { %137 = vsyncpa [#allocation7 + $0x1], 0  ;;  %s6456_s15 = smov 0   ;;  %s6458_s16 = smov 0  }
  0x95   :  { %s6460_s18 = smov 0   ;;  %s6462_s22 = smov 0  }
  0x96 LB: > { %s7072_s24 = sld [smem:[#allocation20_spill]]  ;;  %s7073_s21 = sld [smem:[#allocation15_spill]]  ;;  %s6050_s15 = sphi %s6456_s15, %s7143_s15   ;;  %s6062_s22 = sphi %s6462_s22, %s7145_s22   ;;  %s6058_s18 = sphi %s6460_s18, %s7142_s18   ;;  %s6054_s16 = sphi %s6458_s16, %s7144_s16  }
  0x97   : > { %s7074_s17 = sld [smem:[#allocation14_spill]]  ;;  %s7075_s14 = sld [smem:[#allocation18_spill]] }
  0x98   : > { %s7076_s4 = sld [smem:[#allocation65_spill]]  ;;  %7077 = sst [smem:[#allocation68_spill]] %s6058_s18 }
  0x99   : > { %s6477_s0 = sadd.s32 4294967295, %s6062_s22   ;;  %s4996_s23 = sadd.s32 4294967294, %s6062_s22  }
  0x9a   : > { %s6481_s26 = sadd.s32 1, %s6062_s22   ;;  %s1415_s28 = sadd.s32 1, %s6058_s18 }
  0x9b   : > { %s1412_s1 = ssub.s32 %s6062_s22, %s6481_s26  ;;  %p1425_p0 = scmp.ne.s32.totalorder %s6058_s18, %s6054_s16 }
  0x9c   : > { %p1413_p1 = scmp.eq.s32.totalorder %s1412_s1, 0  ;;  %p1426_p2 = scmp.eq.s32.totalorder %s6477_s0, 1 }
  0x9d   : > { %p1431_p3 = scmp.ne.s32.totalorder %s6054_s16, %s6050_s15  ;;  %p1432_p4 = scmp.eq.s32.totalorder %s4996_s23, 1 }
  0x9e   : > { %s6492_s2 = scalar_select %p1413_p1, %s6058_s18, %s1415_s28  }
  0x9f   : > { %p6494_p5 = por %p1426_p2, %p1425_p0  ;;  %p6498_p6 = por %p1432_p4, %p1431_p3 }
  0xa0   : > { %7078 = sst [smem:[#allocation69_spill]] %s6492_s2  ;;  %p4997_p7 = scmp.ge.s32.totalorder %s6062_s22, 1 }
  0xa1   : > { %s7079_s7 = scalar_select %p6494_p5, 1, 0 }
  0xa2   : > { %s7080_s10 = scalar_select %p6498_p6, 1, 0 }
  0xa3   : > { %p1491_p8 = scmp.lt.s32.totalorder %s6062_s22, 3  ;;  %p6990_p9 = scmp.eq.s32.totalorder %s6477_s0, 0 }
  0xa4   : > { %s6126_s23 = smov [#allocation2]   ;;  %s5936_s2 = scalar_lea.hbm %s7076_s4, 16 }
  0xa5   : > { %p6505_p10 = pnand %p4997_p7, %p1491_p8  ;;  %s1672_s28 = sshll.u32 %s6126_s23, 4  ;;  %s1673_s28 = int_to_ptr.vmem [resolvable:$true] %s1672_s28 }
  0xa6   : > { %p5937_p13 = scmp.ne.s32.totalorder %s7076_s4, %s5936_s2  ;;  %p5943_p3 = scmp.lt.u32.totalorder %s5936_s2, %s7076_s4 }
  0xa7   : > { %s7081_s11 = scalar_select %p6505_p10, 1, 0 }
  0xa8   : > { %p5724_p11 = pneg %p6505_p10 }
  0xaa   : > { %p6513_p12 = pnand %p6990_p9, %p5724_p11 }
  0xac   : > { %p5938_p0 = pneg %p6513_p12 }
  0xae   : > { %p5939_p1 = pnand %p5938_p0, %p5937_p13 }
  0xb0   : > { %p5940_p2 = pneg %p5939_p1 }
  0xb2   : > { %p5945_p4 = pnand %p5943_p3, %p5940_p2 }
  0xb4   : > { %5948 = shalt.err (!%p5945_p4)
}
  0xb5   : > { %s5949_s18 = scalar_lea.vmem %s1673_s28, 16  ;;  %s5956_s23 = scalar_lea.vmem %s1673_s28, 32 }
  0xb6   : > { %p5950_p7 = scmp.ne.s32.totalorder %s1673_s28, %s5949_s18  ;;  %p5957_p5 = scmp.lt.s32.totalorder %s1673_s28, %s1673_s28 }
  0xb7   : > { %p5958_p11 = scmp.lt.s32.totalorder %s5956_s23, %s5949_s18 }
  0xb8   : > { %p5952_p8 = pnand %p5950_p7, %p5938_p0 }
  0xb9   : > { %p5959_p9 = por %p5958_p11, %p5957_p5 }
  0xba   : > { %p5953_p6 = pneg %p5952_p8 }
  0xbc   : > { %p5960_p10 = pnand %p5959_p9, %p5953_p6 }
  0xbe   : > { %5963 = shalt.err (!%p5960_p10)
}
  0xbf   : > { %5727 = dma.hbm_to_vmem [thread:$0]  (!%p6513_p12), %s7076_s4, 16, %s1673_s28, [#allocation3]  }
  0xc0   : > { %p7083_p13 = scmp.ne.s32.totalorder %s7081_s11, 0 }
  0xc1   : > { %p7084_p1 = scmp.eq.s32.totalorder (!%p7083_p13), %s6477_s0, 0 }
  0xc2   : > { %1699 = sbr.rel (%p7083_p13) target bundleno = 8887 (0x22b7), region = 260 }
  0xc9   : > { %6037 = dma.done.wait (%p7084_p1), [#allocation3], 16   ;;  %p7085_p2 = pmov %p7084_p1 }
  0xca   : > { %s7086_s5 = sld [smem:[#allocation11_spill]]  ;;  %p1850_p0 = scmp.lt.s32.totalorder %s6477_s0, 1  ;;  %vm1863_vm0 = vcmask 261120   ;;  %v1907_v14 = vld [vmem:[%s7074_s17] sm:$0xff]  ;;  %vm1935_vm1 = vcmask 130048   ;;  %v1912_v15 = vld [vmem:[%s7073_s21 + $0x8] sm:$0xff] }
  0xcb   : > { %6039 = vsyncadd (%p7085_p2), [#allocation3], 4294967280  ;;  %5249 = vmatprep.mubr.msk.f32.mxu0 %vm1935_vm1, %v1907_v14  ;;  %v6127_v16 = vmov 0   ;;  %v1911_v17 = vld [vmem:[%s7073_s21] sm:$0xff]  ;;  %v1913_v18 = vld [vmem:[%s7073_s21 + $0x10] sm:$0xff]  ;;  %s7087_s9 = sld [smem:[#allocation12_spill]] }
  0xcc   : > { %s6533_s18 = scalar_select %p1850_p0, %s6477_s0, 1  ;;  %5841 = vset.pattern.permute.xlu1 %v6127_v16  ;;  %5840 = vset.pattern.permute.xlu0 %v6127_v16  ;;  %v1914_v19 = vld [vmem:[%s7073_s21 + $0x18] sm:$0xff]  ;;  %v2075_v20 = vld [vmem:[%s6174_s29 + $0x10] sm:$0xff]  ;;  %v2073_v22 = vld [vmem:[%s6174_s29] sm:$0xff]  ;;  %vm2381_vm2 = vcmask 523264   ;;  %vm6130_vm3 = vmmov 0  }
  0xcd   : > { %v2076_v21 = vld [vmem:[%s6174_s29 + $0x18] sm:$0xff]  ;;  %v2074_v23 = vld [vmem:[%s6174_s29 + $0x8] sm:$0xff]  ;;  %s7088_s13 = sld [smem:[#allocation13_spill]]  ;;  %v1909_v42 = vld [vmem:[%s7074_s17 + $0x10] sm:$0xff]  ;;  %s7089_s3 = sld [smem:[#allocation16_spill]]  ;;  %vm3203_vm4 = vcmask 64512  }
  0xce   : > { %s5096_s2 = sshll.u32 %s6533_s18, 4  ;;  %v1908_v41 = vld [vmem:[%s7074_s17 + $0x8] sm:$0xff]  ;;  %v1910_v43 = vld [vmem:[%s7074_s17 + $0x18] sm:$0xff]  ;;  %v2069_v44 = vld [vmem:[%s6169_s25] sm:$0xff]  ;;  %s7090_s8 = sld [smem:[#allocation17_spill]]  ;;  %vm4240_vm5 = vcmask 257024  }
  0xcf   : > { %5263 = vmatprep.mubr.msk.f32.mxu1 %vm1863_vm0, %v2069_v44  ;;  %s7091_s19 = sld [smem:[#allocation19_spill]]  ;;  %s6992_s11 = smov 96   ;;  %vm4496_vm6 = vcmask 1043456   ;;  %vm4492_vm7 = vcmask 31744  }
  0xd0   : > { %s1854_s1 = scalar_lea.vmem %s7086_s5, %s5096_s2  ;;  %s7092_s28 = sld [smem:[#allocation23_spill]] }
  0xd1   : > { %v6537_v0 = vld [vmem:[%s1854_s1] sm:$0xff]  ;;  %v6539_v1 = vld [vmem:[%s1854_s1 + $0x8] sm:$0xff]  ;;  %s7093_s23 = sld [smem:[#allocation24_spill]]  ;;  %s7094_s2 = sld [smem:[#allocation21_spill]] }
  0xd2   : > { %v1864_v2 = vsel %vm1863_vm0, %v6537_v0, 0.0  ;;  %v1867_v3 = vsel %vm1863_vm0, %v6539_v1, 0.0  ;;  %v5007_v32 = vld [vmem:[%s7087_s9] ss:$0 sm:$0xff]  ;;  %s7095_s1 = sld [smem:[#allocation22_spill]]  ;;  %s6664_s4 = sand.u32 1, %s6054_s16  }
  0xd3   : > { %1865 = vadd.xlane.f32.xlu0 %v1864_v2  ;;  %v5008_v36 = vld [vmem:[%s7088_s13] ss:$0 sm:$0xff]  ;;  %s5002_s5 = sshll.u32 %s6664_s4, 4  ;;  %s7109_s13 = sld [smem:[#allocation36_spill]] }
  0xd4   : > { %s6669_s9 = scalar_lea.vmem [#allocation5], %s5002_s5  ;;  %s7103_s5 = sld [smem:[#allocation31_spill]] }
  0xd5   : > { %s7138_s6 = sld [smem:[#allocation67_spill]]  ;;  %p7139_p6 = scmp.ne.s32.totalorder %s7079_s7, 0 }
  0xd7   : > { %1868 = vadd.xlane.f32.xlu0 %v1867_v3 }
  0xed   : > { %1917 = vperm.xlu0 %5840, %v1911_v17  }
 0x160   : > { %v1866_v4 = vpop.xlane.xlu0 %1865 }
 0x161   : > { %v1871_v5 = vmul.f32 0.03125, %v1866_v4 }
 0x163   : > { %v1873_v6 = vsub.f32 %v6537_v0, %v1871_v5 }
 0x164   : > { %v1869_v7 = vpop.xlane.xlu0 %1868 }
 0x165   : > { %v1872_v8 = vmul.f32 0.03125, %v1869_v7  ;;  %v1875_v9 = vmul.f32 %v1873_v6, %v1873_v6 }
 0x167   : > { %v1874_v10 = vsub.f32 %v6539_v1, %v1872_v8  ;;  %v1877_v11 = vsel %vm1863_vm0, %v1875_v9, 0.0 }
 0x168   : > { %1878 = vadd.xlane.f32.xlu1 %v1877_v11 }
 0x169   : > { %v1876_v12 = vmul.f32 %v1874_v10, %v1874_v10 }
 0x16b   : > { %v1880_v13 = vsel %vm1863_vm0, %v1876_v12, 0.0 }
 0x16c   : > { %1881 = vadd.xlane.f32.xlu1 %v1880_v13  ;;  %v1918_v47 = vpop.permute.xlu0 %1917 }
 0x17d   : > { %1922 = vperm.xlu1 %5841, %v1912_v15  }
 0x181   : > { %1927 = vperm.xlu1 %5841, %v1913_v18  }
 0x185   : > { %1932 = vperm.xlu1 %5841, %v1914_v19  }
 0x189   : > { %2089 = vperm.xlu1 %5841, %v2075_v20  }
 0x18d   : > { %2094 = vperm.xlu1 %5841, %v2076_v21  }
 0x191   : > { %2079 = vperm.xlu1 %5841, %v2073_v22  }
 0x195   : > { %2084 = vperm.xlu1 %5841, %v2074_v23  }
 0x1f5   : > { %v1879_v24 = vpop.xlane.xlu1 %1878 }
 0x1f6   : > { %v1883_v25 = vmul.f32 0.03125, %v1879_v24 }
 0x1f8   : > { %v1885_v26 = vadd.f32 1e-05, %v1883_v25 }
 0x1f9   : > { %v1882_v27 = vpop.xlane.xlu1 %1881 }
 0x1fa   : > { %5842 = vrsqrt.f32 %v1885_v26  ;;  %v1884_v28 = vmul.f32 0.03125, %v1882_v27 }
 0x1fc   : > { %v1886_v29 = vadd.f32 1e-05, %v1884_v28 }
 0x1fd   : > { %v1923_v45 = vpop.permute.xlu1 %1922 }
 0x1fe   : > { %5844 = vrsqrt.f32 %v1886_v29 }
 0x201   : > { %v1928_v46 = vpop.permute.xlu1 %1927 }
 0x204   : > { %v5843_v30 = vpop.eup %5842 }
 0x205   : > { %v1889_v31 = vmul.f32 %v5843_v30, %v1873_v6  ;;  %v1933_v53 = vpop.permute.xlu1 %1932 }
 0x207   : > { %v1897_v35 = vmul.f32 %v5007_v32, %v1889_v31 }
 0x208   : > { %v5845_v33 = vpop.eup %5844 }
 0x209   : > { %v1890_v34 = vmul.f32 %v5845_v33, %v1874_v10  ;;  %v1905_v38 = vadd.f32 %v5008_v36, %v1897_v35  ;;  %v2070_v33 = vld [vmem:[%s6169_s25 + $0x8] sm:$0xff]  ;;  %v2072_v35 = vld [vmem:[%s6169_s25 + $0x18] sm:$0xff] }
 0x20b   : > { %v1898_v37 = vmul.f32 %v5007_v32, %v1890_v34  ;;  %v2071_v34 = vld [vmem:[%s6169_s25 + $0x10] sm:$0xff] }
 0x20d   : > { %v1906_v39 = vadd.f32 %v5008_v36, %v1898_v37  ;;  %v2090_v36 = vpop.permute.xlu1 %2089 }
 0x20f   : > { %v5546_v40 = vpack.c.bf16 %v1906_v39, %v1905_v38 }
 0x211   : > { %5547 = vmatprep.subr.bf16.mxu0 %v5546_v40  ;;  %v2095_v39 = vpop.permute.xlu1 %2094 }
 0x212   : > { %5549 = vmatpush3.bf16.msra.mxu0 %v5546_v40 }
 0x215   : > { %5250 = vmatmul.mubr.msk.f32.vlgmr.msra.gmra.mrb[0].mxu0 %vm1935_vm1, %v1908_v41 }
 0x216   : > { %5252 = vmatprep.mubr.msk.f32.mxu0 %vm1935_vm1, %v1909_v42 }
 0x219   : > { %5253 = vmatmul.mubr.msk.f32.gmra.mrb[2].mxu0 %vm1935_vm1, %v1910_v43 }
 0x2e8   : > { %v5251_v48 = vpop.f32.mrb[0].mxu0 }
 0x2e9   : > { %v2020_v49 = vadd.f32 %v5251_v48, %v1923_v45  ;;  %v2014_v50 = vpop.f32.mrb[1].mxu0 }
 0x2ea   : > { %v2015_v51 = vadd.f32 %v2014_v50, %v1918_v47  ;;  %v2080_v50 = vpop.permute.xlu1 %2079 }
 0x2eb   : > { %v2034_v52 = vmul.f32 %v2020_v49, %v2020_v49 }
 0x2ec   : > { %v2033_v54 = vmul.f32 %v2015_v51, %v2015_v51  ;;  %v5254_v55 = vpop.f32.mrb[2].mxu0 }
 0x2ed   : > { %v2038_v56 = vmul.f32 %v2034_v52, %v2020_v49  ;;  %v2030_v57 = vadd.f32 %v5254_v55, %v1933_v53  ;;  %v2024_v58 = vpop.f32.mrb[3].mxu0 }
 0x2ee   : > { %v2037_v59 = vmul.f32 %v2033_v54, %v2015_v51  ;;  %v2025_v60 = vadd.f32 %v2024_v58, %v1928_v46  ;;  %v2085_v52 = vpop.permute.xlu1 %2084 }
 0x2ef   : > { %v2042_v61 = vmul.f32 0.044715, %v2038_v56  ;;  %v2036_v62 = vmul.f32 %v2030_v57, %v2030_v57 }
 0x2f0   : > { %v2041_v63 = vmul.f32 0.044715, %v2037_v59  ;;  %v2035_v2 = vmul.f32 %v2025_v60, %v2025_v60 }
 0x2f1   : > { %v2046_v3 = vadd.f32 %v2042_v61, %v2020_v49  ;;  %v2040_v4 = vmul.f32 %v2036_v62, %v2030_v57 }
 0x2f2   : > { %v2045_v5 = vadd.f32 %v2041_v63, %v2015_v51  ;;  %v2039_v6 = vmul.f32 %v2035_v2, %v2025_v60 }
 0x2f3   : > { %v2050_v7 = vmul.f32 0.7978846, %v2046_v3  ;;  %v2044_v8 = vmul.f32 0.044715, %v2040_v4 }
 0x2f4   : > { %v2049_v9 = vmul.f32 0.7978846, %v2045_v5  ;;  %v2043_v10 = vmul.f32 0.044715, %v2039_v6 }
 0x2f5   : > { %v2048_v11 = vadd.f32 %v2044_v8, %v2030_v57  ;;  %5846 = vtanh.f32 %v2050_v7 }
 0x2f6   : > { %v2047_v12 = vadd.f32 %v2043_v10, %v2025_v60  ;;  %5848 = vtanh.f32 %v2049_v9  ;;  %v2256_v10 = vld [vmem:[%s7075_s14] sm:$0xff] }
 0x2f7   : > { %v2052_v13 = vmul.f32 0.7978846, %v2048_v11  ;;  %v2257_v11 = vld [vmem:[%s7075_s14 + $0x8] sm:$0xff] }
 0x2f8   : > { %v2051_v14 = vmul.f32 0.7978846, %v2047_v12  ;;  %v5558_v12 = vpack.c.bf16 %v2257_v11, %v2256_v10 }
 0x2f9   : > { %5850 = vtanh.f32 %v2052_v13  ;;  %v2258_v13 = vld [vmem:[%s7075_s14 + $0x10] sm:$0xff] }
 0x2fa   : > { %5852 = vtanh.f32 %v2051_v14  ;;  %5559 = vmatprep.subr.bf16.mxu0 %v5558_v12  ;;  %v2259_v14 = vld [vmem:[%s7075_s14 + $0x18] sm:$0xff] }
 0x2fb   : > { %5561 = vmatpush3.bf16.msra.mxu0 %v5558_v12 }
 0x2ff   : > { %v5847_v15 = vpop.eup %5846 }
 0x300   : > { %v5849_v16 = vpop.eup %5848  ;;  %v2058_v17 = vadd.f32 1.0, %v5847_v15  ;;  %v5562_v15 = vpack.c.bf16 %v2259_v14, %v2258_v13 }
 0x301   : > { %v2057_v18 = vadd.f32 1.0, %v5849_v16 }
 0x302   : > { %v2062_v19 = vmul.f32 0.5, %v2058_v17  ;;  %5563 = vmatprep.subr.bf16.mxu0 %v5562_v15 }
 0x303   : > { %v5851_v20 = vpop.eup %5850  ;;  %v2061_v21 = vmul.f32 0.5, %v2057_v18  ;;  %5565 = vmatpush3.bf16.msra.mxu0 %v5562_v15 }
 0x304   : > { %v5853_v22 = vpop.eup %5852  ;;  %v2066_v23 = vmul.f32 %v2062_v19, %v2020_v49  ;;  %v2060_v24 = vadd.f32 1.0, %v5851_v20 }
 0x305   : > { %v2065_v25 = vmul.f32 %v2061_v21, %v2015_v51  ;;  %v2059_v26 = vadd.f32 1.0, %v5853_v22 }
 0x306   : > { %v2064_v27 = vmul.f32 0.5, %v2060_v24 }
 0x307   : > { %v5550_v28 = vpack.c.bf16 %v2066_v23, %v2065_v25  ;;  %v2063_v29 = vmul.f32 0.5, %v2059_v26  ;;  %v5019_v23 = vld [vmem:[%s7089_s3] ss:$0 sm:$0xff]  ;;  %s7101_s3 = sld [smem:[#allocation28_spill]] }
 0x308   : > { %v2068_v30 = vmul.f32 %v2064_v27, %v2030_v57  ;;  %v5020_v27 = vld [vmem:[%s7090_s8] ss:$0 sm:$0xff]  ;;  %s7102_s8 = sld [smem:[#allocation29_spill]] }
 0x309   : > { %5551 = vmatprep.subr.bf16.mxu1 %v5550_v28  ;;  %v2067_v31 = vmul.f32 %v2063_v29, %v2025_v60 }
 0x30a   : > { %5553 = vmatpush3.bf16.msra.mxu1 %v5550_v28 }
 0x30b   : > { %v5554_v32 = vpack.c.bf16 %v2068_v30, %v2067_v31 }
 0x30d   : > { %5555 = vmatprep.subr.bf16.mxu1 %v5554_v32 }
 0x30e   : > { %5557 = vmatpush3.bf16.msra.mxu1 %v5554_v32  ;;  %v2366_v32 = vld [vmem:[%s7072_s24] sm:$0xff] }
 0x311   : > { %5264 = vmatmul.mubr.msk.f32.vlgmr.msra.gmra.mrb[0].mxu1 %vm1863_vm0, %v2070_v33  ;;  %v2367_v33 = vld [vmem:[%s7072_s24 + $0x8] sm:$0xff] }
 0x312   : > { %5266 = vmatprep.mubr.msk.f32.mxu1 %vm1863_vm0, %v2071_v34  ;;  %v5566_v34 = vpack.c.bf16 %v2367_v33, %v2366_v32 }
 0x314   : > { %5567 = vmatprep.subr.bf16.mxu1 %v5566_v34 }
 0x315   : > { %5267 = vmatmul.mubr.msk.f32.gmra.mrb[2].mxu1 %vm1863_vm0, %v2072_v35  ;;  %v2368_v35 = vld [vmem:[%s7072_s24 + $0x10] sm:$0xff] }
 0x316   : > { %5569 = vmatpush3.bf16.msra.mxu1 %v5566_v34 }
 0x3e4   : > { %v5265_v37 = vpop.f32.mrb[0].mxu1 }
 0x3e5   : > { %v2175_v38 = vpop.f32.mrb[1].mxu1  ;;  %v2181_v54 = vadd.f32 %v5265_v37, %v2085_v52 }
 0x3e6   : > { %v2176_v56 = vadd.f32 %v2175_v38, %v2080_v50  ;;  %v2370_v38 = vld [vmem:[%s7072_s24 + $0x20] sm:$0xff] }
 0x3e8   : > { %v5268_v40 = vpop.f32.mrb[2].mxu1 }
 0x3e9   : > { %v2191_v41 = vadd.f32 %v5268_v40, %v2095_v39  ;;  %v2185_v42 = vpop.f32.mrb[3].mxu1  ;;  %v2371_v39 = vld [vmem:[%s7072_s24 + $0x28] sm:$0xff] }
 0x3ea   : > { %v2186_v43 = vadd.f32 %v2185_v42, %v2090_v36  ;;  %v2369_v36 = vld [vmem:[%s7072_s24 + $0x18] sm:$0xff]  ;;  %v5574_v40 = vpack.c.bf16 %v2371_v39, %v2370_v38  ;;  %v2617_v38 = vld [vmem:[%s7093_s23 + $0x8] sm:$0xff]  ;;  %v2618_v39 = vld [vmem:[%s7093_s23 + $0x10] sm:$0xff] }
 0x3eb   : > { %v5018_v44 = vmul.f32 -1.442695, %v2191_v41  ;;  %v5570_v37 = vpack.c.bf16 %v2369_v36, %v2368_v35  ;;  %v2373_v42 = vld [vmem:[%s7072_s24 + $0x38] sm:$0xff]  ;;  %v2533_v36 = vld [vmem:[%s7092_s28] sm:$0xff] }
 0x3ec   : > { %v5017_v45 = vmul.f32 -1.442695, %v2186_v43 }
 0x3ed   : > { %5854 = vpow2.f32 %v5018_v44  ;;  %5571 = vmatprep.subr.bf16.mxu1 %v5570_v37  ;;  %v5021_v44 = vld [vmem:[%s7091_s19] ss:$0 sm:$0xff] }
 0x3ee   : > { %5856 = vpow2.f32 %v5017_v45  ;;  %5573 = vmatpush3.bf16.msra.mxu1 %v5570_v37  ;;  %v2616_v37 = vld [vmem:[%s7093_s23] sm:$0xff] }
 0x3ef   : > { %5575 = vmatprep.subr.bf16.mxu1 %v5574_v40 }
 0x3f2   : > { %5577 = vmatpush3.bf16.msra.mxu1 %v5574_v40  ;;  %v5586_v40 = vpack.c.bf16 %v2617_v38, %v2616_v37 }
 0x3f7   : > { %v5855_v46 = vpop.eup %5854 }
 0x3f8   : > { %v5857_v47 = vpop.eup %5856  ;;  %v2201_v48 = vadd.f32 1.0, %v5855_v46 }
 0x3f9   : > { %v2200_v49 = vadd.f32 1.0, %v5857_v47 }
 0x3fa   : > { %5858 = vrcp.f32 %v2201_v48 }
 0x3fb   : > { %5860 = vrcp.f32 %v2200_v49 }
 0x404   : > { %v5859_v51 = vpop.eup %5858 }
 0x405   : > { %v5861_v53 = vpop.eup %5860  ;;  %v2207_v55 = vmul.f32 %v5859_v51, %v2191_v41  ;;  %v2372_v41 = vld [vmem:[%s7072_s24 + $0x30] sm:$0xff] }
 0x406   : > { %v2206_v57 = vmul.f32 %v5861_v53, %v2186_v43  ;;  %v5578_v43 = vpack.c.bf16 %v2373_v42, %v2372_v41  ;;  %v2619_v41 = vld [vmem:[%s7093_s23 + $0x18] sm:$0xff] }
 0x407   : > { %v2209_v58 = vmul.f32 %v2207_v55, %v2181_v54  ;;  %v5590_v42 = vpack.c.bf16 %v2619_v41, %v2618_v39 }
 0x408   : > { %v2208_v59 = vmul.f32 %v2206_v57, %v2176_v56  ;;  %5579 = vmatprep.subr.bf16.mxu1 %v5578_v43 }
 0x409   : > { %v6576_v60 = vadd.f32 %v2209_v58, %v6539_v1  ;;  %5581 = vmatpush3.bf16.msra.mxu1 %v5578_v43 }
 0x40a   : > { %v6579_v61 = vadd.f32 %v2208_v59, %v6537_v0  ;;  %5587 = vmatprep.subr.bf16.mxu1 %v5586_v40 }
 0x40b   : > { %v2217_v62 = vsel %vm1863_vm0, %v6576_v60, 0.0 }
 0x40c   : > { %2218 = vadd.xlane.f32.xlu0 %v2217_v62  ;;  %v2214_v63 = vsel %vm1863_vm0, %v6579_v61, 0.0 }
 0x40d   : > { %2215 = vadd.xlane.f32.xlu1 %v2214_v63 }
 0x499   : > { %v2219_v2 = vpop.xlane.xlu0 %2218 }
 0x49a   : > { %v2221_v3 = vmul.f32 0.03125, %v2219_v2  ;;  %v2216_v4 = vpop.xlane.xlu1 %2215 }
 0x49b   : > { %v2220_v1 = vmul.f32 0.03125, %v2216_v4 }
 0x49c   : > { %v2223_v5 = vsub.f32 %v6576_v60, %v2221_v3 }
 0x49d   : > { %v2222_v0 = vsub.f32 %v6579_v61, %v2220_v1 }
 0x49e   : > { %v2225_v6 = vmul.f32 %v2223_v5, %v2223_v5 }
 0x49f   : > { %v2224_v7 = vmul.f32 %v2222_v0, %v2222_v0 }
 0x4a0   : > { %v2229_v8 = vsel %vm1863_vm0, %v2225_v6, 0.0 }
 0x4a1   : > { %2230 = vadd.xlane.f32.xlu1 %v2229_v8  ;;  %v2226_v9 = vsel %vm1863_vm0, %v2224_v7, 0.0 }
 0x4a2   : > { %2227 = vadd.xlane.f32.xlu0 %v2226_v9 }
 0x52e   : > { %v2231_v16 = vpop.xlane.xlu1 %2230 }
 0x52f   : > { %v2233_v17 = vmul.f32 0.03125, %v2231_v16  ;;  %v2228_v18 = vpop.xlane.xlu0 %2227 }
 0x530   : > { %v2232_v19 = vmul.f32 0.03125, %v2228_v18 }
 0x531   : > { %v2235_v20 = vadd.f32 1e-05, %v2233_v17 }
 0x532   : > { %v2234_v21 = vadd.f32 1e-05, %v2232_v19 }
 0x533   : > { %5862 = vrsqrt.f32 %v2235_v20 }
 0x534   : > { %5864 = vrsqrt.f32 %v2234_v21 }
 0x53d   : > { %v5863_v22 = vpop.eup %5862 }
 0x53e   : > { %v5865_v24 = vpop.eup %5864  ;;  %v2239_v25 = vmul.f32 %v5863_v22, %v2223_v5 }
 0x53f   : > { %v2238_v26 = vmul.f32 %v5865_v24, %v2222_v0  ;;  %v5024_v0 = vld [vmem:[%s6204_s30] ss:$0 sm:$0xff] }
 0x540   : > { %v2247_v28 = vmul.f32 %v5019_v23, %v2239_v25 }
 0x541   : > { %v2246_v29 = vmul.f32 %v5019_v23, %v2238_v26 }
 0x542   : > { %v2255_v31 = vadd.f32 %v5020_v27, %v2247_v28 }
 0x543   : > { %v2254_v30 = vadd.f32 %v5020_v27, %v2246_v29 }
 0x545   : > { %5277 = vmatprep.mubr.msk.f32.mxu0 %vm1863_vm0, %v2254_v30 }
 0x546   : > { %5278 = vmatmul.mubr.msk.f32.vlgmr.msra.gmra.mrb[4].mxu0 %vm1863_vm0, %v2255_v31 }
 0x547   : > { %5303 = vmatprep.mubr.msk.f32.mxu0 %vm1935_vm1, %v2533_v36 }
 0x619   : > { %v5279_v45 = vpop.f32.mrb[4].mxu0 }
 0x61a   : > { %v2345_v46 = vadd.f32 %v5279_v45, %v5021_v44  ;;  %v2339_v47 = vpop.f32.mrb[5].mxu0 }
 0x61b   : > { %v2340_v48 = vadd.f32 %v5021_v44, %v2339_v47 }
 0x61c   : > { %v2349_v49 = vmul.f32 %v2345_v46, %v2345_v46 }
 0x61d   : > { %v2348_v50 = vmul.f32 %v2340_v48, %v2340_v48 }
 0x61e   : > { %v2351_v51 = vmul.f32 %v2349_v49, %v2345_v46 }
 0x61f   : > { %v2350_v52 = vmul.f32 %v2348_v50, %v2340_v48  ;;  %v5029_v50 = vld [vmem:[%s7094_s2] ss:$0 sm:$0xff]  ;;  %s7097_s2 = sld [smem:[#allocation25_spill]] }
 0x620   : > { %v2353_v53 = vmul.f32 0.044715, %v2351_v51 }
 0x621   : > { %v2352_v54 = vmul.f32 0.044715, %v2350_v52 }
 0x622   : > { %v2355_v55 = vadd.f32 %v2353_v53, %v2345_v46  ;;  %v5030_v53 = vld [vmem:[%s7095_s1] ss:$0 sm:$0xff]  ;;  %s7098_s1 = sld [smem:[#allocation27_spill]] }
 0x623   : > { %v2354_v56 = vadd.f32 %v2352_v54, %v2340_v48 }
 0x624   : > { %v2357_v57 = vmul.f32 0.7978846, %v2355_v55 }
 0x625   : > { %v2356_v58 = vmul.f32 0.7978846, %v2354_v56 }
 0x626   : > { %5866 = vtanh.f32 %v2357_v57 }
 0x627   : > { %5868 = vtanh.f32 %v2356_v58 }
 0x628   : > { %v5036_v36 = vld [vmem:[%s7098_s1] ss:$0 sm:$0xff]  ;;  %s7100_s1 = smov 96  }
 0x630   : > { %v5867_v59 = vpop.eup %5866 }
 0x631   : > { %v5869_v62 = vpop.eup %5868  ;;  %v2361_v63 = vadd.f32 1.0, %v5867_v59 }
 0x632   : > { %v2360_v2 = vadd.f32 1.0, %v5869_v62  ;;  %v2534_v62 = vld [vmem:[%s7092_s28 + $0x8] sm:$0xff] }
 0x633   : > { %v2363_v3 = vmul.f32 0.5, %v2361_v63 }
 0x634   : > { %v2362_v4 = vmul.f32 0.5, %v2360_v2 }
 0x635   : > { %v2365_v5 = vmul.f32 %v2363_v3, %v2345_v46 }
 0x636   : > { %v2364_v1 = vmul.f32 %v2362_v4, %v2340_v48 }
 0x638   : > { %5296 = vmatprep.mubr.msk.f32.mxu1 %vm2381_vm2, %v2364_v1 }
 0x639   : > { %5297 = vmatmul.mubr.msk.f32.vlgmr.msra.gmra.mrb[4].mxu1 %vm2381_vm2, %v2365_v5 }
 0x63a   : > { %5589 = vmatpush3.bf16.msra.mxu1 %v5586_v40 }
 0x63b   : > { %5591 = vmatprep.subr.bf16.mxu1 %v5590_v42 }
 0x63e   : > { %5593 = vmatpush3.bf16.msra.mxu1 %v5590_v42 }
 0x70c   : > { %v5298_v6 = vpop.f32.mrb[4].mxu1 }
 0x70d   : > { %v2460_v7 = vadd.f32 %v5298_v6, %v5024_v0  ;;  %v2454_v8 = vpop.f32.mrb[5].mxu1 }
 0x70e   : > { %v2455_v9 = vadd.f32 %v5024_v0, %v2454_v8 }
 0x70f   : > { %v5028_v10 = vmul.f32 -1.442695, %v2460_v7 }
 0x710   : > { %v5027_v11 = vmul.f32 -1.442695, %v2455_v9 }
 0x711   : > { %5870 = vpow2.f32 %v5028_v10 }
 0x712   : > { %5872 = vpow2.f32 %v5027_v11 }
 0x71b   : > { %v5871_v12 = vpop.eup %5870 }
 0x71c   : > { %v5873_v13 = vpop.eup %5872  ;;  %v2470_v14 = vadd.f32 1.0, %v5871_v12 }
 0x71d   : > { %v2469_v15 = vadd.f32 1.0, %v5873_v13  ;;  %v5033_v13 = vld [vmem:[%s7097_s2] ss:$0 sm:$0xff]  ;;  %s7099_s2 = sld [smem:[#allocation30_spill]] }
 0x71e   : > { %5874 = vrcp.f32 %v2470_v14 }
 0x71f   : > { %5876 = vrcp.f32 %v2469_v15 }
 0x728   : > { %v5875_v16 = vpop.eup %5874 }
 0x729   : > { %v5877_v17 = vpop.eup %5876  ;;  %v2476_v18 = vmul.f32 %v5875_v16, %v2460_v7 }
 0x72a   : > { %v2475_v19 = vmul.f32 %v5877_v17, %v2455_v9 }
 0x72b   : > { %2481 = vrot.lane.b32.xlu1 %v2476_v18, %s6992_s11 }
 0x72c   : > { %2479 = vrot.lane.b32.xlu0 %v2475_v19, %s6992_s11  ;;  %s7096_s11 = sld [smem:[#allocation26_spill]] }
 0x732   : > { %v2726_v3 = vld [vmem:[%s7096_s11] sm:$0xff]  ;;  %v2727_v4 = vld [vmem:[%s7096_s11 + $0x8] sm:$0xff]  ;;  %v2728_v5 = vld [vmem:[%s7096_s11 + $0x10] sm:$0xff] }
 0x733   : > { %v5594_v1 = vpack.c.bf16 %v2727_v4, %v2726_v3  ;;  %v2729_v0 = vld [vmem:[%s7096_s11 + $0x18] sm:$0xff]  ;;  %v2731_v8 = vld [vmem:[%s7096_s11 + $0x28] sm:$0xff]  ;;  %v2732_v10 = vld [vmem:[%s7096_s11 + $0x30] sm:$0xff] }
 0x734   : > { %v5598_v6 = vpack.c.bf16 %v2729_v0, %v2728_v5  ;;  %v2733_v11 = vld [vmem:[%s7096_s11 + $0x38] sm:$0xff]  ;;  %v2850_v5 = vld [vmem:[%s7101_s3] sm:$0xff]  ;;  %s7104_s3 = sld [smem:[#allocation35_spill]] }
 0x735   : > { %v5606_v12 = vpack.c.bf16 %v2733_v11, %v2732_v10  ;;  %v3002_v0 = vld [vmem:[%s7099_s2 + $0x20] sm:$0xff] }
 0x79d   : > { %v2482_v20 = vpop.permute.xlu1 %2481 }
 0x79e   : > { %v2486_v21 = vmul.f32 %v2482_v20, %v2460_v7  ;;  %v2480_v22 = vpop.permute.xlu0 %2479  ;;  %v2730_v7 = vld [vmem:[%s7096_s11 + $0x20] sm:$0xff]  ;;  %s7108_s11 = sld [smem:[#allocation33_spill]] }
 0x79f   : > { %v2485_v23 = vmul.f32 %v2480_v22, %v2455_v9  ;;  %v5602_v9 = vpack.c.bf16 %v2731_v8, %v2730_v7  ;;  %v3004_v7 = vld [vmem:[%s7099_s2 + $0x30] sm:$0xff]  ;;  %v3005_v8 = vld [vmem:[%s7099_s2 + $0x38] sm:$0xff] }
 0x7a0   : > { %v6612_v24 = vadd.f32 %v2486_v21, %v6576_v60 }
 0x7a1   : > { %v6615_v25 = vadd.f32 %v2485_v23, %v6579_v61 }
 0x7a2   : > { %v2494_v26 = vsel %vm1863_vm0, %v6612_v24, 0.0 }
 0x7a3   : > { %2495 = vadd.xlane.f32.xlu0 %v2494_v26  ;;  %v2491_v27 = vsel %vm1863_vm0, %v6615_v25, 0.0 }
 0x7a4   : > { %2492 = vadd.xlane.f32.xlu1 %v2491_v27 }
 0x830   : > { %v2496_v28 = vpop.xlane.xlu0 %2495 }
 0x831   : > { %v2498_v29 = vmul.f32 0.03125, %v2496_v28  ;;  %v2493_v30 = vpop.xlane.xlu1 %2492 }
 0x832   : > { %v2497_v60 = vmul.f32 0.03125, %v2493_v30 }
 0x833   : > { %v2500_v61 = vsub.f32 %v6612_v24, %v2498_v29 }
 0x834   : > { %v2499_v31 = vsub.f32 %v6615_v25, %v2497_v60 }
 0x835   : > { %v2502_v32 = vmul.f32 %v2500_v61, %v2500_v61 }
 0x836   : > { %v2501_v33 = vmul.f32 %v2499_v31, %v2499_v31 }
 0x837   : > { %v2506_v34 = vsel %vm1863_vm0, %v2502_v32, 0.0 }
 0x838   : > { %2507 = vadd.xlane.f32.xlu1 %v2506_v34  ;;  %v2503_v35 = vsel %vm1863_vm0, %v2501_v33, 0.0 }
 0x839   : > { %2504 = vadd.xlane.f32.xlu0 %v2503_v35 }
 0x8c5   : > { %v2508_v43 = vpop.xlane.xlu1 %2507 }
 0x8c6   : > { %v2510_v44 = vmul.f32 0.03125, %v2508_v43  ;;  %v2505_v45 = vpop.xlane.xlu0 %2504 }
 0x8c7   : > { %v2509_v46 = vmul.f32 0.03125, %v2505_v45 }
 0x8c8   : > { %v2512_v47 = vadd.f32 1e-05, %v2510_v44 }
 0x8c9   : > { %v2511_v48 = vadd.f32 1e-05, %v2509_v46 }
 0x8ca   : > { %5878 = vrsqrt.f32 %v2512_v47  ;;  %v6129_v47 = vmov 0.0|0.0  }
 0x8cb   : > { %5880 = vrsqrt.f32 %v2511_v48  ;;  %5610 = vmatprep.subr.bf16.mxu1 %v6129_v47  ;;  %v6131_v48 = vmov 0.0  }
 0x8d4   : > { %v5879_v49 = vpop.eup %5878 }
 0x8d5   : > { %v5881_v51 = vpop.eup %5880  ;;  %v2516_v52 = vmul.f32 %v5879_v49, %v2500_v61 }
 0x8d6   : > { %v2515_v54 = vmul.f32 %v5881_v51, %v2499_v31 }
 0x8d7   : > { %v2524_v55 = vmul.f32 %v5029_v50, %v2516_v52 }
 0x8d8   : > { %v2523_v56 = vmul.f32 %v5029_v50, %v2515_v54  ;;  %v2925_v54 = vld [vmem:[%s7099_s2 + $0x8] sm:$0xff] }
 0x8d9   : > { %v2532_v57 = vadd.f32 %v5030_v53, %v2524_v55 }
 0x8da   : > { %v2531_v58 = vadd.f32 %v5030_v53, %v2523_v56  ;;  %v2924_v53 = vld [vmem:[%s7099_s2] sm:$0xff]  ;;  %v2926_v56 = vld [vmem:[%s7099_s2 + $0x10] sm:$0xff] }
 0x8db   : > { %v5623_v55 = vpack.c.bf16 %v2925_v54, %v2924_v53 }
 0x8dc   : > { %v5582_v59 = vpack.c.bf16 %v2532_v57, %v2531_v58  ;;  %v2927_v57 = vld [vmem:[%s7099_s2 + $0x18] sm:$0xff] }
 0x8dd   : > { %v5626_v58 = vpack.c.bf16 %v2927_v57, %v2926_v56 }
 0x8de   : > { %5583 = vmatprep.subr.bf16.mxu0 %v5582_v59 }
 0x8df   : > { %5585 = vmatpush3.bf16.msra.mxu0 %v5582_v59 }
 0x8e0   : > { %5595 = vmatprep.subr.bf16.mxu0 %v5594_v1 }
 0x8e2   : > { %5304 = vmatmul.mubr.msk.f32.vlgmr.msra.gmra.mrb[6].mxu0 %vm1935_vm1, %v2534_v62 }
 0x8e3   : > { %5597 = vmatpush3.bf16.msra.mxu0 %v5594_v1 }
 0x8e4   : > { %5599 = vmatprep.subr.bf16.mxu0 %v5598_v6 }
 0x8e7   : > { %5601 = vmatpush3.bf16.msra.mxu0 %v5598_v6  ;;  %v3003_v6 = vld [vmem:[%s7099_s2 + $0x28] sm:$0xff]  ;;  %s7106_s2 = sld [smem:[#allocation34_spill]] }
 0x8e8   : > { %5603 = vmatprep.subr.bf16.mxu0 %v5602_v9 }
 0x8eb   : > { %5605 = vmatpush3.bf16.msra.mxu0 %v5602_v9  ;;  %v5620_v9 = vpack.c.bf16 %v3005_v8, %v3004_v7 }
 0x8ec   : > { %5607 = vmatprep.subr.bf16.mxu0 %v5606_v12 }
 0x8ef   : > { %5609 = vmatpush3.bf16.msra.mxu0 %v5606_v12 }
 0x8f0   : > { %5622 = vmatprep.subr.bf16.mxu0 %v6129_v47 }
 0x9b5   : > { %v5305_v63 = vpop.f32.mrb[6].mxu0 }
 0x9b6   : > { %v2607_v2 = vpop.f32.mrb[7].mxu0 }
 0x9b7   : > { %5314 = vmatprep.mubr.msk.f32.mxu1 %vm1863_vm0, %v2607_v2 }
 0x9b8   : > { %5315 = vmatmul.mubr.msk.f32.vlgmr.msra.gmra.mrb[6].mxu1 %vm1863_vm0, %v5305_v63 }
 0x9b9   : > { %5340 = vmatprep.mubr.msk.f32.mxu1 %vm6130_vm3, %v6131_v48 }
 0xa8b   : > { %v5316_v14 = vpop.f32.mrb[6].mxu1 }
 0xa8c   : > { %v2705_v15 = vadd.f32 %v5316_v14, %v5033_v13  ;;  %v2699_v16 = vpop.f32.mrb[7].mxu1 }
 0xa8d   : > { %v2700_v17 = vadd.f32 %v5033_v13, %v2699_v16 }
 0xa8e   : > { %v2709_v18 = vmul.f32 %v2705_v15, %v2705_v15 }
 0xa8f   : > { %v2708_v19 = vmul.f32 %v2700_v17, %v2700_v17 }
 0xa90   : > { %v2711_v20 = vmul.f32 %v2709_v18, %v2705_v15 }
 0xa91   : > { %v2710_v21 = vmul.f32 %v2708_v19, %v2700_v17 }
 0xa92   : > { %v2713_v22 = vmul.f32 0.044715, %v2711_v20 }
 0xa93   : > { %v2712_v23 = vmul.f32 0.044715, %v2710_v21 }
 0xa94   : > { %v2715_v26 = vadd.f32 %v2713_v22, %v2705_v15  ;;  %v3192_v22 = vld [vmem:[%s7104_s3 + $0x8] sm:$0xff] }
 0xa95   : > { %v2714_v27 = vadd.f32 %v2712_v23, %v2700_v17 }
 0xa96   : > { %v2717_v28 = vmul.f32 0.7978846, %v2715_v26 }
 0xa97   : > { %v2716_v29 = vmul.f32 0.7978846, %v2714_v27 }
 0xa98   : > { %5882 = vtanh.f32 %v2717_v28 }
 0xa99   : > { %5884 = vtanh.f32 %v2716_v29 }
 0xaa2   : > { %v5883_v30 = vpop.eup %5882 }
 0xaa3   : > { %v5885_v60 = vpop.eup %5884  ;;  %v2721_v61 = vadd.f32 1.0, %v5883_v30 }
 0xaa4   : > { %v2720_v31 = vadd.f32 1.0, %v5885_v60  ;;  %v3191_v60 = vld [vmem:[%s7104_s3] sm:$0xff]  ;;  %s7113_s3 = sld [smem:[#allocation42_spill]] }
 0xaa5   : > { %v2723_v32 = vmul.f32 0.5, %v2721_v61 }
 0xaa6   : > { %v2722_v33 = vmul.f32 0.5, %v2720_v31  ;;  %v3189_v31 = vld [vmem:[%s7106_s2] sm:$0xff] }
 0xaa7   : > { %v2725_v35 = vmul.f32 %v2723_v32, %v2705_v15 }
 0xaa8   : > { %v2724_v34 = vmul.f32 %v2722_v33, %v2700_v17  ;;  %v5045_v17 = vld [vmem:[%s7103_s5] ss:$0 sm:$0xff]  ;;  %s7107_s5 = sld [smem:[#allocation32_spill]] }
 0xaaa   : > { %5333 = vmatprep.mubr.msk.f32.mxu0 %vm2381_vm2, %v2724_v34 }
 0xaab   : > { %5334 = vmatmul.mubr.msk.f32.vlgmr.msra.gmra.mrb[8].mxu0 %vm2381_vm2, %v2725_v35 }
 0xaac   : > { %5369 = vmatprep.mubr.msk.f32.mxu0 %vm6130_vm3, %v6131_v48  ;;  %5624 = vmatpush3.bf16.msra.mxu0 %v5623_v55 }
 0xaad   : > { %5625 = vmatprep.subr.bf16.mxu0 %v6129_v47 }
 0xab0   : > { %5627 = vmatpush3.bf16.msra.mxu0 %v5626_v58 }
 0xab1   : > { %5632 = vmatprep.subr.bf16.mxu0 %v6129_v47 }
 0xb7e   : > { %v5335_v37 = vpop.f32.mrb[8].mxu0 }
 0xb7f   : > { %v2819_v38 = vadd.f32 %v5335_v37, %v5036_v36  ;;  %v2813_v39 = vpop.f32.mrb[9].mxu0 }
 0xb80   : > { %v2814_v40 = vadd.f32 %v5036_v36, %v2813_v39  ;;  %v5046_v36 = vld [vmem:[%s7107_s5] ss:$0 sm:$0xff]  ;;  %s7111_s5 = sld [smem:[#allocation38_spill]] }
 0xb81   : > { %v5040_v41 = vmul.f32 -1.442695, %v2819_v38 }
 0xb82   : > { %v5039_v42 = vmul.f32 -1.442695, %v2814_v40 }
 0xb83   : > { %5886 = vpow2.f32 %v5040_v41  ;;  %v3190_v41 = vld [vmem:[%s7106_s2 + $0x8] sm:$0xff]  ;;  %s7112_s2 = sld [smem:[#allocation39_spill]] }
 0xb84   : > { %5888 = vpow2.f32 %v5039_v42  ;;  %v3303_v42 = vld [vmem:[%s7109_s13] sm:$0xff] }
 0xb8d   : > { %v5887_v43 = vpop.eup %5886 }
 0xb8e   : > { %v5889_v44 = vpop.eup %5888  ;;  %v2829_v45 = vadd.f32 1.0, %v5887_v43 }
 0xb8f   : > { %v2828_v46 = vadd.f32 1.0, %v5889_v44 }
 0xb90   : > { %5890 = vrcp.f32 %v2829_v45 }
 0xb91   : > { %5892 = vrcp.f32 %v2828_v46 }
 0xb9a   : > { %v5891_v49 = vpop.eup %5890 }
 0xb9b   : > { %v5893_v50 = vpop.eup %5892  ;;  %v2835_v51 = vmul.f32 %v5891_v49, %v2819_v38 }
 0xb9c   : > { %v2834_v52 = vmul.f32 %v5893_v50, %v2814_v40 }
 0xb9d   : > { %2840 = vrot.lane.b32.xlu1 %v2835_v51, %s7100_s1 }
 0xb9e   : > { %2838 = vrot.lane.b32.xlu0 %v2834_v52, %s7100_s1 }
 0xc0f   : > { %v2841_v59 = vpop.permute.xlu1 %2840 }
 0xc10   : > { %v2845_v62 = vmul.f32 %v2841_v59, %v2819_v38  ;;  %v2839_v63 = vpop.permute.xlu0 %2838  ;;  %v5047_v38 = vld [vmem:[%s7108_s11] ss:$0 sm:$0xff]  ;;  %s7110_s11 = sld [smem:[#allocation40_spill]] }
 0xc11   : > { %v2844_v2 = vmul.f32 %v2839_v63, %v2814_v40 }
 0xc12   : > { %v2847_v3 = vadd.f32 %v2845_v62, %v6612_v24  ;;  %v2928_v24 = vld [vmem:[%s7102_s8] sm:$0xff]  ;;  %s7105_s8 = sld [smem:[#allocation37_spill]] }
 0xc13   : > { %v2846_v4 = vadd.f32 %v2844_v2, %v6615_v25  ;;  %v5617_v25 = vpack.c.bf16 %v3003_v6, %v3002_v0 }
 0xc14   : > { %2849 = vst.msk [vmem:[%s6669_s9 + $0x8] sm:$0xff] %vm1863_vm0, %v2847_v3 }
 0xc15   : > { %2848 = vst.msk [vmem:[%s6669_s9] sm:$0xff] %vm1863_vm0, %v2846_v4  ;;  %v5611_v1 = vpack.c.bf16 %v2847_v3, %v2846_v4 }
 0xc17   : > { %5612 = vmatpush3.bf16.msra.mxu1 %v5611_v1 }
 0xc18   : > { %5613 = vmatprep.subr.bf16.mxu1 %v6129_v47  ;;  %v3306_v23 = vld [vmem:[%s7105_s8 + $0x8] sm:$0xff]  ;;  %v3305_v61 = vld [vmem:[%s7105_s8] sm:$0xff]  ;;  %s7119_s8 = sld [smem:[#allocation46_spill]] }
 0xc1a   : > { %5341 = vmatmul.mubr.msk.f32.vlgmr.msra.gmra.mrb[8].mxu1 %vm1935_vm1, %v2850_v5 }
 0xc1b   : > { %5615 = vmatpush3.bf16.msra.mxu1 %v5611_v1  ;;  %5347 = vmatprep.mubr.msk.f32.mxu1 %vm6130_vm3, %v6131_v48 }
 0xc1c   : > { %5616 = vmatprep.subr.bf16.mxu1 %v6129_v47 }
 0xc1e   : > { %5348 = vmatmul.mubr.msk.f32.vlgmr.msra.gmra.mrb[10].mxu1 %vm1935_vm1, %v2928_v24 }
 0xc1f   : > { %5618 = vmatpush3.bf16.msra.mxu1 %v5617_v25  ;;  %5358 = vmatprep.mubr.msk.f32.mxu1 %vm6130_vm3, %v6131_v48  ;;  %v3304_v25 = vld [vmem:[%s7109_s13 + $0x8] sm:$0xff]  ;;  %s7137_s13 = sld [smem:[#allocation66_spill]] }
 0xc20   : > { %5619 = vmatprep.subr.bf16.mxu1 %v6129_v47 }
 0xc23   : > { %5621 = vmatpush3.bf16.msra.mxu1 %v5620_v9 }
 0xced   : > { %v2920_v10 = vpop.f32.mrb[8].mxu1 }
 0xcee   : > { %v5342_v11 = vpop.f32.mrb[9].mxu1  ;;  %5370 = vmatmul.mubr.msk.f32.vlgmr.msra.gmra.mrb[10].mxu0 %vm1863_vm0, %v2920_v10 }
 0xcef   : > { %5392 = vmatprep.mubr.msk.f32.mxu0 %vm6130_vm3, %v6131_v48 }
 0xcf1   : > { %v2998_v12 = vpop.f32.mrb[10].mxu1 }
 0xcf2   : > { %v5349_v13 = vpop.f32.mrb[11].mxu1  ;;  %5359 = vmatmul.mubr.msk.f32.vlgmr.msra.gmra.mrb[12].mxu1 %vm1863_vm0, %v2998_v12 }
 0xcf3   : > { %5374 = vmatprep.mubr.msk.f32.mxu1 %vm3203_vm4, %v3189_v31 }
 0xdc1   : > { %v3148_v14 = vpop.f32.mrb[10].mxu0 }
 0xdc2   : > { %v5371_v15 = vpop.f32.mrb[11].mxu0 }
 0xdc5   : > { %v3075_v16 = vpop.f32.mrb[12].mxu1 }
 0xdc6   : > { %v3149_v18 = vadd.f32 %v3148_v14, %v3075_v16  ;;  %v5360_v19 = vpop.f32.mrb[13].mxu1 }
 0xdc8   : > { %v6695_v20 = vadd.f32 %v5045_v17, %v3149_v18 }
 0xdca   : > { %v3162_v21 = vsel %vm1863_vm0, %v6695_v20, 0.0 }
 0xdcb   : > { %3163 = vadd.xlane.f32.xlu1 %v3162_v21 }
 0xddc   : > { %3200 = vperm.xlu1 %5841, %v3192_v22  }
 0xde0   : > { %3314 = vperm.xlu1 %5841, %v3306_v23  }
 0xe58   : > { %v3164_v26 = vpop.xlane.xlu1 %3163 }
 0xe59   : > { %v3165_v27 = vmul.f32 0.03125, %v3164_v26 }
 0xe5b   : > { %v3166_v28 = vsub.f32 %v6695_v20, %v3165_v27 }
 0xe5c   : > { %v3201_v43 = vpop.permute.xlu1 %3200 }
 0xe5d   : > { %v3167_v29 = vmul.f32 %v3166_v28, %v3166_v28 }
 0xe5f   : > { %v3168_v30 = vsel %vm1863_vm0, %v3167_v29, 0.0  ;;  %v3436_v29 = vld [vmem:[%s7110_s11] sm:$0xff] }
 0xe60   : > { %3169 = vadd.xlane.f32.xlu0 %v3168_v30  ;;  %v3315_v7 = vpop.permute.xlu1 %3314  ;;  %v3437_v30 = vld [vmem:[%s7110_s11 + $0x8] sm:$0xff] }
 0xe76   : > { %3195 = vperm.xlu0 %5840, %v3191_v60   ;;  %v5633_v60 = vpack.c.bf16 %v3437_v30, %v3436_v29 }
 0xe78   : > { %5634 = vmatpush3.bf16.msra.mxu0 %v5633_v60 }
 0xe79   : > { %5635 = vmatprep.subr.bf16.mxu0 %v6129_v47 }
 0xe7a   : > { %3309 = vperm.xlu0 %5840, %v3305_v61   ;;  %v3439_v61 = vld [vmem:[%s7110_s11 + $0x18] sm:$0xff] }
 0xeed   : > { %v3170_v32 = vpop.xlane.xlu0 %3169 }
 0xeee   : > { %v3171_v33 = vmul.f32 0.03125, %v3170_v32 }
 0xef0   : > { %v3172_v34 = vadd.f32 1e-05, %v3171_v33 }
 0xef2   : > { %5894 = vrsqrt.f32 %v3172_v34 }
 0xef5   : > { %v3196_v45 = vpop.permute.xlu0 %3195 }
 0xef9   : > { %v3310_v15 = vpop.permute.xlu0 %3309 }
 0xefc   : > { %v5895_v35 = vpop.eup %5894 }
 0xefd   : > { %v3174_v37 = vmul.f32 %v5895_v35, %v3166_v28 }
 0xeff   : > { %v3181_v39 = vmul.f32 %v5046_v36, %v3174_v37  ;;  %v5053_v36 = vld [vmem:[%s7111_s5] ss:$0 sm:$0xff]  ;;  %s7114_s5 = sld [smem:[#allocation41_spill]] }
 0xf01   : > { %v3188_v40 = vadd.f32 %v5047_v38, %v3181_v39  ;;  %v5054_v38 = vld [vmem:[%s7112_s2] ss:$0 sm:$0xff]  ;;  %s7115_s2 = sld [smem:[#allocation43_spill]] }
 0xf03   : > { %5372 = vmatprep.subr.mxu1 %v3188_v40 }
 0xf04   : > { %5373 = vmatpush3.msra.mxu1 %v3188_v40 }
 0xf05   : > { %5375 = vmatmul.mubr.msk.f32.vlgmr.msra.gmra.mrb[14].mxu1 %vm3203_vm4, %v3190_v41  ;;  %v3529_v41 = vld [vmem:[%s7113_s3] sm:$0xff] }
 0xf06   : > { %5381 = vmatprep.mubr.msk.f32.mxu1 %vm1935_vm1, %v3303_v42  ;;  %v3530_v42 = vld [vmem:[%s7113_s3 + $0x8] sm:$0xff] }
 0xfd8   : > { %v5376_v44 = vpop.f32.mrb[14].mxu1 }
 0xfd9   : > { %v3282_v46 = vadd.f32 %v5376_v44, %v3201_v43  ;;  %v3276_v49 = vpop.f32.mrb[15].mxu1  ;;  %v5639_v43 = vpack.c.bf16 %v3530_v42, %v3529_v41  ;;  %v3531_v44 = vld [vmem:[%s7113_s3 + $0x10] sm:$0xff] }
 0xfda   : > { %v3277_v50 = vadd.f32 %v3276_v49, %v3196_v45  ;;  %v3532_v45 = vld [vmem:[%s7113_s3 + $0x18] sm:$0xff]  ;;  %v3533_v49 = vld [vmem:[%s7113_s3 + $0x20] sm:$0xff] }
 0xfdb   : > { %v3286_v51 = vmul.f32 %v3282_v46, %v3282_v46 }
 0xfdc   : > { %v3285_v52 = vmul.f32 %v3277_v50, %v3277_v50 }
 0xfdd   : > { %v3288_v53 = vmul.f32 %v3286_v51, %v3282_v46 }
 0xfde   : > { %v3287_v54 = vmul.f32 %v3285_v52, %v3277_v50  ;;  %v3535_v52 = vld [vmem:[%s7113_s3 + $0x30] sm:$0xff] }
 0xfdf   : > { %v3290_v55 = vmul.f32 0.044715, %v3288_v53  ;;  %v3536_v53 = vld [vmem:[%s7113_s3 + $0x38] sm:$0xff] }
 0xfe0   : > { %v3289_v56 = vmul.f32 0.044715, %v3287_v54  ;;  %v5648_v54 = vpack.c.bf16 %v3536_v53, %v3535_v52 }
 0xfe1   : > { %v3292_v57 = vadd.f32 %v3290_v55, %v3282_v46  ;;  %v5055_v55 = vld [vmem:[%s7114_s5] ss:$0 sm:$0xff]  ;;  %s7116_s5 = sld [smem:[#allocation44_spill]] }
 0xfe2   : > { %v3291_v58 = vadd.f32 %v3289_v56, %v3277_v50 }
 0xfe3   : > { %v3294_v59 = vmul.f32 0.7978846, %v3292_v57 }
 0xfe4   : > { %v3293_v62 = vmul.f32 0.7978846, %v3291_v58 }
 0xfe5   : > { %5896 = vtanh.f32 %v3294_v59 }
 0xfe6   : > { %5898 = vtanh.f32 %v3293_v62 }
 0xfe7   : > { %v5060_v29 = vld [vmem:[%s7116_s5] ss:$0 sm:$0xff]  ;;  %s7122_s5 = sld [smem:[#allocation50_spill]] }
 0xfef   : > { %v5897_v63 = vpop.eup %5896 }
 0xff0   : > { %v5899_v2 = vpop.eup %5898  ;;  %v3298_v3 = vadd.f32 1.0, %v5897_v63 }
 0xff1   : > { %v3297_v4 = vadd.f32 1.0, %v5899_v2 }
 0xff2   : > { %v3300_v1 = vmul.f32 0.5, %v3298_v3 }
 0xff3   : > { %v3299_v5 = vmul.f32 0.5, %v3297_v4 }
 0xff4   : > { %v3302_v0 = vmul.f32 %v3300_v1, %v3282_v46  ;;  %v5642_v46 = vpack.c.bf16 %v3532_v45, %v3531_v44 }
 0xff5   : > { %v3301_v6 = vmul.f32 %v3299_v5, %v3277_v50  ;;  %v3534_v50 = vld [vmem:[%s7113_s3 + $0x28] sm:$0xff]  ;;  %s7118_s3 = sld [smem:[#allocation47_spill]] }
 0xff6   : > { %v5645_v51 = vpack.c.bf16 %v3534_v50, %v3533_v49 }
 0xff7   : > { %v5628_v24 = vpack.c.bf16 %v3302_v0, %v3301_v6  ;;  %v5057_v6 = vld [vmem:[%s7115_s2] ss:$0 sm:$0xff]  ;;  %s7117_s2 = sld [smem:[#allocation45_spill]] }
 0xff9   : > { %5629 = vmatprep.subr.bf16.mxu1 %v5628_v24 }
 0xffa   : > { %5631 = vmatpush3.bf16.msra.mxu1 %v5628_v24 }
 0xffb   : > { %5638 = vmatprep.subr.bf16.mxu1 %v6129_v47 }
 0xffd   : > { %5382 = vmatmul.mubr.msk.f32.vlgmr.msra.gmra.mrb[16].mxu1 %vm1935_vm1, %v3304_v25  ;;  %v5061_v60 = vld [vmem:[%s7117_s2] ss:$0 sm:$0xff]  ;;  %s7123_s2 = sld [smem:[#allocation53_spill]] }
 0xffe   : > { %5411 = vmatprep.mubr.msk.f32.mxu1 %vm6130_vm3, %v6131_v48  ;;  %5640 = vmatpush3.bf16.msra.mxu1 %v5639_v43 }
 0xfff   : > { %5641 = vmatprep.subr.bf16.mxu1 %v6129_v47 }
0x1002   : > { %5643 = vmatpush3.bf16.msra.mxu1 %v5642_v46 }
0x1003   : > { %5644 = vmatprep.subr.bf16.mxu1 %v6129_v47 }
0x1006   : > { %5646 = vmatpush3.bf16.msra.mxu1 %v5645_v51 }
0x1007   : > { %5647 = vmatprep.subr.bf16.mxu1 %v6129_v47 }
0x100a   : > { %5649 = vmatpush3.bf16.msra.mxu1 %v5648_v54 }
0x100b   : > { %5656 = vmatprep.subr.bf16.mxu1 %v6129_v47 }
0x10d0   : > { %v5383_v8 = vpop.f32.mrb[16].mxu1 }
0x10d1   : > { %v3395_v9 = vadd.f32 %v5383_v8, %v3315_v7  ;;  %v3389_v10 = vpop.f32.mrb[17].mxu1 }
0x10d2   : > { %v3390_v17 = vadd.f32 %v3389_v10, %v3310_v15 }
0x10d3   : > { %v5052_v11 = vmul.f32 -1.442695, %v3395_v9 }
0x10d5   : > { %5900 = vpow2.f32 %v5052_v11 }
0x10df   : > { %v5901_v12 = vpop.eup %5900 }
0x10e0   : > { %v3401_v13 = vadd.f32 1.0, %v5901_v12 }
0x10e2   : > { %5902 = vrcp.f32 %v3401_v13 }
0x10ec   : > { %v5903_v14 = vpop.eup %5902 }
0x10ed   : > { %v3404_v16 = vmul.f32 %v5903_v14, %v3395_v9 }
0x10ef   : > { %v3405_v18 = vmul.f32 %v3404_v16, %v3390_v17 }
0x10f1   : > { %v6719_v19 = vadd.f32 %v3405_v18, %v6695_v20  ;;  %v3438_v20 = vld [vmem:[%s7110_s11 + $0x10] sm:$0xff]  ;;  %s7120_s11 = sld [smem:[#allocation49_spill]] }
0x10f2   : > { %v5636_v31 = vpack.c.bf16 %v3439_v61, %v3438_v20  ;;  %v3733_v20 = vld [vmem:[%s7118_s3] sm:$0xff]  ;;  %v3734_v61 = vld [vmem:[%s7118_s3 + $0x8] sm:$0xff] }
0x10f3   : > { %v3409_v21 = vsel %vm1863_vm0, %v6719_v19, 0.0 }
0x10f4   : > { %3410 = vadd.xlane.f32.xlu1 %v3409_v21  ;;  %5637 = vmatpush3.bf16.msra.mxu0 %v5636_v31 }
0x10f5   : > { %5414 = vmatprep.subr.mxu0 %v6131_v48 }
0x10f7   : > { %v3827_v41 = vld [vmem:[%s7120_s11 + $0x8] sm:$0xff]  ;;  %v3828_v43 = vld [vmem:[%s7120_s11 + $0x10] sm:$0xff]  ;;  %v3829_v44 = vld [vmem:[%s7120_s11 + $0x18] sm:$0xff] }
0x10f8   : > { %v5660_v45 = vpack.c.bf16 %v3829_v44, %v3828_v43  ;;  %v3830_v46 = vld [vmem:[%s7120_s11 + $0x20] sm:$0xff]  ;;  %v3831_v49 = vld [vmem:[%s7120_s11 + $0x28] sm:$0xff]  ;;  %v3832_v51 = vld [vmem:[%s7120_s11 + $0x30] sm:$0xff] }
0x10f9   : > { %v5663_v50 = vpack.c.bf16 %v3831_v49, %v3830_v46  ;;  %v3833_v52 = vld [vmem:[%s7120_s11 + $0x38] sm:$0xff] }
0x10fa   : > { %v5666_v53 = vpack.c.bf16 %v3833_v52, %v3832_v51 }
0x1181   : > { %v3411_v22 = vpop.xlane.xlu1 %3410 }
0x1182   : > { %v3412_v23 = vmul.f32 0.03125, %v3411_v22 }
0x1184   : > { %v3413_v26 = vsub.f32 %v6719_v19, %v3412_v23 }
0x1186   : > { %v3414_v27 = vmul.f32 %v3413_v26, %v3413_v26 }
0x1188   : > { %v3415_v28 = vsel %vm1863_vm0, %v3414_v27, 0.0 }
0x1189   : > { %3416 = vadd.xlane.f32.xlu0 %v3415_v28 }
0x1216   : > { %v3417_v32 = vpop.xlane.xlu0 %3416 }
0x1217   : > { %v3418_v33 = vmul.f32 0.03125, %v3417_v32 }
0x1219   : > { %v3419_v34 = vadd.f32 1e-05, %v3418_v33  ;;  %v3659_v33 = vld [vmem:[%s7119_s8] sm:$0xff]  ;;  %s7121_s8 = sld [smem:[#allocation48_spill]] }
0x121b   : > { %5904 = vrsqrt.f32 %v3419_v34  ;;  %v5651_v34 = vpack.c.bf16 %v3734_v61, %v3733_v20 }
0x121f   : > { %v5063_v54 = vld [vmem:[%s7121_s8] ss:$0 sm:$0xff]  ;;  %s7124_s8 = sld [smem:[#allocation51_spill]] }
0x1225   : > { %v5905_v35 = vpop.eup %5904 }
0x1226   : > { %v3421_v37 = vmul.f32 %v5905_v35, %v3413_v26  ;;  %v3735_v35 = vld [vmem:[%s7118_s3 + $0x10] sm:$0xff] }
0x1228   : > { %v3428_v39 = vmul.f32 %v5053_v36, %v3421_v37  ;;  %v3736_v36 = vld [vmem:[%s7118_s3 + $0x18] sm:$0xff]  ;;  %s5003_s3 = sshll.u32 %s6664_s4, 3 }
0x1229   : > { %v5654_v37 = vpack.c.bf16 %v3736_v36, %v3735_v35 }
0x122a   : > { %v3435_v40 = vadd.f32 %v5054_v38, %v3428_v39 }
0x122c   : > { %5393 = vmatmul.mubr.msk.f32.vlgmr.msra.gmra.mrb[12].mxu0 %vm1863_vm0, %v3435_v40  ;;  %v3826_v40 = vld [vmem:[%s7120_s11] sm:$0xff]  ;;  %s6806_s11 = scalar_lea.vmem [#allocation6], %s5003_s3  ;;  %s7126_s3 = sld [smem:[#allocation54_spill]] }
0x122d   : > { %5416 = vmatprep.mubr.msk.f32.mxu0 %vm6130_vm3, %v6131_v48  ;;  %v5657_v42 = vpack.c.bf16 %v3827_v41, %v3826_v40 }
0x1232   : > { %v5072_v36 = vld [vmem:[%s7126_s3] ss:$0 sm:$0xff]  ;;  %s7129_s3 = sld [smem:[#allocation56_spill]] }
0x12ff   : > { %v3516_v56 = vpop.f32.mrb[12].mxu0 }
0x1300   : > { %v3517_v57 = vadd.f32 %v5055_v55, %v3516_v56  ;;  %v5394_v58 = vpop.f32.mrb[13].mxu0 }
0x1302   : > { %v3520_v59 = vmul.f32 %v3517_v57, %v3517_v57 }
0x1304   : > { %v3521_v62 = vmul.f32 %v3520_v59, %v3517_v57 }
0x1306   : > { %v3522_v63 = vmul.f32 0.044715, %v3521_v62 }
0x1308   : > { %v3523_v2 = vadd.f32 %v3522_v63, %v3517_v57 }
0x130a   : > { %v3524_v3 = vmul.f32 0.7978846, %v3523_v2 }
0x130c   : > { %5906 = vtanh.f32 %v3524_v3 }
0x1316   : > { %v5907_v4 = vpop.eup %5906 }
0x1317   : > { %v3526_v1 = vadd.f32 1.0, %v5907_v4 }
0x1319   : > { %v3527_v5 = vmul.f32 0.5, %v3526_v1 }
0x131b   : > { %v3528_v0 = vmul.f32 %v3527_v5, %v3517_v57 }
0x131d   : > { %5412 = vmatmul.mubr.msk.f32.vlgmr.msra.gmra.mrb[18].mxu1 %vm2381_vm2, %v3528_v0  ;;  %v5065_v0 = vld [vmem:[%s7122_s5] ss:$0 sm:$0xff]  ;;  %s7125_s5 = sld [smem:[#allocation52_spill]] }
0x131e   : > { %5446 = vmatprep.mubr.msk.f32.mxu1 %vm6130_vm3, %v6131_v48  ;;  %5658 = vmatpush3.bf16.msra.mxu1 %v5657_v42 }
0x131f   : > { %5659 = vmatprep.subr.bf16.mxu1 %v6129_v47 }
0x1322   : > { %5661 = vmatpush3.bf16.msra.mxu1 %v5660_v45 }
0x1323   : > { %5662 = vmatprep.subr.bf16.mxu1 %v6129_v47 }
0x1326   : > { %5664 = vmatpush3.bf16.msra.mxu1 %v5663_v50 }
0x1327   : > { %5665 = vmatprep.subr.bf16.mxu1 %v6129_v47 }
0x132a   : > { %5667 = vmatpush3.bf16.msra.mxu1 %v5666_v53 }
0x132b   : > { %5674 = vmatprep.subr.bf16.mxu1 %v6129_v47 }
0x13f0   : > { %v3613_v24 = vpop.f32.mrb[18].mxu1 }
0x13f1   : > { %v3614_v25 = vadd.f32 %v5057_v6, %v3613_v24  ;;  %v5413_v7 = vpop.f32.mrb[19].mxu1 }
0x13f3   : > { %v5059_v8 = vmul.f32 -1.442695, %v3614_v25 }
0x13f5   : > { %5908 = vpow2.f32 %v5059_v8 }
0x13ff   : > { %v5909_v9 = vpop.eup %5908 }
0x1400   : > { %v3620_v10 = vadd.f32 1.0, %v5909_v9 }
0x1402   : > { %5910 = vrcp.f32 %v3620_v10  ;;  %v4002_v10 = vld [vmem:[%s7123_s2] sm:$0xff] }
0x140c   : > { %v5911_v11 = vpop.eup %5910 }
0x140d   : > { %v3623_v12 = vmul.f32 %v5911_v11, %v3614_v25  ;;  %v4003_v11 = vld [vmem:[%s7123_s2 + $0x8] sm:$0xff] }
0x140f   : > { %3625 = vrot.lane.b32.xlu0 %v3623_v12, %s7100_s1 }
0x1481   : > { %v3626_v13 = vpop.permute.xlu0 %3625 }
0x1482   : > { %v3628_v14 = vmul.f32 %v3626_v13, %v3614_v25  ;;  %v5675_v13 = vpack.c.bf16 %v4003_v11, %v4002_v10 }
0x1484   : > { %v6755_v15 = vadd.f32 %v3628_v14, %v6719_v19  ;;  %v4004_v14 = vld [vmem:[%s7123_s2 + $0x10] sm:$0xff] }
0x1486   : > { %v3632_v16 = vsel %vm1863_vm0, %v6755_v15, 0.0 }
0x1487   : > { %3633 = vadd.xlane.f32.xlu1 %v3632_v16  ;;  %v4005_v16 = vld [vmem:[%s7123_s2 + $0x18] sm:$0xff] }
0x1514   : > { %v3634_v17 = vpop.xlane.xlu1 %3633 }
0x1515   : > { %v3635_v18 = vmul.f32 0.03125, %v3634_v17 }
0x1517   : > { %v3636_v21 = vsub.f32 %v6755_v15, %v3635_v18  ;;  %v5678_v18 = vpack.c.bf16 %v4005_v16, %v4004_v14 }
0x1519   : > { %v3637_v22 = vmul.f32 %v3636_v21, %v3636_v21 }
0x151b   : > { %v3638_v23 = vsel %vm1863_vm0, %v3637_v22, 0.0 }
0x151c   : > { %3639 = vadd.xlane.f32.xlu1 %v3638_v23 }
0x15a9   : > { %v3640_v19 = vpop.xlane.xlu1 %3639 }
0x15aa   : > { %v3641_v26 = vmul.f32 0.03125, %v3640_v19  ;;  %v3928_v19 = vld [vmem:[%s7124_s8] sm:$0xf]  ;;  %s7127_s8 = sld [smem:[#allocation57_spill]] }
0x15ac   : > { %v3642_v27 = vadd.f32 1e-05, %v3641_v26  ;;  %v4080_v26 = vld [vmem:[%s7123_s2 + $0x20] sm:$0xff] }
0x15ae   : > { %5912 = vrsqrt.f32 %v3642_v27  ;;  %v4081_v27 = vld [vmem:[%s7123_s2 + $0x28] sm:$0xff] }
0x15b0   : > { %v4268_v46 = vld [vmem:[%s7127_s8] sm:$0xff]  ;;  %v4269_v49 = vld [vmem:[%s7127_s8 + $0x8] sm:$0xff]  ;;  %v4270_v51 = vld [vmem:[%s7127_s8 + $0x10] sm:$0xff] }
0x15b1   : > { %v5681_v50 = vpack.c.bf16 %v4269_v49, %v4268_v46  ;;  %v4271_v52 = vld [vmem:[%s7127_s8 + $0x18] sm:$0xff]  ;;  %s7131_s8 = sld [smem:[#allocation58_spill]] }
0x15b2   : > { %v5684_v53 = vpack.c.bf16 %v4271_v52, %v4270_v51 }
0x15b7   : > { %v5075_v11 = vld [vmem:[%s7131_s8] ss:$0 sm:$0xff]  ;;  %s7133_s8 = sld [smem:[#allocation61_spill]] }
0x15b8   : > { %v5913_v28 = vpop.eup %5912 }
0x15b9   : > { %v3644_v30 = vmul.f32 %v5913_v28, %v3636_v21  ;;  %v5669_v28 = vpack.c.bf16 %v4081_v27, %v4080_v26 }
0x15bb   : > { %v3651_v31 = vmul.f32 %v5060_v29, %v3644_v30  ;;  %v4082_v29 = vld [vmem:[%s7123_s2 + $0x30] sm:$0xff]  ;;  %v4083_v30 = vld [vmem:[%s7123_s2 + $0x38] sm:$0xff]  ;;  %s7130_s2 = sld [smem:[#allocation59_spill]] }
0x15bd   : > { %v3658_v32 = vadd.f32 %v5061_v60, %v3651_v31  ;;  %v5672_v60 = vpack.c.bf16 %v4083_v30, %v4082_v29  ;;  %v5080_v46 = vld [vmem:[%s7133_s8] ss:$0 sm:$0xff]  ;;  %s4788_s8 = sshll.u32 %s6669_s9, 4  ;;  %s6905_s8 = int_to_ptr.vmem [resolvable:$true] %s4788_s8 }
0x15bf   : > { %5415 = vmatpush3.msra.mxu0 %v3658_v32 }
0x15c0   : > { %5417 = vmatmul.mubr.msk.f32.vlgmr.msra.gmra.mrb[14].mxu0 %vm3203_vm4, %v3659_v33  ;;  %5650 = vmatprep.subr.bf16.mxu0 %v6129_v47 }
0x15c1   : > { %5652 = vmatpush3.bf16.msra.mxu0 %v5651_v34  ;;  %5427 = vmatprep.mubr.msk.f32.mxu0 %vm6130_vm3, %v6131_v48 }
0x15c2   : > { %5653 = vmatprep.subr.bf16.mxu0 %v6129_v47 }
0x15c5   : > { %5655 = vmatpush3.bf16.msra.mxu0 %v5654_v37 }
0x15c6   : > { %5449 = vmatprep.subr.mxu0 %v6131_v48 }
0x1693   : > { %v3729_v38 = vpop.f32.mrb[14].mxu0 }
0x1694   : > { %v5418_v39 = vpop.f32.mrb[15].mxu0  ;;  %5428 = vmatmul.mubr.msk.f32.vlgmr.msra.gmra.mrb[16].mxu0 %vm1863_vm0, %v3729_v38 }
0x1695   : > { %5451 = vmatprep.mubr.msk.f32.mxu0 %vm6130_vm3, %v6131_v48 }
0x1767   : > { %v3813_v55 = vpop.f32.mrb[16].mxu0 }
0x1768   : > { %v3814_v56 = vadd.f32 %v5063_v54, %v3813_v55  ;;  %v5429_v57 = vpop.f32.mrb[17].mxu0 }
0x176a   : > { %v3817_v58 = vmul.f32 %v3814_v56, %v3814_v56 }
0x176c   : > { %v3818_v59 = vmul.f32 %v3817_v58, %v3814_v56 }
0x176e   : > { %v3819_v62 = vmul.f32 0.044715, %v3818_v59 }
0x1770   : > { %v3820_v63 = vadd.f32 %v3819_v62, %v3814_v56  ;;  %v5074_v62 = vld [vmem:[%s7129_s3] ss:$0 sm:$0xff]  ;;  %s7134_s3 = sld [smem:[#allocation62_spill]] }
0x1772   : > { %v3821_v2 = vmul.f32 0.7978846, %v3820_v63 }
0x1774   : > { %5914 = vtanh.f32 %v3821_v2 }
0x177e   : > { %v5915_v3 = vpop.eup %5914 }
0x177f   : > { %v3823_v4 = vadd.f32 1.0, %v5915_v3  ;;  %v4361_v3 = vld [vmem:[%s7130_s2] sm:$0xff] }
0x1781   : > { %v3824_v1 = vmul.f32 0.5, %v3823_v4  ;;  %v4362_v4 = vld [vmem:[%s7130_s2 + $0x8] sm:$0xff] }
0x1783   : > { %v3825_v5 = vmul.f32 %v3824_v1, %v3814_v56  ;;  %v5687_v1 = vpack.c.bf16 %v4362_v4, %v4361_v3  ;;  %v4664_v3 = vld [vmem:[%s7137_s13 + $0x8] sm:$0xff] }
0x1785   : > { %5447 = vmatmul.mubr.msk.f32.vlgmr.msra.gmra.mrb[20].mxu1 %vm2381_vm2, %v3825_v5  ;;  %v4363_v5 = vld [vmem:[%s7130_s2 + $0x10] sm:$0xff] }
0x1786   : > { %5478 = vmatprep.mubr.msk.f32.mxu1 %vm6130_vm3, %v6131_v48  ;;  %5676 = vmatpush3.bf16.msra.mxu1 %v5675_v13 }
0x1787   : > { %5677 = vmatprep.subr.bf16.mxu1 %v6129_v47 }
0x178a   : > { %5679 = vmatpush3.bf16.msra.mxu1 %v5678_v18 }
0x178b   : > { %5686 = vmatprep.subr.bf16.mxu1 %v6129_v47 }
0x1858   : > { %v3910_v6 = vpop.f32.mrb[20].mxu1 }
0x1859   : > { %v3911_v24 = vadd.f32 %v5065_v0, %v3910_v6  ;;  %v5448_v25 = vpop.f32.mrb[21].mxu1  ;;  %v4364_v0 = vld [vmem:[%s7130_s2 + $0x18] sm:$0xff] }
0x185a   : > { %v5690_v6 = vpack.c.bf16 %v4364_v0, %v4363_v5  ;;  %v4366_v25 = vld [vmem:[%s7130_s2 + $0x28] sm:$0xff]  ;;  %v4666_v5 = vld [vmem:[%s7137_s13 + $0x18] sm:$0xff] }
0x185b   : > { %v5067_v7 = vmul.f32 -1.442695, %v3911_v24 }
0x185d   : > { %5916 = vpow2.f32 %v5067_v7 }
0x1867   : > { %v5917_v8 = vpop.eup %5916 }
0x1868   : > { %v3917_v9 = vadd.f32 1.0, %v5917_v8  ;;  %v4367_v8 = vld [vmem:[%s7130_s2 + $0x30] sm:$0xff] }
0x186a   : > { %5918 = vrcp.f32 %v3917_v9  ;;  %v4368_v9 = vld [vmem:[%s7130_s2 + $0x38] sm:$0xff] }
0x186b   : > { %v5696_v10 = vpack.c.bf16 %v4368_v9, %v4367_v8  ;;  %v5084_v9 = vld [vmem:[#allocation2] ss:$0 sm:$0xff] }
0x1874   : > { %v5919_v12 = vpop.eup %5918 }
0x1875   : > { %v3920_v17 = vmul.f32 %v5919_v12, %v3911_v24 }
0x1877   : > { %3922 = vrot.lane.b32.xlu1 %v3920_v17, %s7100_s1 }
0x18e9   : > { %v3923_v21 = vpop.permute.xlu1 %3922 }
0x18ea   : > { %v3925_v22 = vmul.f32 %v3923_v21, %v3911_v24  ;;  %v4365_v24 = vld [vmem:[%s7130_s2 + $0x20] sm:$0xff]  ;;  %s7136_s2 = sld [smem:[#allocation63_spill]] }
0x18eb   : > { %v5693_v7 = vpack.c.bf16 %v4366_v25, %v4365_v24  ;;  %v4668_v24 = vld [vmem:[%s7137_s13 + $0x28] sm:$0xff] }
0x18ec   : > { %v3926_v23 = vadd.f32 %v3925_v22, %v6755_v15  ;;  %v4006_v15 = vld [vmem:[%s7125_s5] sm:$0xf]  ;;  %s7128_s5 = sld [smem:[#allocation55_spill]] }
0x18ee   : > { %5450 = vmatpush3.msra.mxu0 %v3926_v23  ;;  %3927 = vst.msk [vmem:[%s6806_s11] sm:$0xff] %vm1863_vm0, %v3926_v23 }
0x18ef   : > { %5452 = vmatmul.mubr.msk.f32.vlgmr.msra.gmra.mrb[18].mxu0 %vm3203_vm4, %v3928_v19  ;;  %5454 = vmatprep.subr.mxu0 %v6131_v48 }
0x18f0   : > { %5455 = vmatpush3.msra.mxu0 %v3926_v23  ;;  %5456 = vmatprep.mubr.msk.f32.mxu0 %vm6130_vm3, %v6131_v48 }
0x18f1   : > { %5668 = vmatprep.subr.bf16.mxu0 %v6129_v47 }
0x18f2   : > { %v5073_v58 = vld [vmem:[%s7128_s5] ss:$0 sm:$0xff]  ;;  %s7132_s5 = sld [smem:[#allocation60_spill]] }
0x18f3   : > { %5457 = vmatmul.mubr.msk.f32.vlgmr.msra.gmra.mrb[20].mxu0 %vm3203_vm4, %v4006_v15 }
0x18f4   : > { %5670 = vmatpush3.bf16.msra.mxu0 %v5669_v28  ;;  %5467 = vmatprep.mubr.msk.f32.mxu0 %vm6130_vm3, %v6131_v48 }
0x18f5   : > { %5671 = vmatprep.subr.bf16.mxu0 %v6129_v47 }
0x18f8   : > { %5673 = vmatpush3.bf16.msra.mxu0 %v5672_v60  ;;  %v5077_v15 = vld [vmem:[%s7132_s5] ss:$0 sm:$0xff]  ;;  %s7135_s5 = sld [smem:[#allocation64_spill]] }
0x18f9   : > { %5680 = vmatprep.subr.bf16.mxu0 %v6129_v47 }
0x18fe   : > { %v4570_v51 = vld [vmem:[%s7135_s5] sm:$0xff]  ;;  %v4571_v52 = vld [vmem:[%s7135_s5 + $0x8] sm:$0xff] }
0x19c2   : > { %v3998_v20 = vpop.f32.mrb[18].mxu0 }
0x19c3   : > { %v5453_v61 = vpop.f32.mrb[19].mxu0  ;;  %5479 = vmatmul.mubr.msk.f32.vlgmr.msra.gmra.mrb[22].mxu1 %vm1863_vm0, %v3998_v20 }
0x19c4   : > { %5508 = vmatprep.mubr.msk.f32.mxu1 %vm6130_vm3, %v6131_v48  ;;  %5688 = vmatpush3.bf16.msra.mxu1 %v5687_v1  ;;  %v4665_v1 = vld [vmem:[%s7137_s13 + $0x10] sm:$0xff] }
0x19c5   : > { %5689 = vmatprep.subr.bf16.mxu1 %v6129_v47  ;;  %v5708_v0 = vpack.c.bf16 %v4666_v5, %v4665_v1 }
0x19c6   : > { %v4076_v31 = vpop.f32.mrb[20].mxu0 }
0x19c7   : > { %v5458_v32 = vpop.f32.mrb[21].mxu0  ;;  %5468 = vmatmul.mubr.msk.f32.vlgmr.msra.gmra.mrb[22].mxu0 %vm1863_vm0, %v4076_v31 }
0x19c8   : > { %5489 = vmatprep.mubr.msk.f32.mxu0 %vm6130_vm3, %v6131_v48  ;;  %5682 = vmatpush3.bf16.msra.mxu0 %v5681_v50  ;;  %v5081_v50 = vld [vmem:[%s7134_s3] ss:$0 sm:$0xff] }
0x19c9   : > { %5683 = vmatprep.subr.bf16.mxu0 %v6129_v47  ;;  %5691 = vmatpush3.bf16.msra.mxu1 %v5690_v6  ;;  %v4667_v6 = vld [vmem:[%s7137_s13 + $0x20] sm:$0xff] }
0x19ca   : > { %5692 = vmatprep.subr.bf16.mxu1 %v6129_v47  ;;  %v5711_v25 = vpack.c.bf16 %v4668_v24, %v4667_v6 }
0x19cc   : > { %5685 = vmatpush3.bf16.msra.mxu0 %v5684_v53 }
0x19cd   : > { %5511 = vmatprep.subr.mxu0 %v6131_v48  ;;  %5694 = vmatpush3.bf16.msra.mxu1 %v5693_v7  ;;  %v4670_v7 = vld [vmem:[%s7137_s13 + $0x38] sm:$0xff] }
0x19ce   : > { %5695 = vmatprep.subr.bf16.mxu1 %v6129_v47 }
0x19d1   : > { %5697 = vmatpush3.bf16.msra.mxu1 %v5696_v10 }
0x1a96   : > { %v4226_v33 = vpop.f32.mrb[22].mxu1 }
0x1a97   : > { %v5480_v34 = vpop.f32.mrb[23].mxu1 }
0x1a9a   : > { %v4153_v35 = vpop.f32.mrb[22].mxu0 }
0x1a9b   : > { %v4227_v37 = vadd.f32 %v4226_v33, %v4153_v35  ;;  %v5469_v38 = vpop.f32.mrb[23].mxu0 }
0x1a9d   : > { %v6830_v39 = vadd.f32 %v5072_v36, %v4227_v37 }
0x1a9f   : > { %v4241_v40 = vsel %vm4240_vm5, %v6830_v39, 0.0 }
0x1aa0   : > { %4242 = vadd.xlane.f32.xlu0 %v4241_v40 }
0x1b2d   : > { %v4243_v41 = vpop.xlane.xlu0 %4242 }
0x1b2e   : > { %v4244_v42 = vmul.f32 0.03125, %v4243_v41 }
0x1b30   : > { %v4245_v43 = vsub.f32 %v6830_v39, %v4244_v42 }
0x1b32   : > { %v4246_v44 = vmul.f32 %v4245_v43, %v4245_v43 }
0x1b34   : > { %v4247_v45 = vsel %vm4240_vm5, %v4246_v44, 0.0 }
0x1b35   : > { %4248 = vadd.xlane.f32.xlu1 %v4247_v45 }
0x1bc2   : > { %v4249_v54 = vpop.xlane.xlu1 %4248 }
0x1bc3   : > { %v4250_v55 = vmul.f32 0.03125, %v4249_v54 }
0x1bc5   : > { %v4251_v56 = vadd.f32 1e-05, %v4250_v55  ;;  %v4491_v55 = vld [vmem:[%s7136_s2] sm:$0xf]  ;;  %s5097_s2 = sshll.u32 %s6477_s0, 8 }
0x1bc6   : > { %s6903_s3 = scalar_lea.hbm %s6444_s27, %s5097_s2 }
0x1bc7   : > { %5920 = vrsqrt.f32 %v4251_v56  ;;  %v5699_v56 = vpack.c.bf16 %v4571_v52, %v4570_v51 }
0x1bd1   : > { %v5921_v57 = vpop.eup %5920 }
0x1bd2   : > { %v4253_v59 = vmul.f32 %v5921_v57, %v4245_v43  ;;  %v4572_v57 = vld [vmem:[%s7135_s5 + $0x10] sm:$0xff] }
0x1bd4   : > { %v4260_v63 = vmul.f32 %v5073_v58, %v4253_v59  ;;  %v4573_v58 = vld [vmem:[%s7135_s5 + $0x18] sm:$0xff]  ;;  %s4766_s5 = scalar_lea.sflag [#allocation4], %s6664_s4 }
0x1bd5   : > { %v5702_v59 = vpack.c.bf16 %v4573_v58, %v4572_v57 }
0x1bd6   : > { %v4267_v2 = vadd.f32 %v5074_v62, %v4260_v63 }
0x1bd8   : > { %5490 = vmatmul.mubr.msk.f32.vlgmr.msra.gmra.mrb[24].mxu0 %vm1863_vm0, %v4267_v2  ;;  %v4663_v2 = vld [vmem:[%s7137_s13] sm:$0xff] }
0x1bd9   : > { %5513 = vmatprep.mubr.msk.f32.mxu0 %vm6130_vm3, %v6131_v48  ;;  %v5705_v4 = vpack.c.bf16 %v4664_v3, %v4663_v2 }
0x1cab   : > { %v4348_v12 = vpop.f32.mrb[24].mxu0 }
0x1cac   : > { %v4349_v13 = vadd.f32 %v5075_v11, %v4348_v12  ;;  %v5491_v14 = vpop.f32.mrb[25].mxu0 }
0x1cae   : > { %v4352_v16 = vmul.f32 %v4349_v13, %v4349_v13 }
0x1cb0   : > { %v4353_v17 = vmul.f32 %v4352_v16, %v4349_v13 }
0x1cb2   : > { %v4354_v18 = vmul.f32 0.044715, %v4353_v17 }
0x1cb4   : > { %v4355_v21 = vadd.f32 %v4354_v18, %v4349_v13 }
0x1cb6   : > { %v4356_v22 = vmul.f32 0.7978846, %v4355_v21 }
0x1cb8   : > { %5922 = vtanh.f32 %v4356_v22 }
0x1cc2   : > { %v5923_v23 = vpop.eup %5922 }
0x1cc3   : > { %v4358_v19 = vadd.f32 1.0, %v5923_v23 }
0x1cc5   : > { %v4359_v26 = vmul.f32 0.5, %v4358_v19  ;;  %v5086_v19 = vld [vmem:[%s7138_s6] ss:$0 sm:$0xff]  ;;  %s5964_s6 = scalar_lea.vmem %s6905_s8, 256 }
0x1cc6   : > { %p5965_p5 = scmp.ne.s32.totalorder %s6905_s8, %s5964_s6 }
0x1cc7   : > { %v4360_v27 = vmul.f32 %v4359_v26, %v4349_v13 }
0x1cc8   : > { %p5966_p9 = pnand %p5965_p5, %p7139_p6 }
0x1cc9   : > { %5509 = vmatmul.mubr.msk.f32.vlgmr.msra.gmra.mrb[24].mxu1 %vm2381_vm2, %v4360_v27 }
0x1cca   : > { %p5967_p10 = pneg %p5966_p9 }
0x1d9c   : > { %v4445_v28 = vpop.f32.mrb[24].mxu1 }
0x1d9d   : > { %v4446_v29 = vadd.f32 %v5077_v15, %v4445_v28  ;;  %v5510_v30 = vpop.f32.mrb[25].mxu1 }
0x1d9f   : > { %v5079_v60 = vmul.f32 -1.442695, %v4446_v29 }
0x1da1   : > { %5924 = vpow2.f32 %v5079_v60 }
0x1dab   : > { %v5925_v20 = vpop.eup %5924 }
0x1dac   : > { %v4452_v61 = vadd.f32 1.0, %v5925_v20 }
0x1dae   : > { %5926 = vrcp.f32 %v4452_v61 }
0x1db8   : > { %v5927_v31 = vpop.eup %5926 }
0x1db9   : > { %v4455_v32 = vmul.f32 %v5927_v31, %v4446_v29 }
0x1dbb   : > { %4457 = vrot.lane.b32.xlu0 %v4455_v32, %s7100_s1 }
0x1e2d   : > { %v4458_v33 = vpop.permute.xlu0 %4457 }
0x1e2e   : > { %v4460_v34 = vmul.f32 %v4458_v33, %v4446_v29 }
0x1e30   : > { %v6863_v35 = vadd.f32 %v4460_v34, %v6830_v39 }
0x1e32   : > { %v4464_v36 = vsel %vm4240_vm5, %v6863_v35, 0.0 }
0x1e33   : > { %4465 = vadd.xlane.f32.xlu1 %v4464_v36 }
0x1ec0   : > { %v4466_v37 = vpop.xlane.xlu1 %4465 }
0x1ec1   : > { %v4467_v38 = vmul.f32 0.03125, %v4466_v37 }
0x1ec3   : > { %v4468_v40 = vsub.f32 %v6863_v35, %v4467_v38 }
0x1ec5   : > { %v4469_v41 = vmul.f32 %v4468_v40, %v4468_v40 }
0x1ec7   : > { %v4470_v42 = vsel %vm4240_vm5, %v4469_v41, 0.0 }
0x1ec8   : > { %4471 = vadd.xlane.f32.xlu1 %v4470_v42 }
0x1f55   : > { %v4472_v43 = vpop.xlane.xlu1 %4471 }
0x1f56   : > { %v4473_v39 = vmul.f32 0.03125, %v4472_v43 }
0x1f58   : > { %v4474_v44 = vadd.f32 1e-05, %v4473_v39 }
0x1f5a   : > { %5928 = vrsqrt.f32 %v4474_v44 }
0x1f64   : > { %v5929_v45 = vpop.eup %5928 }
0x1f65   : > { %v4476_v49 = vmul.f32 %v5929_v45, %v4468_v40 }
0x1f67   : > { %v4483_v53 = vmul.f32 %v5080_v46, %v4476_v49 }
0x1f69   : > { %v4490_v54 = vadd.f32 %v5081_v50, %v4483_v53 }
0x1f6b   : > { %5512 = vmatpush3.msk.msra.mxu0 %vm4496_vm6, %v4490_v54 }
0x1f6c   : > { %5514 = vmatmul.mubr.msk.f32.vlgmr.msra.gmra.mrb[26].mxu0 %vm4492_vm7, %v4491_v55  ;;  %5698 = vmatprep.subr.bf16.mxu0 %v6129_v47 }
0x1f6d   : > { %5700 = vmatpush3.bf16.msra.mxu0 %v5699_v56  ;;  %5524 = vmatprep.mubr.msk.f32.mxu0 %vm6130_vm3, %v6131_v48 }
0x1f6e   : > { %5701 = vmatprep.subr.bf16.mxu0 %v6129_v47 }
0x1f71   : > { %5703 = vmatpush3.bf16.msra.mxu0 %v5702_v59 }
0x1f72   : > { %5704 = vmatprep.subr.bf16.mxu0 %v6129_v47 }
0x203f   : > { %v4566_v62 = vpop.f32.mrb[26].mxu0 }
0x2040   : > { %5525 = vmatmul.mubr.msk.f32.vlgmr.msra.gmra.mrb[28].mxu0 %vm1863_vm0, %v4566_v62  ;;  %v5515_v63 = vpop.f32.mrb[27].mxu0 }
0x2041   : > { %5543 = vmatprep.mubr.msk.f32.mxu0 %vm6130_vm3, %v6131_v48  ;;  %5706 = vmatpush3.bf16.msra.mxu0 %v5705_v4  ;;  %v4669_v48 = vld [vmem:[%s7137_s13 + $0x30] sm:$0xff]  ;;  %s6132_s13 = smov [#allocation5]  }
0x2042   : > { %5707 = vmatprep.subr.bf16.mxu0 %v6129_v47  ;;  %v5714_v8 = vpack.c.bf16 %v4670_v7, %v4669_v48  ;;  %s5968_s14 = sshll.u32 %s6132_s13, 4  ;;  %s5969_s14 = int_to_ptr.vmem [resolvable:$false] %s5968_s14 }
0x2043   : > { %s5970_s17 = scalar_lea.vmem %s5969_s14, 512  ;;  %p5971_p12 = scmp.lt.s32.totalorder %s6905_s8, %s5969_s14 }
0x2044   : > { %p5972_p3 = scmp.lt.s32.totalorder %s5970_s17, %s5964_s6 }
0x2045   : > { %5709 = vmatpush3.bf16.msra.mxu0 %v5708_v0 }
0x2046   : > { %5710 = vmatprep.subr.bf16.mxu0 %v6129_v47  ;;  %p5973_p4 = por %p5972_p3, %p5971_p12 }
0x2048   : > { %p5974_p7 = pnand %p5973_p4, %p5967_p10 }
0x2049   : > { %5712 = vmatpush3.bf16.msra.mxu0 %v5711_v25 }
0x204a   : > { %5713 = vmatprep.subr.bf16.mxu0 %v6129_v47 }
0x204d   : > { %5715 = vmatpush3.bf16.msra.mxu0 %v5714_v8 }
0x2113   : > { %v4650_v10 = vpop.f32.mrb[28].mxu0 }
0x2114   : > { %v4651_v11 = vadd.f32 %v5084_v9, %v4650_v10  ;;  %v5526_v12 = vpop.f32.mrb[29].mxu0 }
0x2116   : > { %v4654_v13 = vmul.f32 %v4651_v11, %v4651_v11 }
0x2118   : > { %v4655_v14 = vmul.f32 %v4654_v13, %v4651_v11 }
0x211a   : > { %v4656_v16 = vmul.f32 0.044715, %v4655_v14 }
0x211c   : > { %v4657_v17 = vadd.f32 %v4656_v16, %v4651_v11 }
0x211e   : > { %v4658_v18 = vmul.f32 0.7978846, %v4657_v17 }
0x2120   : > { %5930 = vtanh.f32 %v4658_v18 }
0x212a   : > { %v5931_v21 = vpop.eup %5930 }
0x212b   : > { %v4660_v47 = vadd.f32 1.0, %v5931_v21 }
0x212d   : > { %v4661_v22 = vmul.f32 0.5, %v4660_v47 }
0x212f   : > { %v4662_v23 = vmul.f32 %v4661_v22, %v4651_v11 }
0x2131   : > { %5544 = vmatmul.mubr.msk.f32.vlgmr.msra.gmra.mrb[30].mxu0 %vm2381_vm2, %v4662_v23 }
0x2204   : > { %v4747_v26 = vpop.f32.mrb[30].mxu0 }
0x2205   : > { %v6897_v27 = vadd.f32 %v5086_v19, %v4747_v26  ;;  %v5545_v15 = vpop.f32.mrb[31].mxu0 }
0x2207   : > { %v5088_v28 = vmul.f32 -1.442695, %v6897_v27 }
0x2209   : > { %5932 = vpow2.f32 %v5088_v28 }
0x2213   : > { %v5933_v29 = vpop.eup %5932 }
0x2214   : > { %v4754_v30 = vadd.f32 1.0, %v5933_v29 }
0x2216   : > { %5934 = vrcp.f32 %v4754_v30 }
0x2217   : > { %5977 = shalt.err (!%p5974_p7)
}
0x2218   : > { %s5978_s9 = scalar_lea.hbm %s6903_s3, 256  ;;  %s5982_s13 = scalar_lea.hbm %s6444_s27, 512 }
0x2219   : > { %p5979_p8 = scmp.ne.s32.totalorder %s6903_s3, %s5978_s9  ;;  %p5983_p1 = scmp.lt.u32.totalorder %s6903_s3, %s6444_s27 }
0x221a   : > { %p5984_p2 = scmp.lt.u32.totalorder %s5982_s13, %s5978_s9  ;;  %p5986_p5 = scmp.lt.u32.totalorder %s5978_s9, %s6903_s3 }
0x221b   : > { %p5980_p11 = pnand %p5979_p8, %p7139_p6 }
0x221c   : > { %p5985_p0 = por %p5984_p2, %p5983_p1 }
0x221d   : > { %p5981_p13 = pneg %p5980_p11 }
0x221e   : > { %p5987_p9 = por %p5986_p5, %p5985_p0 }
0x2220   : > { %p5988_p10 = pnand %p5987_p9, %p5981_p13 }
0x2222   : > { %5991 = shalt.err (!%p5988_p10)
}
0x2223   : > { %s6133_s17 = smov 128   ;;  %s6134_s14 = smov 8  }
0x2224   : > { %5720 = dma.vmem_to_hbm [thread:$0]  (%p7139_p6), %s6905_s8, 256, %s6903_s3, %s4766_s5, %s6133_s17, %s6133_s17, %s6134_s14  }
0x2225   : > { %s5093_s6 = sshll.u32 %s6477_s0, 7  ;;  %s4804_s2 = sshll.u32 %s6806_s11, 4  ;;  %s4805_s2 = int_to_ptr.vmem [resolvable:$true] %s4804_s2 }
0x2226   : > { %s6930_s9 = scalar_lea.hbm %s6449_s20, %s5093_s6  ;;  %s4771_s13 = scalar_lea.sflag [#allocation7], %s6664_s4 }
0x2227   : > { %s5992_s19 = scalar_lea.vmem %s4805_s2, 128  ;;  %s6135_s21 = smov [#allocation6]  }
0x2228   : > { %p5993_p12 = scmp.ne.s32.totalorder %s4805_s2, %s5992_s19  ;;  %s5996_s23 = sshll.u32 %s6135_s21, 4  ;;  %s5997_s23 = int_to_ptr.vmem [resolvable:$false] %s5996_s23 }
0x2229   : > { %s5998_s24 = scalar_lea.vmem %s5997_s23, 256  ;;  %p5999_p7 = scmp.lt.s32.totalorder %s4805_s2, %s5997_s23 }
0x222a   : > { %p5994_p3 = pnand %p5993_p12, %p7139_p6  ;;  %p6000_p8 = scmp.lt.s32.totalorder %s5998_s24, %s5992_s19 }
0x222c   : > { %p5995_p4 = pneg %p5994_p3  ;;  %p6001_p11 = por %p6000_p8, %p5999_p7 }
0x222e   : > { %p6002_p13 = pnand %p6001_p11, %p5995_p4 }
0x2230   : > { %6005 = shalt.err (!%p6002_p13)
}
0x2231   : > { %s6006_s4 = scalar_lea.hbm %s6930_s9, 128  ;;  %s6010_s21 = scalar_lea.hbm %s6449_s20, 256 }
0x2232   : > { %p6007_p1 = scmp.ne.s32.totalorder %s6930_s9, %s6006_s4  ;;  %p6011_p5 = scmp.lt.u32.totalorder %s6930_s9, %s6449_s20 }
0x2233   : > { %p6012_p9 = scmp.lt.u32.totalorder %s6010_s21, %s6006_s4  ;;  %p6014_p12 = scmp.lt.u32.totalorder %s6006_s4, %s6930_s9 }
0x2234   : > { %p6008_p2 = pnand %p6007_p1, %p7139_p6 }
0x2235   : > { %p6013_p10 = por %p6012_p9, %p6011_p5 }
0x2236   : > { %p6009_p0 = pneg %p6008_p2 }
0x2237   : > { %p6015_p3 = por %p6014_p12, %p6013_p10 }
0x2239   : > { %p6016_p4 = pnand %p6015_p3, %p6009_p0 }
0x223b   : > { %6019 = shalt.err (!%p6016_p4)
}
0x223c   : > { %5721 = dma.vmem_to_hbm [thread:$0]  (%p7139_p6), %s4805_s2, 128, %s6930_s9, %s4771_s13   ;;  %v5935_v60 = vpop.eup %5934 }
0x223d   : > { %v4757_v20 = vmul.f32 %v5935_v60, %v6897_v27  ;;  %s5006_s19 = sshll.u32 %s6533_s18, 2 }
0x223e   : > { %s1858_s24 = scalar_lea.vmem %s6454_s12, %s5006_s19 }
0x223f   : > { %4759 = vrot.lane.b32.xlu1 %v4757_v20, %s7100_s1 }
0x22b1   : > { %v4760_v61 = vpop.permute.xlu1 %4759 }
0x22b2   : > { %v4762_v31 = vmul.f32 %v4760_v61, %v6897_v27 }
0x22b4   : > { %v4763_v32 = vadd.f32 %v4762_v31, %v6863_v35 }
0x22b6   : > { %4764 = vst.msk [vmem:[%s1858_s24] sm:$0xf] %vm4240_vm5, %v4763_v32 }
0x22b7 PF: > { %p5737_p7 = scmp.ge.s32.totalorder %s6062_s22, 2  ;;  %s4819_s0 = sand.u32 1, %s6050_s15  }
0x22b8   : > { %p7140_p6 = scmp.ne.s32.totalorder %s7080_s10, 0  ;;  %s4820_s7 = scalar_lea.sflag [#allocation4], %s4819_s0 }
0x22ba   : > { %p5729_p8 = pnand %p5737_p7, %p7140_p6 }
0x22bc   : > { %6041 = dma.done.wait (!%p5729_p8), %s4820_s7, 256  }
0x22bd   : > { %6043 = vsyncadd (!%p5729_p8), %s4820_s7, 4294967040  ;;  %s4829_s18 = scalar_lea.sflag [#allocation7], %s4819_s0 }
0x22be   : > { %6045 = dma.done.wait (!%p5729_p8), %s4829_s18, 128  }
0x22bf   : > { %6047 = vsyncadd (!%p5729_p8), %s4829_s18, 4294967168  ;;  %s7141_s23 = sld [smem:[#allocation68_spill]]  ;;  %s7142_s18 = sld [smem:[#allocation69_spill]] }
0x22c0   : > { %p140_p11 = scmp.ge.s32.totalorder %s6481_s26, 4   ;;  %s7143_s15 = smov %s6054_s16 }
0x22c1   : > { %s7145_s22 = smov %s6481_s26 }
0x22c2   :  { %142 = sbr.rel (!%p140_p11) target bundleno = 150 (0x96), region = 391 }
0x22c5   : > { %s7144_s16 = smov %s7141_s23 }
0x22c9   :  { %4841 = vsyncpa [#allocation3], 1 }
0x22ca   :  { %4843 = vsyncpa [#allocation3 + $0x1], 1 }
0x22cb   :  { %4844 = vsyncpa [#allocation4], 1 }
0x22cc   :  { %4846 = vsyncpa [#allocation4 + $0x1], 1 }
0x22cd   :  { %4847 = vsyncpa [#allocation7], 1 }
0x22ce   :  { %4849 = vsyncpa [#allocation7 + $0x1], 1 }

</bundles_post_ra>
